<compile_context>
chip_gen: v5e
topology: v5e:2x2
jax: 0.10.0
libtpu: 0.0.40
codegen_flags: <defaults>
</compile_context>

<pallas_src>
import functools

import jax
import jax.numpy as jnp
from jax.experimental import pallas as pl
from jax.experimental.pallas import tpu as pltpu


# ----------------------------------------------------------------------------
# Kernel
# ----------------------------------------------------------------------------
def _mlp_kernel(x_ref,
                w1_ref, b1_ref,
                w2_ref, b2_ref,
                w3_ref, b3_ref,
                w4_ref, b4_ref,
                o_ref):
    cdt = w1_ref.dtype                       # compute dtype of MXU operands
    x = x_ref[...].astype(cdt)               # in-kernel cast; no-op for f32

    # layer 1: Linear (+ folded BN) -> ReLU
    h = jnp.dot(x, w1_ref[...], preferred_element_type=jnp.float32) + b1_ref[...]
    h = jnp.maximum(h, 0.0).astype(cdt)

    # layer 2
    h = jnp.dot(h, w2_ref[...], preferred_element_type=jnp.float32) + b2_ref[...]
    h = jnp.maximum(h, 0.0).astype(cdt)

    # layer 3
    h = jnp.dot(h, w3_ref[...], preferred_element_type=jnp.float32) + b3_ref[...]
    h = jnp.maximum(h, 0.0)                  # keep f32 for the final reduction

    # Output layer (out_features = 1): stay off the MXU.  Transpose h (XLU,
    # otherwise-idle slot) so the batch lands on the lane axis, multiply by the
    # (H3, 1) weight column (VPU) and reduce over sublanes -> a lane-dense
    # (1, tile_b) row, stored with one unmasked vst instead of masked column
    # stores.
    ht = h.T                                             # (H3, tile_b) f32
    logits = jnp.sum(ht * w4_ref[...], axis=0, keepdims=True) + b4_ref[0]
    o_ref[...] = jax.nn.sigmoid(logits).astype(o_ref.dtype)


# ----------------------------------------------------------------------------
# Wrapper
# ----------------------------------------------------------------------------
@functools.partial(jax.jit, static_argnames=("tile_b",))
def mlp_forward(x, fp, tile_b=256):
    """x: [B, input_size] f32.  fp: folded params (see fold_bn).

    tile_b=256 gives grid=2 for B=512 (one step per v7x TensorCore); on
    single-TC chips (v5e/v6e) tile_b may be raised up to the padded batch.
    """
    B, D_in = x.shape
    H1 = fp["w1"].shape[1]
    H2 = fp["w2"].shape[1]
    H3 = fp["w3"].shape[1]

    n_tiles = pl.cdiv(B, tile_b)             # ragged batches: partial last
    Bp = n_tiles * tile_b                    # block, no jnp.pad HBM pass

    w1, w2, w3 = fp["w1"], fp["w2"], fp["w3"]
    b1, b2, b3 = fp["b1"], fp["b2"], fp["b3"]
    w4, b4 = fp["w4"], fp["b4"]              # (H3, 1) f32, (1,) f32

    def full(arr):
        # whole-array block, grid-invariant VMEM resident
        return pl.BlockSpec(arr.shape, lambda i: (0,) * arr.ndim)

    in_specs = [
        pl.BlockSpec((tile_b, D_in), lambda i: (i, 0)),      # x tile
        full(w1), full(b1),
        full(w2), full(b2),
        full(w3), full(b3),
        full(w4),
        pl.BlockSpec(memory_space=pltpu.MemorySpace.SMEM),   # b4 scalar
    ]
    # Lane-dense output: one (1, tile_b) row per grid step.
    out_spec = pl.BlockSpec((1, tile_b), lambda i: (0, i))

    param_bytes = sum(int(a.size) * a.dtype.itemsize
                      for a in (w1, b1, w2, b2, w3, b3, w4, b4))
    cost = pl.CostEstimate(
        flops=2 * Bp * (D_in * H1 + H1 * H2 + H2 * H3 + H3 * 1),
        transcendentals=Bp,                                  # sigmoid
        bytes_accessed=int(x.size) * x.dtype.itemsize + param_bytes + Bp * 4,
    )

    # VMEM footprint at tile_b=256: x tile (<=1 MB f32) double-buffered +
    # weights (<=1.2 MB f32) + intermediates -> well under every generation's
    # scoped default, so no explicit vmem_limit_bytes is needed.
    out = pl.pallas_call(
        _mlp_kernel,
        out_shape=jax.ShapeDtypeStruct((1, Bp), jnp.float32),
        grid_spec=pltpu.PrefetchScalarGridSpec(
            num_scalar_prefetch=0,
            grid=(n_tiles,),
            in_specs=in_specs,
            out_specs=out_spec,
        ),
        compiler_params=pltpu.CompilerParams(
            dimension_semantics=("parallel",)),
        cost_estimate=cost,
    )(x, w1, b1, w2, b2, w3, b3, w4, b4)

    return out[0, :B].reshape(B, 1)


# ----------------------------------------------------------------------------
# Parameters: raw (PyTorch-like) + BN folding
# ----------------------------------------------------------------------------
def init_params(key, input_size=1024, h1=256, h2=128, h3=64):
    """Raw parameters: Linear weights [in, out], biases (1, out), BN stats."""
    ks = iter(jax.random.split(key, 32))

    def lin(fan_in, fan_out):
        bound = 1.0 / jnp.sqrt(fan_in)
        w = jax.random.uniform(next(ks), (fan_in, fan_out), jnp.float32, -bound, bound)
        b = jax.random.uniform(next(ks), (1, fan_out), jnp.float32, -bound, bound)
        return w, b

    def bn(n):
        g = 1.0 + 0.1 * jax.random.normal(next(ks), (1, n), jnp.float32)
        be = 0.1 * jax.random.normal(next(ks), (1, n), jnp.float32)
        m = 0.1 * jax.random.normal(next(ks), (1, n), jnp.float32)
        v = jnp.abs(1.0 + 0.1 * jax.random.normal(next(ks), (1, n), jnp.float32))
        return g, be, m, v

    p = {}
    p["w1"], p["b1"] = lin(input_size, h1)
    p["g1"], p["be1"], p["m1"], p["v1"] = bn(h1)
    p["w2"], p["b2"] = lin(h1, h2)
    p["g2"], p["be2"], p["m2"], p["v2"] = bn(h2)
    p["w3"], p["b3"] = lin(h2, h3)
    p["g3"], p["be3"], p["m3"], p["v3"] = bn(h3)
    p["w4"], p["b4"] = lin(h3, 1)
    return p


def fold_bn(p, eps=1e-5, weight_dtype=jnp.float32):
    """Fold eval-mode BatchNorm into the preceding Linear.

    Weights w1..w3 are pre-cast once to `weight_dtype` (bf16 is a strict win
    on v5e/v6e/v7x MXUs); biases and the output layer stay f32.
    """
    def fold(w, b, g, be, m, v):
        scale = g / jnp.sqrt(v + eps)                        # (1, H)
        return (w * scale).astype(weight_dtype), (b - m) * scale + be

    fp = {}
    fp["w1"], fp["b1"] = fold(p["w1"], p["b1"], p["g1"], p["be1"], p["m1"], p["v1"])
    fp["w2"], fp["b2"] = fold(p["w2"], p["b2"], p["g2"], p["be2"], p["m2"], p["v2"])
    fp["w3"], fp["b3"] = fold(p["w3"], p["b3"], p["g3"], p["be3"], p["m3"], p["v3"])
    fp["w4"] = p["w4"]                    # (H3, 1) column, f32 (VPU/XLU path)
    fp["b4"] = p["b4"].reshape(1)         # scalar, lives in SMEM
    return fp


# ----------------------------------------------------------------------------
# Pure-JAX reference (uses the raw, un-folded BN parameters)
# ----------------------------------------------------------------------------
def mlp_reference(x, p, eps=1e-5):
    def bn(z, g, be, m, v):
        return (z - m) / jnp.sqrt(v + eps) * g + be

    h = jnp.maximum(bn(x @ p["w1"] + p["b1"], p["g1"], p["be1"], p["m1"], p["v1"]), 0.0)
    h = jnp.maximum(bn(h @ p["w2"] + p["b2"], p["g2"], p["be2"], p["m2"], p["v2"]), 0.0)
    h = jnp.maximum(bn(h @ p["w3"] + p["b3"], p["g3"], p["be3"], p["m3"], p["v3"]), 0.0)
    return jax.nn.sigmoid(h @ p["w4"] + p["b4"])


# ----------------------------------------------------------------------------
if __name__ == "__main__":
    key = jax.random.PRNGKey(0)
    kx, kp = jax.random.split(key)

    # module defaults: 1024 -> 256 -> 128 -> 64 -> 1
    B, INPUT = 512, 1024                     # grid = 2 tiles of 256 rows
    x = jax.random.normal(kx, (B, INPUT), jnp.float32)

    raw_params = init_params(kp, input_size=INPUT)
    ref = mlp_reference(x, raw_params)

    # f32-weight path
    folded_f32 = fold_bn(raw_params)
    out_f32 = jax.block_until_ready(mlp_forward(x, folded_f32, tile_b=256))
    assert out_f32.shape == (B, 1), out_f32.shape
    assert jnp.allclose(out_f32, ref, atol=1e-2), \
        "f32 kernel mismatch vs JAX reference"

    # bf16-weight MXU fast path (valid on v5e/v6e/v7x; looser tolerance)
    folded_bf16 = fold_bn(raw_params, weight_dtype=jnp.bfloat16)
    out_bf16 = jax.block_until_ready(mlp_forward(x, folded_bf16, tile_b=256))
    assert out_bf16.shape == (B, 1)
    assert jnp.allclose(out_bf16, ref, atol=5e-2), \
        "bf16 kernel mismatch vs JAX reference"

    # ragged batch (exercises the partial-last-block path, no pad HBM pass)
    out_rag = jax.block_until_ready(mlp_forward(x[:300], folded_f32, tile_b=256))
    assert out_rag.shape == (300, 1)
    assert jnp.allclose(out_rag, ref[:300], atol=1e-2), \
        "ragged-batch kernel mismatch vs JAX reference"

    print("KERNEL_OK")
</pallas_src>

<mosaic_0001>
module attributes {stable_mosaic.version = 11 : i64} {
  func.func @_mlp_kernel(%arg0: i32, %arg1: memref<256x1024xf32, #tpu.memory_space<vmem>>, %arg2: memref<1024x256xf32, #tpu.memory_space<vmem>>, %arg3: memref<1x256xf32, #tpu.memory_space<vmem>>, %arg4: memref<256x128xf32, #tpu.memory_space<vmem>>, %arg5: memref<1x128xf32, #tpu.memory_space<vmem>>, %arg6: memref<128x64xf32, #tpu.memory_space<vmem>>, %arg7: memref<1x64xf32, #tpu.memory_space<vmem>>, %arg8: memref<64x1xf32, #tpu.memory_space<vmem>>, %arg9: memref<1xf32, #tpu.memory_space<smem>>, %arg10: memref<1x256xf32, #tpu.memory_space<vmem>>) attributes {dimension_semantics = [#tpu.dimension_semantics<parallel>], iteration_bounds = array<i64: 2>, scalar_prefetch = 0 : i64, scratch_operands = 0 : i64, tpu.core_type = #tpu.core_type<tc>, window_params = [{transform_indices = @transform_0, window_bounds = array<i64: 256, 1024>}, {pipeline_mode = #tpu.pipeline_mode<synchronous>, transform_indices = @transform_1, window_bounds = array<i64: 1024, 256>}, {pipeline_mode = #tpu.pipeline_mode<synchronous>, transform_indices = @transform_2, window_bounds = array<i64: 1, 256>}, {pipeline_mode = #tpu.pipeline_mode<synchronous>, transform_indices = @transform_3, window_bounds = array<i64: 256, 128>}, {pipeline_mode = #tpu.pipeline_mode<synchronous>, transform_indices = @transform_4, window_bounds = array<i64: 1, 128>}, {pipeline_mode = #tpu.pipeline_mode<synchronous>, transform_indices = @transform_5, window_bounds = array<i64: 128, 64>}, {pipeline_mode = #tpu.pipeline_mode<synchronous>, transform_indices = @transform_6, window_bounds = array<i64: 1, 64>}, {pipeline_mode = #tpu.pipeline_mode<synchronous>, transform_indices = @transform_7, window_bounds = array<i64: 64, 1>}, {transform_indices = @transform_8, window_bounds = array<i64: 1>}, {transform_indices = @transform_9, window_bounds = array<i64: 1, 256>}]} {
    %c0 = arith.constant 0 : index
    %c0_0 = arith.constant 0 : index
    %0 = vector.load %arg1[%c0, %c0_0] : memref<256x1024xf32, #tpu.memory_space<vmem>>, vector<256x1024xf32>
    %c0_1 = arith.constant 0 : index
    %c0_2 = arith.constant 0 : index
    %1 = vector.load %arg2[%c0_1, %c0_2] : memref<1024x256xf32, #tpu.memory_space<vmem>>, vector<1024x256xf32>
    %cst = arith.constant dense<0.000000e+00> : vector<256x256xf32>
    %2 = tpu.matmul %0, %1, %cst {dimension_numbers = #tpu.dot_dimension_numbers<[1], [0], [0], [1], [0, 0, 1, 1], [], []>} : vector<256x1024xf32>, vector<1024x256xf32>, vector<256x256xf32> -> vector<256x256xf32>
    %c0_3 = arith.constant 0 : index
    %c0_4 = arith.constant 0 : index
    %3 = vector.load %arg3[%c0_3, %c0_4] : memref<1x256xf32, #tpu.memory_space<vmem>>, vector<1x256xf32>
    %4 = vector.broadcast %3 : vector<1x256xf32> to vector<256x256xf32>
    %5 = arith.addf %2, %4 : vector<256x256xf32>
    %cst_5 = arith.constant 0.000000e+00 : f32
    %6 = vector.broadcast %cst_5 : f32 to vector<256x256xf32>
    %7 = arith.maximumf %5, %6 : vector<256x256xf32>
    %c0_6 = arith.constant 0 : index
    %c0_7 = arith.constant 0 : index
    %8 = vector.load %arg4[%c0_6, %c0_7] : memref<256x128xf32, #tpu.memory_space<vmem>>, vector<256x128xf32>
    %cst_8 = arith.constant dense<0.000000e+00> : vector<256x128xf32>
    %9 = tpu.matmul %7, %8, %cst_8 {dimension_numbers = #tpu.dot_dimension_numbers<[1], [0], [0], [1], [0, 0, 1, 1], [], []>} : vector<256x256xf32>, vector<256x128xf32>, vector<256x128xf32> -> vector<256x128xf32>
    %c0_9 = arith.constant 0 : index
    %c0_10 = arith.constant 0 : index
    %10 = vector.load %arg5[%c0_9, %c0_10] : memref<1x128xf32, #tpu.memory_space<vmem>>, vector<1x128xf32>
    %11 = vector.broadcast %10 : vector<1x128xf32> to vector<256x128xf32>
    %12 = arith.addf %9, %11 : vector<256x128xf32>
    %cst_11 = arith.constant 0.000000e+00 : f32
    %13 = vector.broadcast %cst_11 : f32 to vector<256x128xf32>
    %14 = arith.maximumf %12, %13 : vector<256x128xf32>
    %c0_12 = arith.constant 0 : index
    %c0_13 = arith.constant 0 : index
    %15 = vector.load %arg6[%c0_12, %c0_13] : memref<128x64xf32, #tpu.memory_space<vmem>>, vector<128x64xf32>
    %cst_14 = arith.constant dense<0.000000e+00> : vector<256x64xf32>
    %16 = tpu.matmul %14, %15, %cst_14 {dimension_numbers = #tpu.dot_dimension_numbers<[1], [0], [0], [1], [0, 0, 1, 1], [], []>} : vector<256x128xf32>, vector<128x64xf32>, vector<256x64xf32> -> vector<256x64xf32>
    %c0_15 = arith.constant 0 : index
    %c0_16 = arith.constant 0 : index
    %17 = vector.load %arg7[%c0_15, %c0_16] : memref<1x64xf32, #tpu.memory_space<vmem>>, vector<1x64xf32>
    %18 = vector.broadcast %17 : vector<1x64xf32> to vector<256x64xf32>
    %19 = arith.addf %16, %18 : vector<256x64xf32>
    %cst_17 = arith.constant 0.000000e+00 : f32
    %20 = vector.broadcast %cst_17 : f32 to vector<256x64xf32>
    %21 = arith.maximumf %19, %20 : vector<256x64xf32>
    %22 = tpu.transpose %21, [1, 0] : vector<256x64xf32> -> vector<64x256xf32>
    %c0_18 = arith.constant 0 : index
    %c0_19 = arith.constant 0 : index
    %23 = vector.load %arg8[%c0_18, %c0_19] : memref<64x1xf32, #tpu.memory_space<vmem>>, vector<64x1xf32>
    %24 = vector.broadcast %23 : vector<64x1xf32> to vector<64x256xf32>
    %25 = arith.mulf %22, %24 : vector<64x256xf32>
    %cst_20 = arith.constant dense<0.000000e+00> : vector<256xf32>
    %26 = vector.multi_reduction <add>, %25, %cst_20 [0] : vector<64x256xf32> to vector<256xf32>
    %27 = vector.shape_cast %26 : vector<256xf32> to vector<1x256xf32>
    %c0_21 = arith.constant 0 : index
    %28 = memref.load %arg9[%c0_21] : memref<1xf32, #tpu.memory_space<smem>>
    %29 = vector.broadcast %28 : f32 to vector<1x256xf32>
    %30 = arith.addf %27, %29 : vector<1x256xf32>
    %31 = arith.negf %30 : vector<1x256xf32>
    %32 = math.exp %31 : vector<1x256xf32>
    %cst_22 = arith.constant 1.000000e+00 : f32
    %33 = vector.broadcast %cst_22 : f32 to vector<1x256xf32>
    %34 = arith.addf %33, %32 : vector<1x256xf32>
    %35 = arith.divf %33, %34 : vector<1x256xf32>
    %c0_23 = arith.constant 0 : index
    %c0_24 = arith.constant 0 : index
    %36 = vector.load %arg10[%c0_23, %c0_24] : memref<1x256xf32, #tpu.memory_space<vmem>>, vector<1x256xf32>
    tpu.vector_store %arg10[%c0_23, %c0_24], %35 {strides = array<i32>} : memref<1x256xf32, #tpu.memory_space<vmem>>, vector<1x256xf32>,
    return
  }
  func.func @transform_0(%arg0: i32) -> (i32, i32) {
    %c0_i32 = arith.constant 0 : i32
    %c0_i32_0 = arith.constant 0 : i32
    return %arg0, %c0_i32 : i32, i32
  }
  func.func @transform_1(%arg0: i32) -> (i32, i32) {
    %c0_i32 = arith.constant 0 : i32
    %c0_i32_0 = arith.constant 0 : i32
    %c0_i32_1 = arith.constant 0 : i32
    return %c0_i32, %c0_i32_0 : i32, i32
  }
  func.func @transform_2(%arg0: i32) -> (i32, i32) {
    %c0_i32 = arith.constant 0 : i32
    %c0_i32_0 = arith.constant 0 : i32
    %c0_i32_1 = arith.constant 0 : i32
    return %c0_i32, %c0_i32_0 : i32, i32
  }
  func.func @transform_3(%arg0: i32) -> (i32, i32) {
    %c0_i32 = arith.constant 0 : i32
    %c0_i32_0 = arith.constant 0 : i32
    %c0_i32_1 = arith.constant 0 : i32
    return %c0_i32, %c0_i32_0 : i32, i32
  }
  func.func @transform_4(%arg0: i32) -> (i32, i32) {
    %c0_i32 = arith.constant 0 : i32
    %c0_i32_0 = arith.constant 0 : i32
    %c0_i32_1 = arith.constant 0 : i32
    return %c0_i32, %c0_i32_0 : i32, i32
  }
  func.func @transform_5(%arg0: i32) -> (i32, i32) {
    %c0_i32 = arith.constant 0 : i32
    %c0_i32_0 = arith.constant 0 : i32
    %c0_i32_1 = arith.constant 0 : i32
    return %c0_i32, %c0_i32_0 : i32, i32
  }
  func.func @transform_6(%arg0: i32) -> (i32, i32) {
    %c0_i32 = arith.constant 0 : i32
    %c0_i32_0 = arith.constant 0 : i32
    %c0_i32_1 = arith.constant 0 : i32
    return %c0_i32, %c0_i32_0 : i32, i32
  }
  func.func @transform_7(%arg0: i32) -> (i32, i32) {
    %c0_i32 = arith.constant 0 : i32
    %c0_i32_0 = arith.constant 0 : i32
    %c0_i32_1 = arith.constant 0 : i32
    return %c0_i32, %c0_i32_0 : i32, i32
  }
  func.func @transform_8(%arg0: i32) -> i32 {
    %c0_i32 = arith.constant 0 : i32
    %c0_i32_0 = arith.constant 0 : i32
    return %c0_i32 : i32
  }
  func.func @transform_9(%arg0: i32) -> (i32, i32) {
    %c0_i32 = arith.constant 0 : i32
    %c0_i32_0 = arith.constant 0 : i32
    return %c0_i32, %arg0 : i32, i32
  }
}

</mosaic_0001>

<bundles_post_ra>
// kernel: mlp_forward.1
= control target key start
LH: loop header
LB: loop body
LE: loop exit
PB: predicated region body
PF: predicated region fallthrough
CT: control target
= control target key end

     0   :  { %s6417_s0 = inlined_call_operand.hbm [shape: f32[512,1024], index: 0, kind: input, shape index: {}]   ;;  %s6418_s1 = inlined_call_operand.hbm [shape: f32[1024,256], index: 1, kind: input, shape index: {}]   ;;  %s6419_s2 = inlined_call_operand.hbm [shape: f32[1,256], index: 2, kind: input, shape index: {}]   ;;  %s6420_s3 = inlined_call_operand.hbm [shape: f32[256,128], index: 3, kind: input, shape index: {}]   ;;  %s6421_s4 = inlined_call_operand.hbm [shape: f32[1,128], index: 4, kind: input, shape index: {}]   ;;  %s6422_s5 = inlined_call_operand.vmem [shape: f32[128,64], index: 5, kind: input, shape index: {}]   ;;  %s6423_s6 = inlined_call_operand.hbm [shape: f32[1,64], index: 6, kind: input, shape index: {}]   ;;  %s6424_s7 = inlined_call_operand.vmem [shape: f32[64,1], index: 7, kind: input, shape index: {}]   ;;  %s6425_s8 = inlined_call_operand.<no memory space> [shape: f32[1], index: 8, kind: input, shape index: {}]   ;;  %s6426_s9 = inlined_call_operand.hbm [shape: f32[1,512], index: 9, kind: output, shape index: {}]  }
   0x1   :  { %6427 = sst [smem:[#allocation98_spill]] %s6418_s1 }
   0x2   :  { %6428 = sst [smem:[#allocation99_spill]] %s6419_s2 }
   0x3   :  { %6429 = sst [smem:[#allocation100_spill]] %s6420_s3 }
   0x4   :  { %14 = sst [smem:[#allocation2]] %s6425_s8 }
   0x5   :  { %15 = vsyncpa [#allocation4], 0 }
   0x6   :  { %17 = vsyncpa [#allocation4 + $0x1], 0 }
   0x7   :  { %18 = vsyncpa [#allocation7], 0 }
   0x8   :  { %19 = vsyncpa [#allocation10], 0 }
   0x9   :  { %20 = vsyncpa [#allocation13], 0 }
   0xa   :  { %21 = vsyncpa [#allocation5], 0 }
   0xb   :  { %23 = vsyncpa [#allocation5 + $0x1], 0  ;;  %s4398_s11 = smov 0   ;;  %s4400_s12 = smov 0  }
   0xc   :  { %s4402_s13 = smov 0   ;;  %s4404_s14 = smov 0  }
   0xd LB: > { %s6430_s1 = sld [smem:[#allocation98_spill]]  ;;  %s4422_s17 = sadd.s32 4294967295, %s4331_s14   ;;  %s4331_s14 = sphi %s4404_s14, %s6666_s14   ;;  %s4327_s13 = sphi %s4402_s13, %s6665_s13   ;;  %s4323_s12 = sphi %s4400_s12, %s6664_s12   ;;  %s4319_s11 = sphi %s4398_s11, %s6663_s11  }
   0xe   : > { %p3625_p0 = scmp.ge.s32.totalorder %s4331_s14, 1  ;;  %p50_p1 = scmp.eq.s32.totalorder %s4422_s17, 0 }
   0xf   : > { %p254_p2 = scmp.lt.s32.totalorder %s4331_s14, 3  ;;  %s4333_s19 = smov [#allocation6]  }
  0x10   : > { %s267_s20 = sshll.u32 %s4333_s19, 4  ;;  %s6432_s3 = sld [smem:[#allocation100_spill]]  ;;  %s268_s20 = int_to_ptr.vmem [resolvable:$true] %s267_s20 }
  0x11   : > { %p4427_p3 = pnand %p3625_p0, %p254_p2  ;;  %s4334_s25 = smov [#allocation9]  }
  0x12   : > { %s293_s26 = sshll.u32 %s4334_s25, 4  ;;  %s4335_s27 = smov 256   ;;  %s294_s26 = int_to_ptr.vmem [resolvable:$true] %s293_s26 }
  0x13   : > { %s265_s16 = sshll.u32 %s6430_s1, 4  ;;  %p3724_p4 = pneg %p4427_p3  ;;  %s266_s16 = int_to_ptr.hbm [resolvable:$true] %s265_s16 }
  0x14   : > { %s4336_s28 = smov 16   ;;  %s4337_s29 = smov 128  }
  0x15   : > { %p4439_p6 = pnand %p3724_p4, %p50_p1  ;;  %s4338_s30 = smov 8  }
  0x16   : > { %s291_s23 = sshll.u32 %s6432_s3, 4  ;;  %s6434_s2 = sld [smem:[#allocation99_spill]]  ;;  %s292_s23 = int_to_ptr.hbm [resolvable:$true] %s291_s23 }
  0x17   : > { %3727 = dma.hbm_to_vmem [thread:$0]  (!%p4439_p6), %s266_s16, 32768, %s268_s20, [#allocation7], %s4335_s27, %s4335_s27, %s4336_s28  }
  0x18   : > { %3733 = dma.hbm_to_vmem [thread:$0]  (!%p4439_p6), %s292_s23, 4096, %s294_s26, [#allocation10], %s4337_s29, %s4337_s29, %s4338_s30  }
  0x19   : > { %s4339_s19 = smov [#allocation8]   ;;  %s306_s16 = sshll.u32 %s6421_s4, 4  ;;  %s307_s16 = int_to_ptr.hbm [resolvable:$true] %s306_s16 }
  0x1a   : > { %s282_s21 = sshll.u32 %s4339_s19, 4  ;;  %s4340_s20 = smov [#allocation11]   ;;  %s283_s21 = int_to_ptr.vmem [resolvable:$true] %s282_s21 }
  0x1b   : > { %s308_s23 = sshll.u32 %s4340_s20, 4  ;;  %s321_s28 = sshll.u32 %s6423_s6, 4  ;;  %s309_s23 = int_to_ptr.vmem [resolvable:$true] %s308_s23  ;;  %s322_s28 = int_to_ptr.hbm [resolvable:$true] %s321_s28 }
  0x1c   : > { %s280_s15 = sshll.u32 %s6434_s2, 4  ;;  %s4341_s29 = smov [#allocation12]   ;;  %s281_s15 = int_to_ptr.hbm [resolvable:$true] %s280_s15 }
  0x1d   : > { %3730 = dma.hbm_to_vmem [thread:$0]  (!%p4439_p6), %s281_s15, 32, %s283_s21, [#allocation7]  }
  0x1e   : > { %3736 = dma.hbm_to_vmem [thread:$0]  (!%p4439_p6), %s307_s16, 16, %s309_s23, [#allocation10]  }
  0x1f   : > { %s323_s30 = sshll.u32 %s4341_s29, 4  ;;  %s3624_s10 = sadd.s32 4294967294, %s4331_s14   ;;  %s324_s30 = int_to_ptr.vmem [resolvable:$true] %s323_s30 }
  0x20   : > { %3739 = dma.hbm_to_vmem [thread:$0]  (!%p4439_p6), %s322_s28, 16, %s324_s30, [#allocation13]  }
  0x21   : > { %s4464_s8 = sadd.s32 1, %s4331_s14   ;;  %s36_s15 = sadd.s32 1, %s4327_s13 }
  0x22   : > { %s33_s19 = ssub.s32 %s4331_s14, %s4464_s8  ;;  %p43_p7 = scmp.ne.s32.totalorder %s4327_s13, %s4323_s12 }
  0x23   : > { %p34_p8 = scmp.eq.s32.totalorder %s33_s19, 0  ;;  %p44_p9 = scmp.eq.s32.totalorder %s4331_s14, 0 }
  0x24   : > { %p49_p10 = scmp.ne.s32.totalorder %s4323_s12, %s4319_s11  ;;  %p241_p11 = scmp.eq.s32.totalorder %s4422_s17, 1 }
  0x25   : > { %s4476_s21 = scalar_select %p34_p8, %s4327_s13, %s36_s15  }
  0x26   : > { %p4478_p12 = por %p44_p9, %p43_p7  ;;  %p4484_p13 = por %p50_p1, %p49_p10 }
  0x27   : > { %p4488_p0 = por %p241_p11, %p43_p7  ;;  %p247_p2 = scmp.eq.s32.totalorder %s3624_s10, 1 }
  0x28   : > { %p3753_p4 = scmp.lt.s32.totalorder %s4331_s14, 2  ;;  %s340_s16 = sand.u32 1, %s4327_s13  }
  0x29   : > { %p4494_p6 = por %p247_p2, %p49_p10  ;;  %s3632_s23 = sshll.u32 %s340_s16, 11 }
  0x2a   : > { %s3651_s26 = sshll.u32 %s4331_s14, 11  ;;  %s344_s15 = scalar_lea.vmem [#allocation3], %s3632_s23 }
  0x2b   : > { %s350_s29 = scalar_lea.hbm %s6417_s0, %s3651_s26  ;;  %s353_s19 = sshll.u32 %s344_s15, 4  ;;  %s354_s19 = int_to_ptr.vmem [resolvable:$true] %s353_s19 }
  0x2c   : > { %s351_s30 = sshll.u32 %s350_s29, 4  ;;  %p4504_p7 = pnand %p3753_p4, %p4478_p12  ;;  %s352_s30 = int_to_ptr.hbm [resolvable:$true] %s351_s30 }
  0x2d   : > { %s341_s1 = scalar_lea.sflag [#allocation4], %s340_s16  ;;  %s4223_s2 = sshra.s32 %s352_s30, 4  ;;  %s4224_s2 = int_to_ptr.hbm [resolvable:$true] %s4223_s2 }
  0x2e   : > { %s4225_s3 = scalar_lea.hbm %s4224_s2, 2048  ;;  %p4227_p9 = pneg %p4504_p7 }
  0x2f   : > { %p4226_p8 = scmp.ne.s32.totalorder %s4224_s2, %s4225_s3  ;;  %s4230_s27 = scalar_lea.hbm %s6417_s0, 4096 }
  0x30   : > { %p4231_p12 = scmp.lt.s32.totalorder %s4224_s2, %s6417_s0  ;;  %p4232_p2 = scmp.lt.s32.totalorder %s4230_s27, %s4225_s3 }
  0x31   : > { %p4228_p10 = pnand %p4227_p9, %p4226_p8 }
  0x32   : > { %p4233_p4 = por %p4232_p2, %p4231_p12 }
  0x33   : > { %p4229_p11 = pneg %p4228_p10 }
  0x35   : > { %p4234_p5 = pnand %p4233_p4, %p4229_p11 }
  0x37   : > { %4237 = shalt.err (!%p4234_p5)
}
  0x38   : > { %s4342_s16 = smov 1024   ;;  %s4343_s29 = smov 64  }
  0x39   : > { %3743 = dma.hbm_to_vmem [thread:$0]  (!%p4504_p7), %s352_s30, 32768, %s354_s19, %s341_s1, %s4342_s16, %s4342_s16, %s4343_s29  }
  0x3a   : > { %365 = sbr.rel (%p4427_p3) target bundleno = 1869 (0x74d), region = 56 }
  0x3f   : > { %s4521_s15 = sand.u32 1, %s4323_s12  }
  0x40   : > { %s3637_s26 = sshll.u32 %s4521_s15, 11  ;;  %s368_s2 = scalar_lea.sflag [#allocation4], %s4521_s15 }
  0x41   : > { %s4525_s3 = scalar_lea.vmem [#allocation3], %s3637_s26 }
  0x42   : > { %4298 = dma.done.wait (%p4484_p13), %s368_s2, 32768  }
  0x43   : > { %4300 = vsyncadd (%p4484_p13), %s368_s2, 4294934528 }
  0x44   : > { %4302 = dma.done.wait (%p50_p1), [#allocation7], 32800  }
  0x45   : > { %4304 = vsyncadd (%p50_p1), [#allocation7], 4294934496 }
  0x46   : > { %4306 = dma.done.wait (%p50_p1), [#allocation10], 4112  }
  0x47   : > { %4308 = vsyncadd (%p50_p1), [#allocation10], 4294963184 }
  0x48   : > { %4310 = dma.done.wait (%p50_p1), [#allocation13], 16  }
  0x49   : > { %4312 = vsyncadd (%p50_p1), [#allocation13], 4294967280  ;;  %v720_v0 = vld [vmem:[#allocation6 + $0xf0] sm:$0xff]  ;;  %v718_v1 = vld [vmem:[#allocation6 + $0xe0] sm:$0xff]  ;;  %s6374_s19 = sld [smem:[#allocation2]]  ;;  %s3643_s10 = sshll.u32 %s4521_s15, 1 }
  0x4a   : > { %952 = vmatpush.msra.mxu0 %v720_v0  ;;  %3652 = vmatpush.msra.mxu3 %v720_v0  ;;  %v4543_v2 = vld [vmem:[#allocation6 + $0x2f0] sm:$0xff]  ;;  %v4546_v4 = vld [vmem:[#allocation6 + $0x2e0] sm:$0xff]  ;;  %v435_v51 = vld [vmem:[%s4525_s3 + $0x8] sm:$0xff]  ;;  %s3647_s23 = sshll.u32 %s4422_s17, 1  ;;  %s431_s17 = scalar_lea.vmem [#allocation14], %s3643_s10  ;;  %vm3482_vm8 = vcmask 1040384  }
  0x4b   : > { %v716_v3 = vld [vmem:[#allocation6 + $0xd0] sm:$0xff]  ;;  %1178 = vmatpush.msra.mxu2 %v4543_v2  ;;  %v4552_v7 = vld [vmem:[#allocation6 + $0x1e0] sm:$0xff]  ;;  %v443_v55 = vld [vmem:[%s4525_s3 + $0x48] sm:$0xff]  ;;  %s3501_s22 = scalar_lea.hbm %s6426_s9, %s3647_s23  ;;  %s3503_s16 = sshll.u32 %s431_s17, 4  ;;  %s3504_s16 = int_to_ptr.vmem [resolvable:$true] %s3503_s16 }
  0x4c   : > { %v4548_v5 = vld [vmem:[#allocation6 + $0x1f0] sm:$0xff]  ;;  %953 = vmatpush.msra.mxu0 %v718_v1  ;;  %3653 = vmatpush.msra.mxu3 %v718_v1  ;;  %v714_v8 = vld [vmem:[#allocation6 + $0xc0] sm:$0xff]  ;;  %v451_v59 = vld [vmem:[%s4525_s3 + $0x88] sm:$0xff]  ;;  %s3505_s29 = sshll.u32 %s3501_s22, 4  ;;  %s3491_s26 = scalar_lea.sflag [#allocation5], %s4521_s15  ;;  %s3506_s29 = int_to_ptr.hbm [resolvable:$true] %s3505_s29 }
  0x4d   : > { %v4550_v6 = vld [vmem:[#allocation6 + $0x2d0] sm:$0xff]  ;;  %1179 = vmatpush.msra.mxu2 %v4546_v4  ;;  %1065 = vmatpush.msra.mxu1 %v4548_v5  ;;  %v4556_v9 = vld [vmem:[#allocation6 + $0x2c0] sm:$0xff]  ;;  %v459_v63 = vld [vmem:[%s4525_s3 + $0xc8] sm:$0xff]  ;;  %s4267_s2 = sshra.s32 %s3506_s29, 4  ;;  %s4273_s30 = scalar_lea.hbm %s6426_s9, 4  ;;  %s4268_s2 = int_to_ptr.hbm [resolvable:$true] %s4267_s2 }
  0x4e   : > { %954 = vmatpush.msra.mxu0 %v716_v3  ;;  %3654 = vmatpush.msra.mxu3 %v716_v3  ;;  %v4558_v10 = vld [vmem:[#allocation6 + $0x1d0] sm:$0xff]  ;;  %v4564_v13 = vld [vmem:[#allocation6 + $0x1c0] sm:$0xff]  ;;  %s4269_s1 = scalar_lea.hbm %s4268_s2, 2  ;;  %p4274_p13 = scmp.lt.s32.totalorder %s4268_s2, %s6426_s9 }
  0x4f   : > { %v712_v11 = vld [vmem:[#allocation6 + $0xb0] sm:$0xff]  ;;  %1180 = vmatpush.msra.mxu2 %v4550_v6  ;;  %1066 = vmatpush.msra.mxu1 %v4552_v7  ;;  %v710_v14 = vld [vmem:[#allocation6 + $0xa0] sm:$0xff]  ;;  %p4270_p1 = scmp.ne.s32.totalorder %s4268_s2, %s4269_s1  ;;  %p4275_p7 = scmp.lt.s32.totalorder %s4273_s30, %s4269_s1 }
  0x50   : > { %955 = vmatpush.msra.mxu0 %v714_v8  ;;  %3655 = vmatpush.msra.mxu3 %v714_v8  ;;  %v4562_v12 = vld [vmem:[#allocation6 + $0x2b0] sm:$0xff]  ;;  %v4568_v15 = vld [vmem:[#allocation6 + $0x2a0] sm:$0xff] }
  0x51   : > { %1181 = vmatpush.msra.mxu2 %v4556_v9  ;;  %1067 = vmatpush.msra.mxu1 %v4558_v10  ;;  %v4570_v16 = vld [vmem:[#allocation6 + $0x1b0] sm:$0xff]  ;;  %v4576_v19 = vld [vmem:[#allocation6 + $0x1a0] sm:$0xff]  ;;  %p4271_p3 = pnand %p4270_p1, %p4488_p0  ;;  %p4276_p8 = por %p4275_p7, %p4274_p13 }
  0x52   : > { %956 = vmatpush.msra.mxu0 %v712_v11  ;;  %3656 = vmatpush.msra.mxu3 %v712_v11  ;;  %v708_v17 = vld [vmem:[#allocation6 + $0x90] sm:$0xff]  ;;  %v706_v20 = vld [vmem:[#allocation6 + $0x80] sm:$0xff] }
  0x53   : > { %1182 = vmatpush.msra.mxu2 %v4562_v12  ;;  %1068 = vmatpush.msra.mxu1 %v4564_v13  ;;  %v4574_v18 = vld [vmem:[#allocation6 + $0x290] sm:$0xff]  ;;  %v4580_v21 = vld [vmem:[#allocation6 + $0x280] sm:$0xff]  ;;  %p4272_p5 = pneg %p4271_p3 }
  0x54   : > { %957 = vmatpush.msra.mxu0 %v710_v14  ;;  %3657 = vmatpush.msra.mxu3 %v710_v14  ;;  %v4582_v22 = vld [vmem:[#allocation6 + $0x190] sm:$0xff]  ;;  %v4588_v25 = vld [vmem:[#allocation6 + $0x180] sm:$0xff] }
  0x55   : > { %1183 = vmatpush.msra.mxu2 %v4568_v15  ;;  %1069 = vmatpush.msra.mxu1 %v4570_v16  ;;  %v704_v23 = vld [vmem:[#allocation6 + $0x70] sm:$0xff]  ;;  %v702_v26 = vld [vmem:[#allocation6 + $0x60] sm:$0xff]  ;;  %p4277_p9 = pnand %p4276_p8, %p4272_p5 }
  0x56   : > { %958 = vmatpush.msra.mxu0 %v708_v17  ;;  %3658 = vmatpush.msra.mxu3 %v708_v17  ;;  %v4586_v24 = vld [vmem:[#allocation6 + $0x270] sm:$0xff]  ;;  %v4592_v27 = vld [vmem:[#allocation6 + $0x260] sm:$0xff]  ;;  %v627_v17 = vld [vmem:[%s4525_s3 + $0x608] sm:$0xff] }
  0x57   : > { %1184 = vmatpush.msra.mxu2 %v4574_v18  ;;  %1070 = vmatpush.msra.mxu1 %v4576_v19  ;;  %v4594_v28 = vld [vmem:[#allocation6 + $0x170] sm:$0xff]  ;;  %v4600_v31 = vld [vmem:[#allocation6 + $0x160] sm:$0xff] }
  0x58   : > { %959 = vmatpush.msra.mxu0 %v706_v20  ;;  %3659 = vmatpush.msra.mxu3 %v706_v20  ;;  %v700_v29 = vld [vmem:[#allocation6 + $0x50] sm:$0xff]  ;;  %v698_v32 = vld [vmem:[#allocation6 + $0x40] sm:$0xff] }
  0x59   : > { %1185 = vmatpush.msra.mxu2 %v4580_v21  ;;  %1071 = vmatpush.msra.mxu1 %v4582_v22  ;;  %v4598_v30 = vld [vmem:[#allocation6 + $0x250] sm:$0xff]  ;;  %v4604_v33 = vld [vmem:[#allocation6 + $0x240] sm:$0xff] }
  0x5a   : > { %960 = vmatpush.msra.mxu0 %v704_v23  ;;  %3660 = vmatpush.msra.mxu3 %v704_v23  ;;  %v4606_v34 = vld [vmem:[#allocation6 + $0x150] sm:$0xff]  ;;  %v4612_v37 = vld [vmem:[#allocation6 + $0x140] sm:$0xff]  ;;  %v507_v23 = vld [vmem:[%s4525_s3 + $0x248] sm:$0xff] }
  0x5b   : > { %1186 = vmatpush.msra.mxu2 %v4586_v24  ;;  %1072 = vmatpush.msra.mxu1 %v4588_v25  ;;  %v696_v35 = vld [vmem:[#allocation6 + $0x30] sm:$0xff]  ;;  %v694_v38 = vld [vmem:[#allocation6 + $0x20] sm:$0xff] }
  0x5c   : > { %961 = vmatpush.msra.mxu0 %v702_v26  ;;  %3661 = vmatpush.msra.mxu3 %v702_v26  ;;  %v4610_v36 = vld [vmem:[#allocation6 + $0x230] sm:$0xff]  ;;  %v4616_v39 = vld [vmem:[#allocation6 + $0x220] sm:$0xff] }
  0x5d   : > { %1187 = vmatpush.msra.mxu2 %v4592_v27  ;;  %1073 = vmatpush.msra.mxu1 %v4594_v28  ;;  %v4618_v40 = vld [vmem:[#allocation6 + $0x130] sm:$0xff]  ;;  %v726_v43 = vld [vmem:[#allocation6 + $0x120] sm:$0xff] }
  0x5e   : > { %962 = vmatpush.msra.mxu0 %v700_v29  ;;  %3662 = vmatpush.msra.mxu3 %v700_v29  ;;  %v692_v41 = vld [vmem:[#allocation6 + $0x10] sm:$0xff]  ;;  %v690_v44 = vld [vmem:[#allocation6] sm:$0xff]  ;;  %v651_v29 = vld [vmem:[%s4525_s3 + $0x6c8] sm:$0xff] }
  0x5f   : > { %1188 = vmatpush.msra.mxu2 %v4598_v30  ;;  %1074 = vmatpush.msra.mxu1 %v4600_v31  ;;  %v4622_v42 = vld [vmem:[#allocation6 + $0x210] sm:$0xff]  ;;  %v434_v45 = vld [vmem:[%s4525_s3] sm:$0xff] }
  0x60   : > { %963 = vmatpush.msra.mxu0 %v698_v32  ;;  %3663 = vmatpush.msra.mxu3 %v698_v32  ;;  %v626_v46 = vld [vmem:[%s4525_s3 + $0x600] sm:$0xff]  ;;  %v436_v48 = vld [vmem:[%s4525_s3 + $0x10] sm:$0xff] }
  0x61   : > { %1189 = vmatpush.msra.mxu2 %v4604_v33  ;;  %1075 = vmatpush.msra.mxu1 %v4606_v34  ;;  %v4629_v47 = vld [vmem:[#allocation6 + $0x200] sm:$0xff]  ;;  %v724_v49 = vld [vmem:[#allocation6 + $0x110] sm:$0xff] }
  0x62   : > { %964 = vmatpush.msra.mxu0 %v696_v35  ;;  %3664 = vmatpush.msra.mxu3 %v696_v35  ;;  %v722_v50 = vld [vmem:[#allocation6 + $0x100] sm:$0xff]  ;;  %v444_v54 = vld [vmem:[%s4525_s3 + $0x50] sm:$0xff] }
  0x63   : > { %1190 = vmatpush.msra.mxu2 %v4610_v36  ;;  %1076 = vmatpush.msra.mxu1 %v4612_v37  ;;  %v442_v52 = vld [vmem:[%s4525_s3 + $0x40] sm:$0xff]  ;;  %v452_v58 = vld [vmem:[%s4525_s3 + $0x90] sm:$0xff] }
  0x64   : > { %965 = vmatpush.msra.mxu0 %v694_v38  ;;  %3665 = vmatpush.msra.mxu3 %v694_v38  ;;  %v634_v53 = vld [vmem:[%s4525_s3 + $0x640] sm:$0xff]  ;;  %v460_v62 = vld [vmem:[%s4525_s3 + $0xd0] sm:$0xff] }
  0x65   : > { %1191 = vmatpush.msra.mxu2 %v4616_v39  ;;  %1077 = vmatpush.msra.mxu1 %v4618_v40  ;;  %v450_v56 = vld [vmem:[%s4525_s3 + $0x80] sm:$0xff]  ;;  %v468_v3 = vld [vmem:[%s4525_s3 + $0x110] sm:$0xff] }
  0x66   : > { %966 = vmatpush.msra.mxu0 %v692_v41  ;;  %3666 = vmatpush.msra.mxu3 %v692_v41  ;;  %v642_v57 = vld [vmem:[%s4525_s3 + $0x680] sm:$0xff]  ;;  %v492_v14 = vld [vmem:[%s4525_s3 + $0x1d0] sm:$0xff] }
  0x67   : > { %1192 = vmatpush.msra.mxu2 %v4622_v42  ;;  %1078 = vmatpush.msra.mxu1 %v726_v43  ;;  %v458_v60 = vld [vmem:[%s4525_s3 + $0xc0] sm:$0xff]  ;;  %v516_v26 = vld [vmem:[%s4525_s3 + $0x290] sm:$0xff] }
  0x68   : > { %967 = vmatpush.msra.mxu0 %v690_v44  ;;  %3667 = vmatpush.msra.mxu3 %v690_v44  ;;  %v650_v61 = vld [vmem:[%s4525_s3 + $0x6c0] sm:$0xff]  ;;  %v816_v35 = vld [vmem:[#allocation6 + $0x3f0] sm:$0xff]  ;;  %v539_v44 = vld [vmem:[%s4525_s3 + $0x348] sm:$0xff] }
  0x69   : > { %968 = vmatmul.f32.vlgmr.msra.gmra.mxu0 %v434_v45  ;;  %1040 = vmatmul.f32.vlgmr.msra.gmra.mxu3 %v626_v46  ;;  %v466_v0 = vld [vmem:[%s4525_s3 + $0x100] sm:$0xff]  ;;  %v540_v41 = vld [vmem:[%s4525_s3 + $0x350] sm:$0xff] }
  0x6a   : > { %3668 = vmatpush.msrb.mxu3 %v4548_v5  ;;  %1193 = vmatpush.msra.mxu2 %v4629_v47  ;;  %v658_v1 = vld [vmem:[%s4525_s3 + $0x700] sm:$0xff]  ;;  %v467_v5 = vld [vmem:[%s4525_s3 + $0x108] sm:$0xff] }
  0x6b   : > { %1194 = vmatmul.f32.vlgmr.msra.gmra.mxu2 %v436_v48  ;;  %1079 = vmatpush.msra.mxu1 %v724_v49  ;;  %v666_v8 = vld [vmem:[%s4525_s3 + $0x740] sm:$0xff]  ;;  %v548_v48 = vld [vmem:[%s4525_s3 + $0x390] sm:$0xff] }
  0x6c   : > { %3669 = vmatpush.msrb.mxu3 %v4552_v7  ;;  %v474_v7 = vld [vmem:[%s4525_s3 + $0x140] sm:$0xff] }
  0x6d   : > { %1080 = vmatpush.msra.mxu1 %v722_v50  ;;  %v674_v11 = vld [vmem:[%s4525_s3 + $0x780] sm:$0xff] }
  0x6e   : > { %3670 = vmatpush.msrb.mxu3 %v4558_v10  ;;  %1081 = vmatmul.f32.vlgmr.msra.gmra.mxu1 %v435_v51  ;;  %v476_v10 = vld [vmem:[%s4525_s3 + $0x150] sm:$0xff]  ;;  %v506_v20 = vld [vmem:[%s4525_s3 + $0x240] sm:$0xff]  ;;  %v547_v51 = vld [vmem:[%s4525_s3 + $0x388] sm:$0xff] }
  0x6f   : > { %v530_v32 = vld [vmem:[%s4525_s3 + $0x300] sm:$0xff] }
  0x70   : > { %3671 = vmatpush.msrb.mxu3 %v4564_v13  ;;  %v682_v13 = vld [vmem:[%s4525_s3 + $0x7c0] sm:$0xff] }
  0x71   : > { %971 = vmatmul.f32.gmra.mxu0 %v442_v52  ;;  %1043 = vmatmul.f32.gmra.mxu3 %v634_v53  ;;  %v538_v38 = vld [vmem:[%s4525_s3 + $0x340] sm:$0xff] }
  0x72   : > { %3672 = vmatpush.msrb.mxu3 %v4570_v16  ;;  %v498_v16 = vld [vmem:[%s4525_s3 + $0x200] sm:$0xff] }
  0x73   : > { %1197 = vmatmul.f32.gmra.mxu2 %v444_v54  ;;  %v810_v45 = vld [vmem:[#allocation6 + $0x3c0] sm:$0xff] }
  0x74   : > { %3673 = vmatpush.msrb.mxu3 %v4576_v19  ;;  %v499_v19 = vld [vmem:[%s4525_s3 + $0x208] sm:$0xff]  ;;  %v546_v46 = vld [vmem:[%s4525_s3 + $0x380] sm:$0xff] }
  0x75   : > { %v806_v52 = vld [vmem:[#allocation6 + $0x3a0] sm:$0xff] }
  0x76   : > { %1084 = vmatmul.f32.gmra.mxu1 %v443_v55  ;;  %3674 = vmatpush.msrb.mxu3 %v4582_v22  ;;  %v508_v22 = vld [vmem:[%s4525_s3 + $0x250] sm:$0xff]  ;;  %v878_v53 = vld [vmem:[#allocation6 + $0x5e0] sm:$0xff]  ;;  %v683_v55 = vld [vmem:[%s4525_s3 + $0x7c8] sm:$0xff] }
  0x77   : > { %v554_v54 = vld [vmem:[%s4525_s3 + $0x3c0] sm:$0xff] }
  0x78   : > { %3675 = vmatpush.msrb.mxu3 %v4588_v25  ;;  %v643_v25 = vld [vmem:[%s4525_s3 + $0x688] sm:$0xff] }
  0x79   : > { %974 = vmatmul.f32.gmra.mxu0 %v450_v56  ;;  %1046 = vmatmul.f32.gmra.mxu3 %v642_v57  ;;  %v556_v56 = vld [vmem:[%s4525_s3 + $0x3d0] sm:$0xff] }
  0x7a   : > { %3676 = vmatpush.msrb.mxu3 %v4594_v28  ;;  %v522_v28 = vld [vmem:[%s4525_s3 + $0x2c0] sm:$0xff]  ;;  %v804_v57 = vld [vmem:[#allocation6 + $0x390] sm:$0xff] }
  0x7b   : > { %1200 = vmatmul.f32.gmra.mxu2 %v452_v58  ;;  %v555_v58 = vld [vmem:[%s4525_s3 + $0x3c8] sm:$0xff] }
  0x7c   : > { %3677 = vmatpush.msrb.mxu3 %v4600_v31  ;;  %v523_v31 = vld [vmem:[%s4525_s3 + $0x2c8] sm:$0xff] }
  0x7e   : > { %1087 = vmatmul.f32.gmra.mxu1 %v451_v59  ;;  %3678 = vmatpush.msrb.mxu3 %v4606_v34  ;;  %v532_v34 = vld [vmem:[%s4525_s3 + $0x310] sm:$0xff]  ;;  %v802_v59 = vld [vmem:[#allocation6 + $0x380] sm:$0xff] }
  0x80   : > { %3679 = vmatpush.msrb.mxu3 %v4612_v37  ;;  %v814_v37 = vld [vmem:[#allocation6 + $0x3e0] sm:$0xff] }
  0x81   : > { %977 = vmatmul.f32.gmra.mxu0 %v458_v60  ;;  %1049 = vmatmul.f32.gmra.mxu3 %v650_v61  ;;  %v562_v61 = vld [vmem:[%s4525_s3 + $0x400] sm:$0xff] }
  0x82   : > { %3680 = vmatpush.msrb.mxu3 %v4618_v40  ;;  %v848_v40 = vld [vmem:[#allocation6 + $0x4f0] sm:$0xff] }
  0x83   : > { %1203 = vmatmul.f32.gmra.mxu2 %v460_v62  ;;  %1404 = vmatpush.msrb.mxu0 %v848_v40  ;;  %v628_v62 = vld [vmem:[%s4525_s3 + $0x610] sm:$0xff] }
  0x84   : > { %3681 = vmatpush.msrb.mxu3 %v726_v43  ;;  %v880_v43 = vld [vmem:[#allocation6 + $0x5f0] sm:$0xff] }
  0x85   : > { %1517 = vmatpush.msrb.mxu1 %v880_v43  ;;  %v828_v43 = vld [vmem:[#allocation6 + $0x450] sm:$0xff] }
  0x86   : > { %1090 = vmatmul.f32.gmra.mxu1 %v459_v63  ;;  %3682 = vmatpush.msrb.mxu3 %v724_v49  ;;  %v808_v49 = vld [vmem:[#allocation6 + $0x3b0] sm:$0xff] }
  0x87   : > { %1518 = vmatpush.msrb.mxu1 %v878_v53  ;;  %v844_v63 = vld [vmem:[#allocation6 + $0x4d0] sm:$0xff] }
  0x88   : > { %3683 = vmatpush.msrb.mxu3 %v722_v50  ;;  %v846_v50 = vld [vmem:[#allocation6 + $0x4e0] sm:$0xff]  ;;  %v896_v53 = vld [vmem:[#allocation6 + $0x670] sm:$0xff] }
  0x89   : > { %980 = vmatmul.f32.gmra.mxu0 %v466_v0  ;;  %1052 = vmatmul.f32.gmra.mxu3 %v658_v1  ;;  %v564_v0 = vld [vmem:[%s4525_s3 + $0x410] sm:$0xff] }
  0x8a   : > { %3684 = vmatpush.msra.mxu3 %v4543_v2  ;;  %v475_v2 = vld [vmem:[%s4525_s3 + $0x148] sm:$0xff]  ;;  %1405 = vmatpush.msrb.mxu0 %v846_v50  ;;  %v800_v1 = vld [vmem:[#allocation6 + $0x370] sm:$0xff]  ;;  %v826_v50 = vld [vmem:[#allocation6 + $0x440] sm:$0xff] }
  0x8b   : > { %1206 = vmatmul.f32.gmra.mxu2 %v468_v3  ;;  %v876_v3 = vld [vmem:[#allocation6 + $0x5d0] sm:$0xff] }
  0x8c   : > { %3685 = vmatpush.msra.mxu3 %v4546_v4  ;;  %v482_v4 = vld [vmem:[%s4525_s3 + $0x180] sm:$0xff]  ;;  %1406 = vmatpush.msrb.mxu0 %v844_v63  ;;  %v864_v63 = vld [vmem:[#allocation6 + $0x570] sm:$0xff] }
  0x8d   : > { %1519 = vmatpush.msrb.mxu1 %v876_v3 }
  0x8e   : > { %1093 = vmatmul.f32.gmra.mxu1 %v467_v5  ;;  %3686 = vmatpush.msra.mxu3 %v4550_v6  ;;  %v484_v6 = vld [vmem:[%s4525_s3 + $0x190] sm:$0xff] }
  0x90   : > { %3687 = vmatpush.msra.mxu3 %v4556_v9  ;;  %v483_v9 = vld [vmem:[%s4525_s3 + $0x188] sm:$0xff] }
  0x91   : > { %983 = vmatmul.f32.gmra.mxu0 %v474_v7  ;;  %1055 = vmatmul.f32.gmra.mxu3 %v666_v8  ;;  %v563_v7 = vld [vmem:[%s4525_s3 + $0x408] sm:$0xff] }
  0x92   : > { %3688 = vmatpush.msra.mxu3 %v4562_v12  ;;  %v490_v12 = vld [vmem:[%s4525_s3 + $0x1c0] sm:$0xff] }
  0x93   : > { %1209 = vmatmul.f32.gmra.mxu2 %v476_v10  ;;  %v798_v10 = vld [vmem:[#allocation6 + $0x360] sm:$0xff] }
  0x94   : > { %3689 = vmatpush.msra.mxu3 %v4568_v15  ;;  %v491_v15 = vld [vmem:[%s4525_s3 + $0x1c8] sm:$0xff] }
  0x96   : > { %1096 = vmatmul.f32.gmra.mxu1 %v475_v2  ;;  %3690 = vmatpush.msra.mxu3 %v4574_v18  ;;  %v500_v18 = vld [vmem:[%s4525_s3 + $0x210] sm:$0xff] }
  0x98   : > { %3691 = vmatpush.msra.mxu3 %v4580_v21  ;;  %v635_v21 = vld [vmem:[%s4525_s3 + $0x648] sm:$0xff] }
  0x99   : > { %986 = vmatmul.f32.gmra.mxu0 %v482_v4  ;;  %1058 = vmatmul.f32.gmra.mxu3 %v674_v11  ;;  %v570_v4 = vld [vmem:[%s4525_s3 + $0x440] sm:$0xff]  ;;  %v636_v11 = vld [vmem:[%s4525_s3 + $0x650] sm:$0xff] }
  0x9a   : > { %3692 = vmatpush.msra.mxu3 %v4586_v24  ;;  %v514_v24 = vld [vmem:[%s4525_s3 + $0x280] sm:$0xff] }
  0x9b   : > { %1212 = vmatmul.f32.gmra.mxu2 %v484_v6 }
  0x9c   : > { %3693 = vmatpush.msra.mxu3 %v4592_v27  ;;  %v515_v27 = vld [vmem:[%s4525_s3 + $0x288] sm:$0xff] }
  0x9e   : > { %1099 = vmatmul.f32.gmra.mxu1 %v483_v9  ;;  %3694 = vmatpush.msra.mxu3 %v4598_v30  ;;  %v524_v30 = vld [vmem:[%s4525_s3 + $0x2d0] sm:$0xff]  ;;  %v842_v9 = vld [vmem:[#allocation6 + $0x4c0] sm:$0xff] }
  0x9f   : > { %1407 = vmatpush.msrb.mxu0 %v842_v9  ;;  %v862_v9 = vld [vmem:[#allocation6 + $0x560] sm:$0xff] }
  0xa0   : > { %3695 = vmatpush.msra.mxu3 %v4604_v33  ;;  %v659_v33 = vld [vmem:[%s4525_s3 + $0x708] sm:$0xff] }
  0xa1   : > { %989 = vmatmul.f32.gmra.mxu0 %v490_v12  ;;  %1061 = vmatmul.f32.gmra.mxu3 %v682_v13  ;;  %v912_v12 = vld [vmem:[#allocation6 + $0x6f0] sm:$0xff] }
  0xa2   : > { %3696 = vmatpush.msra.mxu3 %v4610_v36  ;;  %v531_v36 = vld [vmem:[%s4525_s3 + $0x308] sm:$0xff]  ;;  %v572_v13 = vld [vmem:[%s4525_s3 + $0x450] sm:$0xff]  ;;  %1630 = vmatpush.msrb.mxu2 %v912_v12 }
  0xa3   : > { %1215 = vmatmul.f32.gmra.mxu2 %v492_v14  ;;  %v796_v14 = vld [vmem:[#allocation6 + $0x350] sm:$0xff] }
  0xa4   : > { %3697 = vmatpush.msra.mxu3 %v4616_v39  ;;  %v667_v39 = vld [vmem:[%s4525_s3 + $0x748] sm:$0xff]  ;;  %v596_v12 = vld [vmem:[%s4525_s3 + $0x510] sm:$0xff] }
  0xa6   : > { %1102 = vmatmul.f32.gmra.mxu1 %v491_v15  ;;  %3698 = vmatpush.msra.mxu3 %v4622_v42  ;;  %v812_v42 = vld [vmem:[#allocation6 + $0x3d0] sm:$0xff] }
  0xa7   : > { %v840_v15 = vld [vmem:[#allocation6 + $0x4b0] sm:$0xff] }
  0xa8   : > { %3699 = vmatpush.msra.mxu3 %v4629_v47  ;;  %v675_v47 = vld [vmem:[%s4525_s3 + $0x788] sm:$0xff]  ;;  %1408 = vmatpush.msrb.mxu0 %v840_v15  ;;  %v944_v15 = vld [vmem:[#allocation6 + $0x7f0] sm:$0xff] }
  0xa9   : > { %992 = vmatmul.f32.gmra.mxu0 %v498_v16  ;;  %1153 = vmatmul.f32.vlgmr.msrb.gmra.mxu3 %v627_v17  ;;  %v910_v16 = vld [vmem:[#allocation6 + $0x6e0] sm:$0xff] }
  0xaa   : > { %1291 = vmatpush.msrb.mxu3 %v816_v35  ;;  %1631 = vmatpush.msrb.mxu2 %v910_v16  ;;  %v902_v35 = vld [vmem:[#allocation6 + $0x6a0] sm:$0xff]  ;;  %v860_v16 = vld [vmem:[#allocation6 + $0x550] sm:$0xff] }
  0xab   : > { %1218 = vmatmul.f32.gmra.mxu2 %v500_v18  ;;  %v571_v18 = vld [vmem:[%s4525_s3 + $0x448] sm:$0xff] }
  0xac   : > { %1292 = vmatpush.msrb.mxu3 %v814_v37  ;;  %v579_v37 = vld [vmem:[%s4525_s3 + $0x488] sm:$0xff] }
  0xae   : > { %1105 = vmatmul.f32.gmra.mxu1 %v499_v19  ;;  %1293 = vmatpush.msrb.mxu3 %v812_v42  ;;  %v838_v19 = vld [vmem:[#allocation6 + $0x4a0] sm:$0xff] }
  0xaf   : > { %1409 = vmatpush.msrb.mxu0 %v838_v19  ;;  %v790_v42 = vld [vmem:[#allocation6 + $0x320] sm:$0xff]  ;;  %v595_v19 = vld [vmem:[%s4525_s3 + $0x508] sm:$0xff] }
  0xb0   : > { %1294 = vmatpush.msrb.mxu3 %v810_v45 }
  0xb1   : > { %995 = vmatmul.f32.gmra.mxu0 %v506_v20  ;;  %1156 = vmatmul.f32.gmra.mxu3 %v635_v21  ;;  %v908_v20 = vld [vmem:[#allocation6 + $0x6d0] sm:$0xff] }
  0xb2   : > { %1295 = vmatpush.msrb.mxu3 %v808_v49  ;;  %1632 = vmatpush.msrb.mxu2 %v908_v20  ;;  %v898_v49 = vld [vmem:[#allocation6 + $0x680] sm:$0xff]  ;;  %v888_v20 = vld [vmem:[#allocation6 + $0x630] sm:$0xff] }
  0xb3   : > { %1221 = vmatmul.f32.gmra.mxu2 %v508_v22  ;;  %v794_v22 = vld [vmem:[#allocation6 + $0x340] sm:$0xff] }
  0xb4   : > { %1296 = vmatpush.msrb.mxu3 %v806_v52  ;;  %v868_v52 = vld [vmem:[#allocation6 + $0x590] sm:$0xff] }
  0xb6   : > { %1108 = vmatmul.f32.gmra.mxu1 %v507_v23  ;;  %1297 = vmatpush.msrb.mxu3 %v804_v57  ;;  %v874_v23 = vld [vmem:[#allocation6 + $0x5c0] sm:$0xff] }
  0xb7   : > { %1520 = vmatpush.msrb.mxu1 %v874_v23  ;;  %v858_v23 = vld [vmem:[#allocation6 + $0x540] sm:$0xff] }
  0xb8   : > { %1298 = vmatpush.msrb.mxu3 %v802_v59  ;;  %v894_v59 = vld [vmem:[#allocation6 + $0x660] sm:$0xff] }
  0xb9   : > { %998 = vmatmul.f32.gmra.mxu0 %v514_v24  ;;  %1159 = vmatmul.f32.gmra.mxu3 %v643_v25  ;;  %v836_v24 = vld [vmem:[#allocation6 + $0x490] sm:$0xff] }
  0xba   : > { %1299 = vmatpush.msrb.mxu3 %v800_v1  ;;  %1410 = vmatpush.msrb.mxu0 %v836_v24  ;;  %v786_v1 = vld [vmem:[#allocation6 + $0x300] sm:$0xff] }
  0xbb   : > { %1224 = vmatmul.f32.gmra.mxu2 %v516_v26  ;;  %v578_v26 = vld [vmem:[%s4525_s3 + $0x480] sm:$0xff] }
  0xbc   : > { %1300 = vmatpush.msrb.mxu3 %v798_v10  ;;  %v660_v10 = vld [vmem:[%s4525_s3 + $0x710] sm:$0xff]  ;;  %v886_v24 = vld [vmem:[#allocation6 + $0x620] sm:$0xff] }
  0xbe   : > { %1111 = vmatmul.f32.gmra.mxu1 %v515_v27  ;;  %1301 = vmatpush.msrb.mxu3 %v796_v14  ;;  %v644_v27 = vld [vmem:[%s4525_s3 + $0x690] sm:$0xff]  ;;  %v818_v14 = vld [vmem:[#allocation6 + $0x400] sm:$0xff] }
  0xc0   : > { %1302 = vmatpush.msrb.mxu3 %v794_v22 }
  0xc1   : > { %1001 = vmatmul.f32.gmra.mxu0 %v522_v28  ;;  %1162 = vmatmul.f32.gmra.mxu3 %v651_v29  ;;  %v906_v29 = vld [vmem:[#allocation6 + $0x6c0] sm:$0xff] }
  0xc2   : > { %1633 = vmatpush.msrb.mxu2 %v906_v29  ;;  %v668_v29 = vld [vmem:[%s4525_s3 + $0x750] sm:$0xff] }
  0xc3   : > { %1227 = vmatmul.f32.gmra.mxu2 %v524_v30  ;;  %v834_v30 = vld [vmem:[#allocation6 + $0x480] sm:$0xff] }
  0xc4   : > { %1411 = vmatpush.msrb.mxu0 %v834_v30 }
  0xc6   : > { %1114 = vmatmul.f32.gmra.mxu1 %v523_v31  ;;  %v904_v31 = vld [vmem:[#allocation6 + $0x6b0] sm:$0xff] }
  0xc7   : > { %1634 = vmatpush.msrb.mxu2 %v904_v31  ;;  %v856_v31 = vld [vmem:[#allocation6 + $0x530] sm:$0xff] }
  0xc9   : > { %1004 = vmatmul.f32.gmra.mxu0 %v530_v32  ;;  %1165 = vmatmul.f32.gmra.mxu3 %v659_v33  ;;  %v580_v32 = vld [vmem:[%s4525_s3 + $0x490] sm:$0xff] }
  0xca   : > { %v792_v33 = vld [vmem:[#allocation6 + $0x330] sm:$0xff]  ;;  %1635 = vmatpush.msrb.mxu2 %v902_v35  ;;  %v882_v35 = vld [vmem:[#allocation6 + $0x600] sm:$0xff] }
  0xcb   : > { %1230 = vmatmul.f32.gmra.mxu2 %v532_v34  ;;  %v832_v34 = vld [vmem:[#allocation6 + $0x470] sm:$0xff]  ;;  %1303 = vmatpush.msrb.mxu3 %v792_v33 }
  0xcc   : > { %1412 = vmatpush.msrb.mxu0 %v832_v34  ;;  %v604_v33 = vld [vmem:[%s4525_s3 + $0x550] sm:$0xff]  ;;  %v854_v34 = vld [vmem:[#allocation6 + $0x520] sm:$0xff] }
  0xcd   : > { %1304 = vmatpush.msrb.mxu3 %v790_v42 }
  0xce   : > { %1117 = vmatmul.f32.gmra.mxu1 %v531_v36 }
  0xd1   : > { %1007 = vmatmul.f32.gmra.mxu0 %v538_v38  ;;  %1168 = vmatmul.f32.gmra.mxu3 %v667_v39  ;;  %v830_v38 = vld [vmem:[#allocation6 + $0x460] sm:$0xff]  ;;  %v872_v39 = vld [vmem:[#allocation6 + $0x5b0] sm:$0xff] }
  0xd2   : > { %1521 = vmatpush.msrb.mxu1 %v872_v39  ;;  %1413 = vmatpush.msrb.mxu0 %v830_v38  ;;  %v603_v38 = vld [vmem:[%s4525_s3 + $0x548] sm:$0xff] }
  0xd3   : > { %1233 = vmatmul.f32.gmra.mxu2 %v540_v41  ;;  %v900_v41 = vld [vmem:[#allocation6 + $0x690] sm:$0xff] }
  0xd4   : > { %1636 = vmatpush.msrb.mxu2 %v900_v41  ;;  %1414 = vmatpush.msrb.mxu0 %v828_v43  ;;  %v852_v41 = vld [vmem:[#allocation6 + $0x510] sm:$0xff]  ;;  %v610_v43 = vld [vmem:[%s4525_s3 + $0x580] sm:$0xff] }
  0xd6   : > { %1120 = vmatmul.f32.gmra.mxu1 %v539_v44  ;;  %v870_v44 = vld [vmem:[#allocation6 + $0x5a0] sm:$0xff]  ;;  %1637 = vmatpush.msrb.mxu2 %v898_v49  ;;  %v612_v49 = vld [vmem:[%s4525_s3 + $0x590] sm:$0xff] }
  0xd7   : > { %1522 = vmatpush.msrb.mxu1 %v870_v44  ;;  %1415 = vmatpush.msrb.mxu0 %v826_v50  ;;  %v676_v44 = vld [vmem:[%s4525_s3 + $0x790] sm:$0xff]  ;;  %v942_v50 = vld [vmem:[#allocation6 + $0x7e0] sm:$0xff] }
  0xd8   : > { %1638 = vmatpush.msrb.mxu2 %v896_v53 }
  0xd9   : > { %1010 = vmatmul.f32.gmra.mxu0 %v546_v46  ;;  %1171 = vmatmul.f32.gmra.mxu3 %v675_v47  ;;  %v586_v46 = vld [vmem:[%s4525_s3 + $0x4c0] sm:$0xff]  ;;  %v652_v47 = vld [vmem:[%s4525_s3 + $0x6d0] sm:$0xff] }
  0xda   : > { %1523 = vmatpush.msrb.mxu1 %v868_v52  ;;  %1639 = vmatpush.msrb.mxu2 %v894_v59  ;;  %v611_v52 = vld [vmem:[%s4525_s3 + $0x588] sm:$0xff]  ;;  %v620_v59 = vld [vmem:[%s4525_s3 + $0x5d0] sm:$0xff] }
  0xdb   : > { %1236 = vmatmul.f32.gmra.mxu2 %v548_v48 }
  0xde   : > { %1123 = vmatmul.f32.gmra.mxu1 %v547_v51  ;;  %v588_v51 = vld [vmem:[%s4525_s3 + $0x4d0] sm:$0xff] }
  0xe1   : > { %1013 = vmatmul.f32.gmra.mxu0 %v554_v54  ;;  %1174 = vmatmul.f32.gmra.mxu3 %v683_v55  ;;  %v788_v54 = vld [vmem:[#allocation6 + $0x310] sm:$0xff] }
  0xe2   : > { %v824_v55 = vld [vmem:[#allocation6 + $0x430] sm:$0xff]  ;;  %1305 = vmatpush.msrb.mxu3 %v788_v54 }
  0xe3   : > { %1239 = vmatmul.f32.gmra.mxu2 %v556_v56  ;;  %v866_v56 = vld [vmem:[#allocation6 + $0x580] sm:$0xff]  ;;  %1416 = vmatpush.msrb.mxu0 %v824_v55 }
  0xe4   : > { %1524 = vmatpush.msrb.mxu1 %v866_v56  ;;  %1306 = vmatpush.msrb.mxu3 %v786_v1  ;;  %v618_v55 = vld [vmem:[%s4525_s3 + $0x5c0] sm:$0xff]  ;;  %v684_v56 = vld [vmem:[%s4525_s3 + $0x7d0] sm:$0xff] }
  0xe6   : > { %v4723_v60 = vpop.f32.mrf.mxu0  ;;  %1126 = vmatmul.f32.gmra.mxu1 %v555_v58  ;;  %v587_v58 = vld [vmem:[%s4525_s3 + $0x4c8] sm:$0xff] }
  0xe7   : > { %1525 = vmatpush.msrb.mxu1 %v864_v63  ;;  %v619_v63 = vld [vmem:[%s4525_s3 + $0x5c8] sm:$0xff] }
  0xe9   : > { %1016 = vmatmul.f32.gmra.mxu0 %v562_v61  ;;  %1266 = vmatmul.f32.vlgmr.msra.gmra.mxu3 %v628_v62  ;;  %v822_v62 = vld [vmem:[#allocation6 + $0x420] sm:$0xff] }
  0xea   : > { %1417 = vmatpush.msrb.mxu0 %v822_v62  ;;  %1526 = vmatpush.msrb.mxu1 %v862_v9 }
  0xeb   : > { %1242 = vmatmul.f32.gmra.mxu2 %v564_v0  ;;  %v4728_v5 = vpop.f32.mrf.mxu1  ;;  %v892_v0 = vld [vmem:[#allocation6 + $0x650] sm:$0xff]  ;;  %1743 = vmatpush.msra.mxu3 %v944_v15 }
  0xec   : > { %v4731_v8 = vpop.f32.mrf.mxu3  ;;  %1640 = vmatpush.msrb.mxu2 %v892_v0  ;;  %1527 = vmatpush.msrb.mxu1 %v860_v16  ;;  %v946_v0 = vld [vmem:[#allocation8] sm:$0x3] }
  0xed   : > { %1744 = vmatpush.msra.mxu3 %v942_v50 }
  0xee   : > { %v4733_v2 = vpop.f32.mrf.mxu0  ;;  %v4737_v6 = vpop.f32.mrf.mxu2  ;;  %1129 = vmatmul.f32.gmra.mxu1 %v563_v7  ;;  %v594_v7 = vld [vmem:[%s4525_s3 + $0x500] sm:$0xff] }
  0xef   : > { %1528 = vmatpush.msrb.mxu1 %v858_v23 }
  0xf1   : > { %1019 = vmatmul.f32.gmra.mxu0 %v570_v4  ;;  %1269 = vmatmul.f32.gmra.mxu3 %v636_v11  ;;  %v820_v11 = vld [vmem:[#allocation6 + $0x410] sm:$0xff] }
  0xf2   : > { %1418 = vmatpush.msrb.mxu0 %v820_v11  ;;  %1529 = vmatpush.msrb.mxu1 %v856_v31  ;;  %v438_v11 = vld [vmem:[%s4525_s3 + $0x20] sm:$0xff] }
  0xf3   : > { %1245 = vmatmul.f32.gmra.mxu2 %v572_v13  ;;  %v4740_v17 = vpop.f32.mrf.mxu1  ;;  %v890_v13 = vld [vmem:[#allocation6 + $0x640] sm:$0xff] }
  0xf4   : > { %v4743_v21 = vpop.f32.mrf.mxu3  ;;  %1641 = vmatpush.msrb.mxu2 %v890_v13  ;;  %1419 = vmatpush.msrb.mxu0 %v818_v14  ;;  %v440_v13 = vld [vmem:[%s4525_s3 + $0x30] sm:$0xff] }
  0xf5   : > { %1530 = vmatpush.msrb.mxu1 %v854_v34  ;;  %v940_v14 = vld [vmem:[#allocation6 + $0x7d0] sm:$0xff]  ;;  %v447_v34 = vld [vmem:[%s4525_s3 + $0x68] sm:$0xff] }
  0xf6   : > { %v4745_v25 = vpop.f32.mrf.mxu0  ;;  %v4749_v28 = vpop.f32.mrf.mxu2  ;;  %1132 = vmatmul.f32.gmra.mxu1 %v571_v18  ;;  %1642 = vmatpush.msrb.mxu2 %v888_v20 }
  0xf7   : > { %1531 = vmatpush.msrb.mxu1 %v852_v41  ;;  %1745 = vmatpush.msra.mxu3 %v940_v14 }
  0xf8   : > { %1643 = vmatpush.msrb.mxu2 %v886_v24 }
  0xf9   : > { %1022 = vmatmul.f32.gmra.mxu0 %v578_v26  ;;  %1272 = vmatmul.f32.gmra.mxu3 %v644_v27  ;;  %v602_v27 = vld [vmem:[%s4525_s3 + $0x540] sm:$0xff] }
  0xfb   : > { %1248 = vmatmul.f32.gmra.mxu2 %v580_v32  ;;  %v4752_v36 = vpop.f32.mrf.mxu1  ;;  %v884_v32 = vld [vmem:[#allocation6 + $0x610] sm:$0xff] }
  0xfc   : > { %v4755_v40 = vpop.f32.mrf.mxu3  ;;  %1644 = vmatpush.msrb.mxu2 %v884_v32  ;;  %v448_v32 = vld [vmem:[%s4525_s3 + $0x70] sm:$0xff] }
  0xfe   : > { %v4757_v45 = vpop.f32.mrf.mxu0  ;;  %v4761_v48 = vpop.f32.mrf.mxu2  ;;  %1135 = vmatmul.f32.gmra.mxu1 %v579_v37  ;;  %1645 = vmatpush.msrb.mxu2 %v882_v35 }
 0x101   : > { %1025 = vmatmul.f32.gmra.mxu0 %v586_v46  ;;  %1275 = vmatmul.f32.gmra.mxu3 %v652_v47  ;;  %v850_v47 = vld [vmem:[#allocation6 + $0x500] sm:$0xff] }
 0x102   : > { %1532 = vmatpush.msrb.mxu1 %v850_v47 }
 0x103   : > { %1251 = vmatmul.f32.gmra.mxu2 %v588_v51  ;;  %v4764_v57 = vpop.f32.mrf.mxu1 }
 0x104   : > { %v4767_v61 = vpop.f32.mrf.mxu3 }
 0x106   : > { %v4769_v3 = vpop.f32.mrf.mxu0  ;;  %v4773_v4 = vpop.f32.mrf.mxu2  ;;  %1138 = vmatmul.f32.gmra.mxu1 %v587_v58 }
 0x109   : > { %1028 = vmatmul.f32.gmra.mxu0 %v594_v7  ;;  %1278 = vmatmul.f32.gmra.mxu3 %v660_v10  ;;  %v437_v10 = vld [vmem:[%s4525_s3 + $0x18] sm:$0xff] }
 0x10b   : > { %1254 = vmatmul.f32.gmra.mxu2 %v596_v12  ;;  %v4776_v18 = vpop.f32.mrf.mxu1  ;;  %v4823_v12 = vperm.slane %v946_v0, 0  ;;  %v461_v0 = vld [vmem:[%s4525_s3 + $0xd8] sm:$0xff] }
 0x10c   : > { %v4779_v22 = vpop.f32.mrf.mxu3 }
 0x10d   : > { %v1042_v15 = vadd.f32 %v4731_v8, %v4823_v12  ;;  %v1045_v8 = vadd.f32 %v4743_v21, %v4823_v12  ;;  %v938_v21 = vld [vmem:[#allocation6 + $0x7c0] sm:$0xff]  ;;  %v1048_v50 = vadd.f32 %v4755_v40, %v4823_v12  ;;  %v1051_v40 = vadd.f32 %v4767_v61, %v4823_v12  ;;  %v936_v61 = vld [vmem:[#allocation6 + $0x7b0] sm:$0xff] }
 0x10e   : > { %v4781_v26 = vpop.f32.mrf.mxu0  ;;  %v4785_v30 = vpop.f32.mrf.mxu2  ;;  %1141 = vmatmul.f32.gmra.mxu1 %v595_v19  ;;  %v439_v19 = vld [vmem:[%s4525_s3 + $0x28] sm:$0xff]  ;;  %1746 = vmatpush.msra.mxu3 %v938_v21 }
 0x110   : > { %1747 = vmatpush.msra.mxu3 %v936_v61 }
 0x111   : > { %1031 = vmatmul.f32.gmra.mxu0 %v602_v27  ;;  %1281 = vmatmul.f32.gmra.mxu3 %v668_v29  ;;  %v445_v27 = vld [vmem:[%s4525_s3 + $0x58] sm:$0xff]  ;;  %v446_v29 = vld [vmem:[%s4525_s3 + $0x60] sm:$0xff] }
 0x113   : > { %1257 = vmatmul.f32.gmra.mxu2 %v604_v33  ;;  %v4788_v37 = vpop.f32.mrf.mxu1 }
 0x114   : > { %v4791_v39 = vpop.f32.mrf.mxu3 }
 0x116   : > { %v4793_v42 = vpop.f32.mrf.mxu0  ;;  %v4797_v46 = vpop.f32.mrf.mxu2  ;;  %1144 = vmatmul.f32.gmra.mxu1 %v603_v38 }
 0x119   : > { %1034 = vmatmul.f32.gmra.mxu0 %v610_v43  ;;  %1284 = vmatmul.f32.gmra.mxu3 %v676_v44  ;;  %v453_v43 = vld [vmem:[%s4525_s3 + $0x98] sm:$0xff]  ;;  %v454_v44 = vld [vmem:[%s4525_s3 + $0xa0] sm:$0xff] }
 0x11b   : > { %1260 = vmatmul.f32.gmra.mxu2 %v612_v49  ;;  %v4800_v51 = vpop.f32.mrf.mxu1  ;;  %v456_v49 = vld [vmem:[%s4525_s3 + $0xb0] sm:$0xff] }
 0x11c   : > { %v4803_v53 = vpop.f32.mrf.mxu3 }
 0x11e   : > { %v4805_v54 = vpop.f32.mrf.mxu0  ;;  %v4809_v58 = vpop.f32.mrf.mxu2  ;;  %1147 = vmatmul.f32.gmra.mxu1 %v611_v52 }
 0x121   : > { %1037 = vmatmul.f32.gmra.mxu0 %v618_v55  ;;  %1287 = vmatmul.f32.gmra.mxu3 %v684_v56  ;;  %v455_v55 = vld [vmem:[%s4525_s3 + $0xa8] sm:$0xff] }
 0x123   : > { %1263 = vmatmul.f32.gmra.mxu2 %v620_v59  ;;  %v4812_v62 = vpop.f32.mrf.mxu1 }
 0x124   : > { %v4815_v1 = vpop.f32.mrf.mxu3 }
 0x126   : > { %v4817_v7 = vpop.f32.mrf.mxu0  ;;  %v4821_v9 = vpop.f32.mrf.mxu2  ;;  %1150 = vmatmul.f32.gmra.mxu1 %v619_v63 }
 0x129   : > { %1307 = vmatmul.f32.vlgmr.msrb.gmra.mxu3 %v437_v10  ;;  %1420 = vmatmul.f32.vlgmr.msrb.gmra.mxu0 %v438_v11  ;;  %v462_v10 = vld [vmem:[%s4525_s3 + $0xe0] sm:$0xff] }
 0x12b   : > { %1646 = vmatmul.f32.vlgmr.msrb.gmra.mxu2 %v440_v13  ;;  %v4828_v16 = vpop.f32.mrf.mxu1  ;;  %v464_v13 = vld [vmem:[%s4525_s3 + $0xf0] sm:$0xff] }
 0x12c   : > { %v1154_v20 = vpop.f32.mrf.mxu3 }
 0x12d   : > { %v4831_v23 = vadd.f32 %v1154_v20, %v1042_v15  ;;  %v463_v15 = vld [vmem:[%s4525_s3 + $0xe8] sm:$0xff] }
 0x12e   : > { %v4833_v24 = vpop.f32.mrf.mxu0  ;;  %v4837_v31 = vpop.f32.mrf.mxu2  ;;  %1533 = vmatmul.f32.vlgmr.msrb.gmra.mxu1 %v439_v19 }
 0x131   : > { %1310 = vmatmul.f32.gmra.mxu3 %v445_v27  ;;  %1423 = vmatmul.f32.gmra.mxu0 %v446_v29  ;;  %v469_v29 = vld [vmem:[%s4525_s3 + $0x118] sm:$0xff] }
 0x133   : > { %1649 = vmatmul.f32.gmra.mxu2 %v448_v32  ;;  %v4842_v33 = vpop.f32.mrf.mxu1  ;;  %v470_v32 = vld [vmem:[%s4525_s3 + $0x120] sm:$0xff] }
 0x134   : > { %v1157_v35 = vpop.f32.mrf.mxu3 }
 0x135   : > { %v4845_v38 = vadd.f32 %v1157_v35, %v1045_v8  ;;  %v1054_v35 = vadd.f32 %v4779_v22, %v4823_v12  ;;  %v1057_v22 = vadd.f32 %v4791_v39, %v4823_v12  ;;  %v934_v39 = vld [vmem:[#allocation6 + $0x7a0] sm:$0xff] }
 0x136   : > { %v4847_v41 = vpop.f32.mrf.mxu0  ;;  %v4851_v47 = vpop.f32.mrf.mxu2  ;;  %1536 = vmatmul.f32.gmra.mxu1 %v447_v34  ;;  %v472_v34 = vld [vmem:[%s4525_s3 + $0x130] sm:$0xff]  ;;  %1748 = vmatpush.msra.mxu3 %v934_v39  ;;  %v495_v39 = vld [vmem:[%s4525_s3 + $0x1e8] sm:$0xff] }
 0x139   : > { %1313 = vmatmul.f32.gmra.mxu3 %v453_v43  ;;  %1426 = vmatmul.f32.gmra.mxu0 %v454_v44  ;;  %v471_v44 = vld [vmem:[%s4525_s3 + $0x128] sm:$0xff] }
 0x13b   : > { %1652 = vmatmul.f32.gmra.mxu2 %v456_v49  ;;  %v4856_v52 = vpop.f32.mrf.mxu1 }
 0x13c   : > { %v1160_v56 = vpop.f32.mrf.mxu3 }
 0x13d   : > { %v4859_v59 = vadd.f32 %v1160_v56, %v1048_v50  ;;  %v478_v56 = vld [vmem:[%s4525_s3 + $0x160] sm:$0xff] }
 0x13e   : > { %v4861_v63 = vpop.f32.mrf.mxu0  ;;  %v4865_v11 = vpop.f32.mrf.mxu2  ;;  %1539 = vmatmul.f32.gmra.mxu1 %v455_v55  ;;  %v477_v55 = vld [vmem:[%s4525_s3 + $0x158] sm:$0xff] }
 0x141   : > { %1316 = vmatmul.f32.gmra.mxu3 %v461_v0  ;;  %1429 = vmatmul.f32.gmra.mxu0 %v462_v10  ;;  %v480_v10 = vld [vmem:[%s4525_s3 + $0x170] sm:$0xff] }
 0x143   : > { %1655 = vmatmul.f32.gmra.mxu2 %v464_v13  ;;  %v4870_v14 = vpop.f32.mrf.mxu1 }
 0x144   : > { %v1163_v19 = vpop.f32.mrf.mxu3 }
 0x145   : > { %v4873_v20 = vadd.f32 %v1163_v19, %v1051_v40  ;;  %v479_v40 = vld [vmem:[%s4525_s3 + $0x168] sm:$0xff] }
 0x146   : > { %v4875_v27 = vpop.f32.mrf.mxu0  ;;  %v4879_v8 = vpop.f32.mrf.mxu2  ;;  %1542 = vmatmul.f32.gmra.mxu1 %v463_v15 }
 0x149   : > { %1319 = vmatmul.f32.gmra.mxu3 %v469_v29  ;;  %1432 = vmatmul.f32.gmra.mxu0 %v470_v32  ;;  %v485_v32 = vld [vmem:[%s4525_s3 + $0x198] sm:$0xff] }
 0x14b   : > { %1658 = vmatmul.f32.gmra.mxu2 %v472_v34  ;;  %v4884_v43 = vpop.f32.mrf.mxu1  ;;  %v486_v34 = vld [vmem:[%s4525_s3 + $0x1a0] sm:$0xff] }
 0x14c   : > { %v1166_v49 = vpop.f32.mrf.mxu3 }
 0x14d   : > { %v4887_v21 = vadd.f32 %v1166_v49, %v1054_v35  ;;  %v488_v35 = vld [vmem:[%s4525_s3 + $0x1b0] sm:$0xff] }
 0x14e   : > { %v4889_v50 = vpop.f32.mrf.mxu0  ;;  %v4893_v0 = vpop.f32.mrf.mxu2  ;;  %1545 = vmatmul.f32.gmra.mxu1 %v471_v44  ;;  %v1060_v44 = vadd.f32 %v4803_v53, %v4823_v12  ;;  %v1063_v53 = vadd.f32 %v4815_v1, %v4823_v12  ;;  %v932_v1 = vld [vmem:[#allocation6 + $0x790] sm:$0xff] }
 0x14f   : > { %1749 = vmatpush.msra.mxu3 %v932_v1  ;;  %v511_v1 = vld [vmem:[%s4525_s3 + $0x268] sm:$0xff] }
 0x151   : > { %1322 = vmatmul.f32.gmra.mxu3 %v477_v55  ;;  %1435 = vmatmul.f32.gmra.mxu0 %v478_v56  ;;  %v487_v55 = vld [vmem:[%s4525_s3 + $0x1a8] sm:$0xff] }
 0x153   : > { %1661 = vmatmul.f32.gmra.mxu2 %v480_v10  ;;  %v4898_v13 = vpop.f32.mrf.mxu1 }
 0x154   : > { %v1169_v15 = vpop.f32.mrf.mxu3 }
 0x155   : > { %v4901_v19 = vadd.f32 %v1169_v15, %v1057_v22  ;;  %v494_v15 = vld [vmem:[%s4525_s3 + $0x1e0] sm:$0xff] }
 0x156   : > { %v4903_v29 = vpop.f32.mrf.mxu0  ;;  %v4907_v61 = vpop.f32.mrf.mxu2  ;;  %1548 = vmatmul.f32.gmra.mxu1 %v479_v40  ;;  %v493_v40 = vld [vmem:[%s4525_s3 + $0x1d8] sm:$0xff] }
 0x159   : > { %1325 = vmatmul.f32.gmra.mxu3 %v485_v32  ;;  %1438 = vmatmul.f32.gmra.mxu0 %v486_v34  ;;  %v496_v34 = vld [vmem:[%s4525_s3 + $0x1f0] sm:$0xff] }
 0x15b   : > { %1664 = vmatmul.f32.gmra.mxu2 %v488_v35  ;;  %v4912_v49 = vpop.f32.mrf.mxu1 }
 0x15c   : > { %6440 = vst [vmem:[#allocation20_spill] sm:$0xff] %v4912_v49  ;;  %v1172_v56 = vpop.f32.mrf.mxu3 }
 0x15d   : > { %v4915_v10 = vadd.f32 %v1172_v56, %v1060_v44 }
 0x15e   : > { %v4917_v22 = vpop.f32.mrf.mxu0  ;;  %v4921_v32 = vpop.f32.mrf.mxu2  ;;  %1551 = vmatmul.f32.gmra.mxu1 %v487_v55  ;;  %v502_v55 = vld [vmem:[%s4525_s3 + $0x220] sm:$0xff] }
 0x15f   : > { %6441 = vst [vmem:[#allocation21_spill] sm:$0xff] %v4917_v22 }
 0x160   : > { %6442 = vst [vmem:[#allocation22_spill] sm:$0xff] %v4921_v32  ;;  %v501_v32 = vld [vmem:[%s4525_s3 + $0x218] sm:$0xff] }
 0x161   : > { %1328 = vmatmul.f32.gmra.mxu3 %v493_v40  ;;  %1441 = vmatmul.f32.gmra.mxu0 %v494_v15  ;;  %v504_v40 = vld [vmem:[%s4525_s3 + $0x230] sm:$0xff] }
 0x163   : > { %1667 = vmatmul.f32.gmra.mxu2 %v496_v34  ;;  %v4926_v35 = vpop.f32.mrf.mxu1  ;;  %v503_v34 = vld [vmem:[%s4525_s3 + $0x228] sm:$0xff] }
 0x164   : > { %v1175_v44 = vpop.f32.mrf.mxu3 }
 0x165   : > { %v4929_v56 = vadd.f32 %v1175_v44, %v1063_v53 }
 0x166   : > { %v4931_v22 = vpop.f32.mrf.mxu0  ;;  %v4935_v49 = vpop.f32.mrf.mxu2  ;;  %1554 = vmatmul.f32.gmra.mxu1 %v495_v39  ;;  %v509_v39 = vld [vmem:[%s4525_s3 + $0x258] sm:$0xff] }
 0x167   : > { %6443 = vst [vmem:[#allocation23_spill] sm:$0xff] %v4931_v22 }
 0x168   : > { %6444 = vst [vmem:[#allocation24_spill] sm:$0xff] %v4935_v49  ;;  %v510_v49 = vld [vmem:[%s4525_s3 + $0x260] sm:$0xff] }
 0x169   : > { %1331 = vmatmul.f32.gmra.mxu3 %v501_v32  ;;  %1444 = vmatmul.f32.gmra.mxu0 %v502_v55  ;;  %v512_v55 = vld [vmem:[%s4525_s3 + $0x270] sm:$0xff] }
 0x16b   : > { %1670 = vmatmul.f32.gmra.mxu2 %v504_v40  ;;  %v4938_v15 = vpop.f32.mrf.mxu1 }
 0x16c   : > { %6445 = vst [vmem:[#allocation25_spill] sm:$0xff] %v4938_v15  ;;  %v1267_v53 = vpop.f32.mrf.mxu3 }
 0x16d   : > { %v4942_v44 = vadd.f32 %v1267_v53, %v4831_v23 }
 0x16e   : > { %v4944_v22 = vpop.f32.mrf.mxu0  ;;  %v4948_v32 = vpop.f32.mrf.mxu2  ;;  %1557 = vmatmul.f32.gmra.mxu1 %v503_v34  ;;  %v930_v34 = vld [vmem:[#allocation6 + $0x780] sm:$0xff] }
 0x16f   : > { %6446 = vst [vmem:[#allocation26_spill] sm:$0xff] %v4942_v44  ;;  %v517_v44 = vld [vmem:[%s4525_s3 + $0x298] sm:$0xff]  ;;  %1750 = vmatpush.msra.mxu3 %v930_v34  ;;  %v527_v34 = vld [vmem:[%s4525_s3 + $0x2e8] sm:$0xff] }
 0x170   : > { %6447 = vst [vmem:[#allocation27_spill] sm:$0xff] %v4944_v22  ;;  %v518_v22 = vld [vmem:[%s4525_s3 + $0x2a0] sm:$0xff] }
 0x171   : > { %6448 = vst [vmem:[#allocation28_spill] sm:$0xff] %v4948_v32  ;;  %1334 = vmatmul.f32.gmra.mxu3 %v509_v39  ;;  %1447 = vmatmul.f32.gmra.mxu0 %v510_v49  ;;  %v520_v49 = vld [vmem:[%s4525_s3 + $0x2b0] sm:$0xff] }
 0x173   : > { %1673 = vmatmul.f32.gmra.mxu2 %v512_v55  ;;  %v4951_v40 = vpop.f32.mrf.mxu1 }
 0x174   : > { %v1270_v15 = vpop.f32.mrf.mxu3 }
 0x175   : > { %v4955_v23 = vadd.f32 %v1270_v15, %v4845_v38  ;;  %v519_v38 = vld [vmem:[%s4525_s3 + $0x2a8] sm:$0xff] }
 0x176   : > { %v4957_v53 = vpop.f32.mrf.mxu0  ;;  %v4961_v32 = vpop.f32.mrf.mxu2  ;;  %1560 = vmatmul.f32.gmra.mxu1 %v511_v1  ;;  %v525_v1 = vld [vmem:[%s4525_s3 + $0x2d8] sm:$0xff] }
 0x177   : > { %6449 = vst [vmem:[#allocation29_spill] sm:$0xff] %v4955_v23 }
 0x178   : > { %6450 = vst [vmem:[#allocation30_spill] sm:$0xff] %v4961_v32  ;;  %v526_v32 = vld [vmem:[%s4525_s3 + $0x2e0] sm:$0xff] }
 0x179   : > { %1337 = vmatmul.f32.gmra.mxu3 %v517_v44  ;;  %1450 = vmatmul.f32.gmra.mxu0 %v518_v22  ;;  %v528_v22 = vld [vmem:[%s4525_s3 + $0x2f0] sm:$0xff] }
 0x17b   : > { %1676 = vmatmul.f32.gmra.mxu2 %v520_v49  ;;  %v4964_v39 = vpop.f32.mrf.mxu1 }
 0x17c   : > { %6451 = vst [vmem:[#allocation31_spill] sm:$0xff] %v4964_v39  ;;  %v1273_v15 = vpop.f32.mrf.mxu3 }
 0x17d   : > { %v4968_v55 = vadd.f32 %v1273_v15, %v4859_v59 }
 0x17e   : > { %v4970_v23 = vpop.f32.mrf.mxu0  ;;  %v4974_v44 = vpop.f32.mrf.mxu2  ;;  %1563 = vmatmul.f32.gmra.mxu1 %v519_v38  ;;  %v536_v38 = vld [vmem:[%s4525_s3 + $0x330] sm:$0xff] }
 0x17f   : > { %6452 = vst [vmem:[#allocation32_spill] sm:$0xff] %v4968_v55  ;;  %v533_v55 = vld [vmem:[%s4525_s3 + $0x318] sm:$0xff] }
 0x180   : > { %6453 = vst [vmem:[#allocation33_spill] sm:$0xff] %v4970_v23  ;;  %v534_v23 = vld [vmem:[%s4525_s3 + $0x320] sm:$0xff] }
 0x181   : > { %6454 = vst [vmem:[#allocation34_spill] sm:$0xff] %v4974_v44  ;;  %1340 = vmatmul.f32.gmra.mxu3 %v525_v1  ;;  %1453 = vmatmul.f32.gmra.mxu0 %v526_v32  ;;  %v928_v32 = vld [vmem:[#allocation6 + $0x770] sm:$0xff] }
 0x182   : > { %1751 = vmatpush.msra.mxu3 %v928_v32  ;;  %v543_v32 = vld [vmem:[%s4525_s3 + $0x368] sm:$0xff] }
 0x183   : > { %1679 = vmatmul.f32.gmra.mxu2 %v528_v22  ;;  %v4977_v49 = vpop.f32.mrf.mxu1 }
 0x184   : > { %v1276_v39 = vpop.f32.mrf.mxu3 }
 0x185   : > { %v4981_v59 = vadd.f32 %v1276_v39, %v4873_v20  ;;  %v535_v20 = vld [vmem:[%s4525_s3 + $0x328] sm:$0xff] }
 0x186   : > { %v4983_v15 = vpop.f32.mrf.mxu0  ;;  %v4987_v44 = vpop.f32.mrf.mxu2  ;;  %1566 = vmatmul.f32.gmra.mxu1 %v527_v34 }
 0x187   : > { %6455 = vst [vmem:[#allocation35_spill] sm:$0xff] %v4981_v59 }
 0x188   : > { %6456 = vst [vmem:[#allocation36_spill] sm:$0xff] %v4983_v15  ;;  %v541_v15 = vld [vmem:[%s4525_s3 + $0x358] sm:$0xff] }
 0x189   : > { %6457 = vst [vmem:[#allocation37_spill] sm:$0xff] %v4987_v44  ;;  %1343 = vmatmul.f32.gmra.mxu3 %v533_v55  ;;  %1456 = vmatmul.f32.gmra.mxu0 %v534_v23  ;;  %v542_v44 = vld [vmem:[%s4525_s3 + $0x360] sm:$0xff]  ;;  %v721_v23 = vld [vmem:[#allocation6 + $0xf8] sm:$0xff]  ;;  %v544_v55 = vld [vmem:[%s4525_s3 + $0x370] sm:$0xff] }
 0x18a   : > { %1856 = vmatpush.msra.mxu0 %v721_v23  ;;  %v550_v23 = vld [vmem:[%s4525_s3 + $0x3a0] sm:$0xff] }
 0x18b   : > { %1682 = vmatmul.f32.gmra.mxu2 %v536_v38  ;;  %v4990_v1 = vpop.f32.mrf.mxu1  ;;  %v753_v38 = vld [vmem:[#allocation6 + $0x1f8] sm:$0xff] }
 0x18c   : > { %v1279_v39 = vpop.f32.mrf.mxu3  ;;  %1969 = vmatpush.msra.mxu1 %v753_v38 }
 0x18d   : > { %v4994_v22 = vadd.f32 %v1279_v39, %v4887_v21 }
 0x18e   : > { %v4996_v59 = vpop.f32.mrf.mxu0  ;;  %v5000_v34 = vpop.f32.mrf.mxu2  ;;  %1569 = vmatmul.f32.gmra.mxu1 %v535_v20  ;;  %v549_v20 = vld [vmem:[%s4525_s3 + $0x398] sm:$0xff] }
 0x18f   : > { %6458 = vst [vmem:[#allocation38_spill] sm:$0xff] %v4994_v22 }
 0x190   : > { %6459 = vst [vmem:[#allocation39_spill] sm:$0xff] %v4996_v59 }
 0x191   : > { %6460 = vst [vmem:[#allocation40_spill] sm:$0xff] %v5000_v34  ;;  %1346 = vmatmul.f32.gmra.mxu3 %v541_v15  ;;  %1459 = vmatmul.f32.gmra.mxu0 %v542_v44  ;;  %v552_v44 = vld [vmem:[%s4525_s3 + $0x3b0] sm:$0xff]  ;;  %v926_v15 = vld [vmem:[#allocation6 + $0x760] sm:$0xff] }
 0x192   : > { %1752 = vmatpush.msra.mxu3 %v926_v15 }
 0x193   : > { %1685 = vmatmul.f32.gmra.mxu2 %v544_v55  ;;  %v5003_v21 = vpop.f32.mrf.mxu1 }
 0x194   : > { %6461 = vst [vmem:[#allocation41_spill] sm:$0xff] %v5003_v21  ;;  %v1282_v39 = vpop.f32.mrf.mxu3  ;;  %v574_v21 = vld [vmem:[%s4525_s3 + $0x460] sm:$0xff] }
 0x195   : > { %v5007_v22 = vadd.f32 %v1282_v39, %v4901_v19  ;;  %v551_v19 = vld [vmem:[%s4525_s3 + $0x3a8] sm:$0xff] }
 0x196   : > { %v5009_v34 = vpop.f32.mrf.mxu0  ;;  %v5013_v59 = vpop.f32.mrf.mxu2  ;;  %1572 = vmatmul.f32.gmra.mxu1 %v543_v32 }
 0x197   : > { %6462 = vst [vmem:[#allocation42_spill] sm:$0xff] %v5007_v22 }
 0x198   : > { %6463 = vst [vmem:[#allocation43_spill] sm:$0xff] %v5009_v34  ;;  %v557_v34 = vld [vmem:[%s4525_s3 + $0x3d8] sm:$0xff] }
 0x199   : > { %6464 = vst [vmem:[#allocation44_spill] sm:$0xff] %v5013_v59  ;;  %1349 = vmatmul.f32.gmra.mxu3 %v549_v20  ;;  %1462 = vmatmul.f32.gmra.mxu0 %v550_v23  ;;  %v558_v59 = vld [vmem:[%s4525_s3 + $0x3e0] sm:$0xff]  ;;  %v719_v20 = vld [vmem:[#allocation6 + $0xe8] sm:$0xff]  ;;  %v560_v23 = vld [vmem:[%s4525_s3 + $0x3f0] sm:$0xff] }
 0x19a   : > { %1857 = vmatpush.msra.mxu0 %v719_v20  ;;  %v565_v20 = vld [vmem:[%s4525_s3 + $0x418] sm:$0xff] }
 0x19b   : > { %1688 = vmatmul.f32.gmra.mxu2 %v552_v44  ;;  %v5016_v55 = vpop.f32.mrf.mxu1  ;;  %v751_v44 = vld [vmem:[#allocation6 + $0x1e8] sm:$0xff] }
 0x19c   : > { %6465 = vst [vmem:[#allocation45_spill] sm:$0xff] %v5016_v55  ;;  %v1285_v38 = vpop.f32.mrf.mxu3  ;;  %1970 = vmatpush.msra.mxu1 %v751_v44  ;;  %v573_v55 = vld [vmem:[%s4525_s3 + $0x458] sm:$0xff] }
 0x19d   : > { %v5020_v39 = vadd.f32 %v1285_v38, %v4915_v10  ;;  %v970_v10 = vadd.f32 %v4723_v60, %v4823_v12  ;;  %v559_v38 = vld [vmem:[%s4525_s3 + $0x3e8] sm:$0xff]  ;;  %v568_v60 = vld [vmem:[%s4525_s3 + $0x430] sm:$0xff] }
 0x19e   : > { %v5022_v22 = vpop.f32.mrf.mxu0  ;;  %v5026_v32 = vpop.f32.mrf.mxu2  ;;  %1575 = vmatmul.f32.gmra.mxu1 %v551_v19 }
 0x19f   : > { %6466 = vst [vmem:[#allocation46_spill] sm:$0xff] %v5020_v39 }
 0x1a0   : > { %6467 = vst [vmem:[#allocation47_spill] sm:$0xff] %v5022_v22  ;;  %v566_v22 = vld [vmem:[%s4525_s3 + $0x420] sm:$0xff] }
 0x1a1   : > { %6468 = vst [vmem:[#allocation48_spill] sm:$0xff] %v5026_v32  ;;  %1352 = vmatmul.f32.gmra.mxu3 %v557_v34  ;;  %1465 = vmatmul.f32.gmra.mxu0 %v558_v59  ;;  %v1083_v59 = vadd.f32 %v4728_v5, %v970_v10 }
 0x1a3   : > { %1691 = vmatmul.f32.gmra.mxu2 %v560_v23  ;;  %v5031_v15 = vpop.f32.mrf.mxu1  ;;  %v924_v23 = vld [vmem:[#allocation6 + $0x750] sm:$0xff] }
 0x1a4   : > { %6469 = vst [vmem:[#allocation49_spill] sm:$0xff] %v5031_v15  ;;  %v1288_v39 = vpop.f32.mrf.mxu3  ;;  %1753 = vmatpush.msra.mxu3 %v924_v23 }
 0x1a5   : > { %v5035_v32 = vadd.f32 %v1288_v39, %v4929_v56  ;;  %v973_v56 = vadd.f32 %v4733_v2, %v4823_v12  ;;  %v1196_v39 = vadd.f32 %v4737_v6, %v1083_v59  ;;  %v576_v2 = vld [vmem:[%s4525_s3 + $0x470] sm:$0xff]  ;;  %v749_v59 = vld [vmem:[#allocation6 + $0x1d8] sm:$0xff] }
 0x1a6   : > { %v1421_v19 = vpop.f32.mrf.mxu0  ;;  %v5039_v34 = vpop.f32.mrf.mxu2  ;;  %1578 = vmatmul.f32.gmra.mxu1 %v559_v38 }
 0x1a7   : > { %6470 = vst [vmem:[#allocation50_spill] sm:$0xff] %v5035_v32  ;;  %v567_v32 = vld [vmem:[%s4525_s3 + $0x428] sm:$0xff]  ;;  %v1086_v10 = vadd.f32 %v4740_v17, %v973_v56  ;;  %1971 = vmatpush.msra.mxu1 %v749_v59 }
 0x1a8   : > { %6471 = vst [vmem:[#allocation51_spill] sm:$0xff] %v5039_v34 }
 0x1a9   : > { %1355 = vmatmul.f32.gmra.mxu3 %v565_v20  ;;  %1468 = vmatmul.f32.gmra.mxu0 %v566_v22  ;;  %v717_v22 = vld [vmem:[#allocation6 + $0xd8] sm:$0xff] }
 0x1aa   : > { %1858 = vmatpush.msra.mxu0 %v717_v22 }
 0x1ab   : > { %1694 = vmatmul.f32.gmra.mxu2 %v568_v60  ;;  %v1534_v44 = vpop.f32.mrf.mxu1 }
 0x1ac   : > { %v1308_v34 = vpop.f32.mrf.mxu3 }
 0x1ad   : > { %v1309_v15 = vadd.f32 %v1308_v34, %v1196_v39  ;;  %v976_v34 = vadd.f32 %v4745_v25, %v4823_v12  ;;  %v581_v39 = vld [vmem:[%s4525_s3 + $0x498] sm:$0xff]  ;;  %v584_v25 = vld [vmem:[%s4525_s3 + $0x4b0] sm:$0xff] }
 0x1ae   : > { %v1424_v38 = vpop.f32.mrf.mxu0  ;;  %v1647_v5 = vpop.f32.mrf.mxu2  ;;  %1581 = vmatmul.f32.gmra.mxu1 %v567_v32  ;;  %v1199_v32 = vadd.f32 %v4749_v28, %v1086_v10  ;;  %v979_v10 = vadd.f32 %v4757_v45, %v4823_v12 }
 0x1af   : > { %v1422_v20 = vadd.f32 %v1421_v19, %v1309_v15  ;;  %v575_v15 = vld [vmem:[%s4525_s3 + $0x468] sm:$0xff] }
 0x1b1   : > { %v1535_v6 = vadd.f32 %v1534_v44, %v1422_v20  ;;  %1358 = vmatmul.f32.gmra.mxu3 %v573_v55  ;;  %1471 = vmatmul.f32.gmra.mxu0 %v574_v21  ;;  %v582_v44 = vld [vmem:[%s4525_s3 + $0x4a0] sm:$0xff]  ;;  %v1089_v55 = vadd.f32 %v4752_v36, %v976_v34  ;;  %v583_v36 = vld [vmem:[%s4525_s3 + $0x4a8] sm:$0xff] }
 0x1b3   : > { %v5054_v60 = vadd.f32 %v1647_v5, %v1535_v6  ;;  %1697 = vmatmul.f32.gmra.mxu2 %v576_v2  ;;  %v1537_v17 = vpop.f32.mrf.mxu1  ;;  %v922_v5 = vld [vmem:[#allocation6 + $0x740] sm:$0xff]  ;;  %v1202_v20 = vadd.f32 %v4761_v48, %v1089_v55  ;;  %v592_v48 = vld [vmem:[%s4525_s3 + $0x4f0] sm:$0xff] }
 0x1b4   : > { %v1311_v19 = vpop.f32.mrf.mxu3  ;;  %1754 = vmatpush.msra.mxu3 %v922_v5 }
 0x1b5   : > { %v1312_v23 = vadd.f32 %v1311_v19, %v1199_v32  ;;  %v589_v32 = vld [vmem:[%s4525_s3 + $0x4d8] sm:$0xff]  ;;  %v715_v19 = vld [vmem:[#allocation6 + $0xc8] sm:$0xff] }
 0x1b6   : > { %v1427_v56 = vpop.f32.mrf.mxu0  ;;  %v1650_v21 = vpop.f32.mrf.mxu2  ;;  %1584 = vmatmul.f32.gmra.mxu1 %v575_v15  ;;  %1859 = vmatpush.msra.mxu0 %v715_v19 }
 0x1b7   : > { %v1425_v22 = vadd.f32 %v1424_v38, %v1312_v23  ;;  %v1092_v23 = vadd.f32 %v4764_v57, %v979_v10  ;;  %v597_v10 = vld [vmem:[%s4525_s3 + $0x518] sm:$0xff] }
 0x1b9   : > { %v1538_v28 = vadd.f32 %v1537_v17, %v1425_v22  ;;  %1361 = vmatmul.f32.gmra.mxu3 %v581_v39  ;;  %1474 = vmatmul.f32.gmra.mxu0 %v582_v44  ;;  %v590_v17 = vld [vmem:[%s4525_s3 + $0x4e0] sm:$0xff]  ;;  %v747_v44 = vld [vmem:[#allocation6 + $0x1c8] sm:$0xff]  ;;  %v1205_v55 = vadd.f32 %v4773_v4, %v1092_v23 }
 0x1ba   : > { %1972 = vmatpush.msra.mxu1 %v747_v44 }
 0x1bb   : > { %v5064_v2 = vadd.f32 %v1650_v21, %v1538_v28  ;;  %1700 = vmatmul.f32.gmra.mxu2 %v584_v25  ;;  %v1540_v6 = vpop.f32.mrf.mxu1  ;;  %v982_v21 = vadd.f32 %v4769_v3, %v4823_v12  ;;  %v600_v3 = vld [vmem:[%s4525_s3 + $0x530] sm:$0xff] }
 0x1bc   : > { %v1314_v38 = vpop.f32.mrf.mxu3 }
 0x1bd   : > { %v1315_v59 = vadd.f32 %v1314_v38, %v1202_v20  ;;  %v598_v20 = vld [vmem:[%s4525_s3 + $0x520] sm:$0xff] }
 0x1be   : > { %v1430_v34 = vpop.f32.mrf.mxu0  ;;  %v1653_v15 = vpop.f32.mrf.mxu2  ;;  %1587 = vmatmul.f32.gmra.mxu1 %v583_v36  ;;  %v1095_v36 = vadd.f32 %v4776_v18, %v982_v21  ;;  %v599_v18 = vld [vmem:[%s4525_s3 + $0x528] sm:$0xff]  ;;  %v713_v21 = vld [vmem:[#allocation6 + $0xb8] sm:$0xff] }
 0x1bf   : > { %v1428_v45 = vadd.f32 %v1427_v56, %v1315_v59  ;;  %v591_v56 = vld [vmem:[%s4525_s3 + $0x4e8] sm:$0xff]  ;;  %v920_v59 = vld [vmem:[#allocation6 + $0x730] sm:$0xff]  ;;  %1860 = vmatpush.msra.mxu0 %v713_v21  ;;  %v622_v21 = vld [vmem:[%s4525_s3 + $0x5e0] sm:$0xff] }
 0x1c0   : > { %1755 = vmatpush.msra.mxu3 %v920_v59 }
 0x1c1   : > { %v1541_v39 = vadd.f32 %v1540_v6, %v1428_v45  ;;  %1364 = vmatmul.f32.gmra.mxu3 %v589_v32  ;;  %1477 = vmatmul.f32.gmra.mxu0 %v590_v17  ;;  %v985_v32 = vadd.f32 %v4781_v26, %v4823_v12  ;;  %v1208_v17 = vadd.f32 %v4785_v30, %v1095_v36  ;;  %v608_v30 = vld [vmem:[%s4525_s3 + $0x570] sm:$0xff] }
 0x1c3   : > { %v5074_v22 = vadd.f32 %v1653_v15, %v1541_v39  ;;  %1703 = vmatmul.f32.gmra.mxu2 %v592_v48  ;;  %v1543_v57 = vpop.f32.mrf.mxu1  ;;  %v605_v48 = vld [vmem:[%s4525_s3 + $0x558] sm:$0xff]  ;;  %v606_v39 = vld [vmem:[%s4525_s3 + $0x560] sm:$0xff] }
 0x1c4   : > { %v1317_v25 = vpop.f32.mrf.mxu3 }
 0x1c5   : > { %v1318_v28 = vadd.f32 %v1317_v25, %v1205_v55  ;;  %v1098_v55 = vadd.f32 %v4788_v37, %v985_v32  ;;  %v988_v25 = vadd.f32 %v4793_v42, %v4823_v12  ;;  %v616_v42 = vld [vmem:[%s4525_s3 + $0x5b0] sm:$0xff] }
 0x1c6   : > { %v1433_v5 = vpop.f32.mrf.mxu0  ;;  %v1656_v6 = vpop.f32.mrf.mxu2  ;;  %1590 = vmatmul.f32.gmra.mxu1 %v591_v56  ;;  %v745_v56 = vld [vmem:[#allocation6 + $0x1b8] sm:$0xff] }
 0x1c7   : > { %v1431_v38 = vadd.f32 %v1430_v34, %v1318_v28  ;;  %1973 = vmatpush.msra.mxu1 %v745_v56  ;;  %v1211_v28 = vadd.f32 %v4797_v46, %v1098_v55  ;;  %v1101_v59 = vadd.f32 %v4800_v51, %v988_v25  ;;  %v615_v51 = vld [vmem:[%s4525_s3 + $0x5a8] sm:$0xff]  ;;  %v994_v25 = vadd.f32 %v4817_v7, %v4823_v12  ;;  %v632_v7 = vld [vmem:[%s4525_s3 + $0x630] sm:$0xff] }
 0x1c8   : > { %v743_v56 = vld [vmem:[#allocation6 + $0x1a8] sm:$0xff] }
 0x1c9   : > { %v1544_v4 = vadd.f32 %v1543_v57, %v1431_v38  ;;  %1367 = vmatmul.f32.gmra.mxu3 %v597_v10  ;;  %1480 = vmatmul.f32.gmra.mxu0 %v598_v20  ;;  %v613_v38 = vld [vmem:[%s4525_s3 + $0x598] sm:$0xff] }
 0x1ca   : > { %1974 = vmatpush.msra.mxu1 %v743_v56 }
 0x1cb   : > { %v5084_v15 = vadd.f32 %v1656_v6, %v1544_v4  ;;  %1706 = vmatmul.f32.gmra.mxu2 %v600_v3  ;;  %v1546_v19 = vpop.f32.mrf.mxu1  ;;  %v614_v3 = vld [vmem:[%s4525_s3 + $0x5a0] sm:$0xff] }
 0x1cc   : > { %v1320_v34 = vpop.f32.mrf.mxu3 }
 0x1cd   : > { %v1321_v23 = vadd.f32 %v1320_v34, %v1208_v17  ;;  %v918_v17 = vld [vmem:[#allocation6 + $0x720] sm:$0xff] }
 0x1ce   : > { %v1436_v45 = vpop.f32.mrf.mxu0  ;;  %v1659_v44 = vpop.f32.mrf.mxu2  ;;  %1593 = vmatmul.f32.gmra.mxu1 %v599_v18  ;;  %1756 = vmatpush.msra.mxu3 %v918_v17  ;;  %v1214_v18 = vadd.f32 %v4809_v58, %v1101_v59  ;;  %v624_v58 = vld [vmem:[%s4525_s3 + $0x5f0] sm:$0xff]  ;;  %v1107_v59 = vadd.f32 %v4828_v16, %v994_v25  ;;  %v631_v16 = vld [vmem:[%s4525_s3 + $0x628] sm:$0xff] }
 0x1cf   : > { %v1434_v26 = vadd.f32 %v1433_v5, %v1321_v23  ;;  %v607_v5 = vld [vmem:[%s4525_s3 + $0x568] sm:$0xff] }
 0x1d0   : > { %v1220_v17 = vadd.f32 %v4837_v31, %v1107_v59  ;;  %v640_v31 = vld [vmem:[%s4525_s3 + $0x670] sm:$0xff]  ;;  %v707_v59 = vld [vmem:[#allocation6 + $0x88] sm:$0xff] }
 0x1d1   : > { %v1547_v57 = vadd.f32 %v1546_v19, %v1434_v26  ;;  %1370 = vmatmul.f32.gmra.mxu3 %v605_v48  ;;  %1483 = vmatmul.f32.gmra.mxu0 %v606_v39  ;;  %v991_v19 = vadd.f32 %v4805_v54, %v4823_v12  ;;  %v711_v26 = vld [vmem:[#allocation6 + $0xa8] sm:$0xff] }
 0x1d2   : > { %1861 = vmatpush.msra.mxu0 %v711_v26 }
 0x1d3   : > { %v5094_v10 = vadd.f32 %v1659_v44, %v1547_v57  ;;  %1709 = vmatmul.f32.gmra.mxu2 %v608_v30  ;;  %v1549_v37 = vpop.f32.mrf.mxu1  ;;  %v621_v44 = vld [vmem:[%s4525_s3 + $0x5d8] sm:$0xff]  ;;  %v1104_v30 = vadd.f32 %v4812_v62, %v991_v19 }
 0x1d4   : > { %v1323_v20 = vpop.f32.mrf.mxu3 }
 0x1d5   : > { %v1324_v6 = vadd.f32 %v1323_v20, %v1211_v28  ;;  %v1217_v28 = vadd.f32 %v4821_v9, %v1104_v30 }
 0x1d6   : > { %v1439_v36 = vpop.f32.mrf.mxu0  ;;  %v1662_v4 = vpop.f32.mrf.mxu2  ;;  %1596 = vmatmul.f32.gmra.mxu1 %v607_v5  ;;  %v623_v5 = vld [vmem:[%s4525_s3 + $0x5e8] sm:$0xff] }
 0x1d7   : > { %v1437_v32 = vadd.f32 %v1436_v45, %v1324_v6 }
 0x1d9   : > { %v1550_v46 = vadd.f32 %v1549_v37, %v1437_v32  ;;  %1373 = vmatmul.f32.gmra.mxu3 %v613_v38  ;;  %1486 = vmatmul.f32.gmra.mxu0 %v614_v3  ;;  %v629_v38 = vld [vmem:[%s4525_s3 + $0x618] sm:$0xff]  ;;  %v630_v3 = vld [vmem:[%s4525_s3 + $0x620] sm:$0xff] }
 0x1db   : > { %v5104_v34 = vadd.f32 %v1662_v4, %v1550_v46  ;;  %1712 = vmatmul.f32.gmra.mxu2 %v616_v42  ;;  %v1552_v23 = vpop.f32.mrf.mxu1  ;;  %v916_v42 = vld [vmem:[#allocation6 + $0x710] sm:$0xff]  ;;  %v997_v46 = vadd.f32 %v4833_v24, %v4823_v12  ;;  %v785_v24 = vld [vmem:[#allocation6 + $0x2f8] sm:$0xff] }
 0x1dc   : > { %v1326_v45 = vpop.f32.mrf.mxu3  ;;  %1757 = vmatpush.msra.mxu3 %v916_v42  ;;  %2082 = vmatpush.msra.mxu2 %v785_v24  ;;  %v914_v42 = vld [vmem:[#allocation6 + $0x700] sm:$0xff]  ;;  %v653_v24 = vld [vmem:[%s4525_s3 + $0x6d8] sm:$0xff] }
 0x1dd   : > { %v1327_v48 = vadd.f32 %v1326_v45, %v1214_v18 }
 0x1de   : > { %v1442_v39 = vpop.f32.mrf.mxu0  ;;  %v1665_v55 = vpop.f32.mrf.mxu2  ;;  %1599 = vmatmul.f32.gmra.mxu1 %v615_v51  ;;  %1758 = vmatpush.msra.mxu3 %v914_v42 }
 0x1df   : > { %v1440_v54 = vadd.f32 %v1439_v36, %v1327_v48  ;;  %v637_v48 = vld [vmem:[%s4525_s3 + $0x658] sm:$0xff] }
 0x1e1   : > { %v1553_v57 = vadd.f32 %v1552_v23, %v1440_v54  ;;  %1376 = vmatmul.f32.gmra.mxu3 %v621_v44  ;;  %1489 = vmatmul.f32.gmra.mxu0 %v622_v21  ;;  %v709_v21 = vld [vmem:[#allocation6 + $0x98] sm:$0xff] }
 0x1e2   : > { %1862 = vmatpush.msra.mxu0 %v709_v21  ;;  %v741_v54 = vld [vmem:[#allocation6 + $0x198] sm:$0xff] }
 0x1e3   : > { %v5114_v37 = vadd.f32 %v1665_v55, %v1553_v57  ;;  %1715 = vmatmul.f32.gmra.mxu2 %v624_v58  ;;  %v1555_v62 = vpop.f32.mrf.mxu1  ;;  %v1110_v55 = vadd.f32 %v4842_v33, %v997_v46  ;;  %v783_v58 = vld [vmem:[#allocation6 + $0x2e8] sm:$0xff]  ;;  %1975 = vmatpush.msra.mxu1 %v741_v54  ;;  %v1000_v57 = vadd.f32 %v4847_v41, %v4823_v12  ;;  %v705_v46 = vld [vmem:[#allocation6 + $0x78] sm:$0xff] }
 0x1e4   : > { %v1329_v20 = vpop.f32.mrf.mxu3  ;;  %2083 = vmatpush.msra.mxu2 %v783_v58  ;;  %1863 = vmatpush.msra.mxu0 %v707_v59  ;;  %v701_v21 = vld [vmem:[#allocation6 + $0x58] sm:$0xff]  ;;  %v699_v54 = vld [vmem:[#allocation6 + $0x48] sm:$0xff] }
 0x1e5   : > { %v1330_v6 = vadd.f32 %v1329_v20, %v1217_v28  ;;  %v1223_v33 = vadd.f32 %v4851_v47, %v1110_v55  ;;  %v639_v28 = vld [vmem:[%s4525_s3 + $0x668] sm:$0xff]  ;;  %v1113_v41 = vadd.f32 %v4856_v52, %v1000_v57  ;;  %v769_v58 = vld [vmem:[#allocation6 + $0x278] sm:$0xff]  ;;  %v656_v57 = vld [vmem:[%s4525_s3 + $0x6f0] sm:$0xff] }
 0x1e6   : > { %v1445_v36 = vpop.f32.mrf.mxu0  ;;  %v1668_v4 = vpop.f32.mrf.mxu2  ;;  %1602 = vmatmul.f32.gmra.mxu1 %v623_v5  ;;  %1864 = vmatpush.msra.mxu0 %v705_v46  ;;  %v771_v55 = vld [vmem:[#allocation6 + $0x288] sm:$0xff] }
 0x1e7   : > { %v1443_v32 = vadd.f32 %v1442_v39, %v1330_v6  ;;  %v638_v39 = vld [vmem:[%s4525_s3 + $0x660] sm:$0xff]  ;;  %v779_v6 = vld [vmem:[#allocation6 + $0x2c8] sm:$0xff]  ;;  %v1226_v52 = vadd.f32 %v4865_v11, %v1113_v41  ;;  %v765_v41 = vld [vmem:[#allocation6 + $0x258] sm:$0xff] }
 0x1e8   : > { %v735_v59 = vld [vmem:[#allocation6 + $0x168] sm:$0xff] }
 0x1e9   : > { %v1556_v9 = vadd.f32 %v1555_v62, %v1443_v32  ;;  %1379 = vmatmul.f32.gmra.mxu3 %v629_v38  ;;  %1492 = vmatmul.f32.gmra.mxu0 %v630_v3  ;;  %v781_v62 = vld [vmem:[#allocation6 + $0x2d8] sm:$0xff]  ;;  %v646_v3 = vld [vmem:[%s4525_s3 + $0x6a0] sm:$0xff] }
 0x1ea   : > { %2084 = vmatpush.msra.mxu2 %v781_v62  ;;  %v645_v38 = vld [vmem:[%s4525_s3 + $0x698] sm:$0xff]  ;;  %v767_v62 = vld [vmem:[#allocation6 + $0x268] sm:$0xff] }
 0x1eb   : > { %v5124_v19 = vadd.f32 %v1668_v4, %v1556_v9  ;;  %1718 = vmatmul.f32.gmra.mxu2 %v632_v7  ;;  %v1558_v18 = vpop.f32.mrf.mxu1  ;;  %v777_v32 = vld [vmem:[#allocation6 + $0x2b8] sm:$0xff]  ;;  %v648_v7 = vld [vmem:[%s4525_s3 + $0x6b0] sm:$0xff] }
 0x1ec   : > { %v1332_v23 = vpop.f32.mrf.mxu3  ;;  %2085 = vmatpush.msra.mxu2 %v779_v6 }
 0x1ed   : > { %v1333_v51 = vadd.f32 %v1332_v23, %v1220_v17  ;;  %v775_v17 = vld [vmem:[#allocation6 + $0x2a8] sm:$0xff] }
 0x1ee   : > { %v1448_v45 = vpop.f32.mrf.mxu0  ;;  %v1671_v44 = vpop.f32.mrf.mxu2  ;;  %1605 = vmatmul.f32.gmra.mxu1 %v631_v16  ;;  %2086 = vmatpush.msra.mxu2 %v777_v32  ;;  %v661_v32 = vld [vmem:[%s4525_s3 + $0x718] sm:$0xff] }
 0x1ef   : > { %v1446_v26 = vadd.f32 %v1445_v36, %v1333_v51  ;;  %v647_v51 = vld [vmem:[%s4525_s3 + $0x6a8] sm:$0xff] }
 0x1f0   : > { %2087 = vmatpush.msra.mxu2 %v775_v17  ;;  %v763_v17 = vld [vmem:[#allocation6 + $0x248] sm:$0xff] }
 0x1f1   : > { %v1559_v30 = vadd.f32 %v1558_v18, %v1446_v26  ;;  %1382 = vmatmul.f32.gmra.mxu3 %v637_v48  ;;  %1495 = vmatmul.f32.gmra.mxu0 %v638_v39  ;;  %v1003_v18 = vadd.f32 %v4861_v63, %v4823_v12  ;;  %v773_v48 = vld [vmem:[#allocation6 + $0x298] sm:$0xff]  ;;  %v654_v63 = vld [vmem:[%s4525_s3 + $0x6e0] sm:$0xff] }
 0x1f2   : > { %2088 = vmatpush.msra.mxu2 %v773_v48  ;;  %v817_v48 = vld [vmem:[#allocation6 + $0x3f8] sm:$0xff] }
 0x1f3   : > { %v5134_v56 = vadd.f32 %v1671_v44, %v1559_v30  ;;  %1721 = vmatmul.f32.gmra.mxu2 %v640_v31  ;;  %v1561_v25 = vpop.f32.mrf.mxu1  ;;  %v1116_v11 = vadd.f32 %v4870_v14, %v1003_v18  ;;  %v691_v18 = vld [vmem:[#allocation6 + $0x8] sm:$0xff]  ;;  %2195 = vmatpush.msrb.mxu3 %v817_v48 }
 0x1f4   : > { %v1335_v5 = vpop.f32.mrf.mxu3  ;;  %2089 = vmatpush.msra.mxu2 %v771_v55  ;;  %v679_v48 = vld [vmem:[%s4525_s3 + $0x7a8] sm:$0xff] }
 0x1f5   : > { %v1336_v20 = vadd.f32 %v1335_v5, %v1223_v33  ;;  %v1006_v5 = vadd.f32 %v4875_v27, %v4823_v12  ;;  %v1229_v14 = vadd.f32 %v4879_v8, %v1116_v11  ;;  %v693_v27 = vld [vmem:[#allocation6 + $0x18] sm:$0xff] }
 0x1f6   : > { %v1451_v36 = vpop.f32.mrf.mxu0  ;;  %v1674_v4 = vpop.f32.mrf.mxu2  ;;  %1608 = vmatmul.f32.gmra.mxu1 %v639_v28  ;;  %v697_v28 = vld [vmem:[#allocation6 + $0x38] sm:$0xff]  ;;  %2090 = vmatpush.msra.mxu2 %v769_v58  ;;  %v670_v58 = vld [vmem:[%s4525_s3 + $0x760] sm:$0xff] }
 0x1f7   : > { %v1449_v47 = vadd.f32 %v1448_v45, %v1336_v20  ;;  %v703_v45 = vld [vmem:[#allocation6 + $0x68] sm:$0xff]  ;;  %v1119_v42 = vadd.f32 %v4884_v43, %v1006_v5  ;;  %v1009_v43 = vadd.f32 %v4889_v50, %v4823_v12 }
 0x1f8   : > { %1865 = vmatpush.msra.mxu0 %v703_v45  ;;  %2091 = vmatpush.msra.mxu2 %v767_v62  ;;  %v761_v45 = vld [vmem:[#allocation6 + $0x238] sm:$0xff]  ;;  %v672_v62 = vld [vmem:[%s4525_s3 + $0x770] sm:$0xff] }
 0x1f9   : > { %v1562_v9 = vadd.f32 %v1561_v25, %v1449_v47  ;;  %1385 = vmatmul.f32.gmra.mxu3 %v645_v38  ;;  %1498 = vmatmul.f32.gmra.mxu0 %v646_v3  ;;  %v739_v25 = vld [vmem:[#allocation6 + $0x188] sm:$0xff]  ;;  %v737_v3 = vld [vmem:[#allocation6 + $0x178] sm:$0xff] }
 0x1fa   : > { %1866 = vmatpush.msra.mxu0 %v701_v21  ;;  %1976 = vmatpush.msra.mxu1 %v739_v25  ;;  %v695_v38 = vld [vmem:[#allocation6 + $0x28] sm:$0xff] }
 0x1fb   : > { %v5144_v16 = vadd.f32 %v1674_v4, %v1562_v9  ;;  %1724 = vmatmul.f32.gmra.mxu2 %v648_v7  ;;  %v1564_v23 = vpop.f32.mrf.mxu1  ;;  %v662_v7 = vld [vmem:[%s4525_s3 + $0x720] sm:$0xff]  ;;  %v727_v25 = vld [vmem:[#allocation6 + $0x128] sm:$0xff] }
 0x1fc   : > { %v1338_v39 = vpop.f32.mrf.mxu3  ;;  %1867 = vmatpush.msra.mxu0 %v699_v54  ;;  %1977 = vmatpush.msra.mxu1 %v737_v3  ;;  %v669_v54 = vld [vmem:[%s4525_s3 + $0x758] sm:$0xff]  ;;  %v671_v3 = vld [vmem:[%s4525_s3 + $0x768] sm:$0xff] }
 0x1fd   : > { %v1339_v44 = vadd.f32 %v1338_v39, %v1226_v52  ;;  %2092 = vmatpush.msra.mxu2 %v765_v41  ;;  %v664_v52 = vld [vmem:[%s4525_s3 + $0x730] sm:$0xff]  ;;  %v731_v39 = vld [vmem:[#allocation6 + $0x148] sm:$0xff] }
 0x1fe   : > { %v1454_v26 = vpop.f32.mrf.mxu0  ;;  %v1677_v31 = vpop.f32.mrf.mxu2  ;;  %1611 = vmatmul.f32.gmra.mxu1 %v647_v51  ;;  %1868 = vmatpush.msra.mxu0 %v697_v28  ;;  %v755_v28 = vld [vmem:[#allocation6 + $0x208] sm:$0xff] }
 0x1ff   : > { %v1452_v30 = vadd.f32 %v1451_v36, %v1339_v44  ;;  %v655_v36 = vld [vmem:[%s4525_s3 + $0x6e8] sm:$0xff]  ;;  %1978 = vmatpush.msra.mxu1 %v735_v59  ;;  %2093 = vmatpush.msra.mxu2 %v763_v17  ;;  %v1232_v44 = vadd.f32 %v4893_v0, %v1119_v42  ;;  %v677_v59 = vld [vmem:[%s4525_s3 + $0x798] sm:$0xff] }
 0x200   : > { %1869 = vmatpush.msra.mxu0 %v695_v38  ;;  %v723_v41 = vld [vmem:[#allocation6 + $0x108] sm:$0xff]  ;;  %v6473_v17 = vld [vmem:[#allocation21_spill] sm:$0xff] }
 0x201   : > { %v1565_v33 = vadd.f32 %v1564_v23, %v1452_v30  ;;  %1388 = vmatmul.f32.gmra.mxu3 %v653_v24  ;;  %1501 = vmatmul.f32.gmra.mxu0 %v654_v63  ;;  %v733_v23 = vld [vmem:[#allocation6 + $0x158] sm:$0xff]  ;;  %v759_v24 = vld [vmem:[#allocation6 + $0x228] sm:$0xff] }
 0x202   : > { %1870 = vmatpush.msra.mxu0 %v693_v27  ;;  %1979 = vmatpush.msra.mxu1 %v733_v23  ;;  %v757_v30 = vld [vmem:[#allocation6 + $0x218] sm:$0xff] }
 0x203   : > { %v5154_v20 = vadd.f32 %v1677_v31, %v1565_v33  ;;  %1727 = vmatmul.f32.gmra.mxu2 %v656_v57  ;;  %v1567_v6 = vpop.f32.mrf.mxu1  ;;  %v729_v31 = vld [vmem:[#allocation6 + $0x138] sm:$0xff]  ;;  %v1122_v57 = vadd.f32 %v4898_v13, %v1009_v43 }
 0x204   : > { %v1341_v4 = vpop.f32.mrf.mxu3  ;;  %1871 = vmatpush.msra.mxu0 %v691_v18  ;;  %2094 = vmatpush.msra.mxu2 %v761_v45  ;;  %v1015_v18 = vadd.f32 %v6473_v17, %v4823_v12 }
 0x205   : > { %v1342_v47 = vadd.f32 %v1341_v4, %v1229_v14  ;;  %1980 = vmatpush.msra.mxu1 %v731_v39  ;;  %v725_v14 = vld [vmem:[#allocation6 + $0x118] sm:$0xff]  ;;  %v1235_v13 = vadd.f32 %v4907_v61, %v1122_v57  ;;  %v680_v61 = vld [vmem:[%s4525_s3 + $0x7b0] sm:$0xff] }
 0x206   : > { %v1457_v8 = vpop.f32.mrf.mxu0  ;;  %v1680_v9 = vpop.f32.mrf.mxu2  ;;  %1614 = vmatmul.f32.gmra.mxu1 %v655_v36  ;;  %2095 = vmatpush.msra.mxu2 %v759_v24 }
 0x207   : > { %v1455_v46 = vadd.f32 %v1454_v26, %v1342_v47  ;;  %v663_v26 = vld [vmem:[%s4525_s3 + $0x728] sm:$0xff]  ;;  %1981 = vmatpush.msra.mxu1 %v729_v31 }
 0x208   : > { %2096 = vmatpush.msra.mxu2 %v757_v30 }
 0x209   : > { %v1568_v51 = vadd.f32 %v1567_v6, %v1455_v46  ;;  %1391 = vmatmul.f32.gmra.mxu3 %v661_v32  ;;  %1504 = vmatmul.f32.gmra.mxu0 %v662_v7  ;;  %v1012_v6 = vadd.f32 %v4903_v29, %v4823_v12  ;;  %v6472_v7 = vld [vmem:[#allocation20_spill] sm:$0xff] }
 0x20a   : > { %1982 = vmatpush.msra.mxu1 %v727_v25  ;;  %2097 = vmatpush.msra.mxu2 %v755_v28  ;;  %v815_v46 = vld [vmem:[#allocation6 + $0x3e8] sm:$0xff] }
 0x20b   : > { %v5164_v21 = vadd.f32 %v1680_v9, %v1568_v51  ;;  %1730 = vmatmul.f32.gmra.mxu2 %v664_v52  ;;  %v1570_v55 = vpop.f32.mrf.mxu1  ;;  %v1125_v29 = vadd.f32 %v6472_v7, %v1012_v6  ;;  %2196 = vmatpush.msrb.mxu3 %v815_v46  ;;  %v6474_v52 = vld [vmem:[#allocation22_spill] sm:$0xff]  ;;  %v687_v25 = vld [vmem:[%s4525_s3 + $0x7e8] sm:$0xff]  ;;  %v6477_v6 = vld [vmem:[#allocation25_spill] sm:$0xff] }
 0x20c   : > { %v1344_v63 = vpop.f32.mrf.mxu3  ;;  %1983 = vmatpush.msra.mxu1 %v725_v14  ;;  %v3817_v7 = vld [vmem:[%s4525_s3 + $0x10] sm:$0xff]  ;;  %v449_v46 = vld [vmem:[%s4525_s3 + $0x78] sm:$0xff] }
 0x20d   : > { %v1345_v11 = vadd.f32 %v1344_v63, %v1232_v44  ;;  %v1238_v23 = vadd.f32 %v6474_v52, %v1125_v29  ;;  %v1128_v63 = vadd.f32 %v4926_v35, %v1015_v18  ;;  %v3818_v18 = vld [vmem:[%s4525_s3 + $0x8] sm:$0xff] }
 0x20e   : > { %v1460_v50 = vpop.f32.mrf.mxu0  ;;  %v1683_v0 = vpop.f32.mrf.mxu2  ;;  %1617 = vmatmul.f32.gmra.mxu1 %v663_v26  ;;  %v686_v26 = vld [vmem:[%s4525_s3 + $0x7e0] sm:$0xff] }
 0x20f   : > { %v1458_v33 = vadd.f32 %v1457_v8, %v1345_v11  ;;  %v678_v8 = vld [vmem:[%s4525_s3 + $0x7a0] sm:$0xff]  ;;  %1984 = vmatpush.msra.mxu1 %v723_v41  ;;  %v688_v11 = vld [vmem:[%s4525_s3 + $0x7f0] sm:$0xff]  ;;  %v813_v41 = vld [vmem:[#allocation6 + $0x3d8] sm:$0xff] }
 0x210   : > { %2197 = vmatpush.msrb.mxu3 %v813_v41  ;;  %v465_v41 = vld [vmem:[%s4525_s3 + $0xf8] sm:$0xff] }
 0x211   : > { %v1571_v5 = vadd.f32 %v1570_v55, %v1458_v33  ;;  %1394 = vmatmul.f32.gmra.mxu3 %v669_v54  ;;  %1507 = vmatmul.f32.gmra.mxu0 %v670_v58  ;;  %v685_v55 = vld [vmem:[%s4525_s3 + $0x7d8] sm:$0xff]  ;;  %v6476_v58 = vld [vmem:[#allocation24_spill] sm:$0xff] }
 0x213   : > { %v5174_v36 = vadd.f32 %v1683_v0, %v1571_v5  ;;  %1733 = vmatmul.f32.gmra.mxu2 %v672_v62  ;;  %v1573_v38 = vpop.f32.mrf.mxu1  ;;  %v1241_v0 = vadd.f32 %v6476_v58, %v1128_v63  ;;  %v441_v5 = vld [vmem:[%s4525_s3 + $0x38] sm:$0xff] }
 0x214   : > { %v1347_v4 = vpop.f32.mrf.mxu3 }
 0x215   : > { %v1348_v47 = vadd.f32 %v1347_v4, %v1235_v13  ;;  %v3816_v4 = vld [vmem:[%s4525_s3] sm:$0xff] }
 0x216   : > { %v1463_v27 = vpop.f32.mrf.mxu0  ;;  %v1686_v32 = vpop.f32.mrf.mxu2  ;;  %1620 = vmatmul.f32.gmra.mxu1 %v671_v3 }
 0x217   : > { %v1461_v9 = vadd.f32 %v1460_v50, %v1348_v47  ;;  %v6475_v50 = vld [vmem:[#allocation23_spill] sm:$0xff] }
 0x218   : > { %v1018_v54 = vadd.f32 %v6475_v50, %v4823_v12  ;;  %v6478_v47 = vld [vmem:[#allocation27_spill] sm:$0xff] }
 0x219   : > { %v1574_v42 = vadd.f32 %v1573_v38, %v1461_v9  ;;  %1397 = vmatmul.f32.gmra.mxu3 %v677_v59  ;;  %1510 = vmatmul.f32.gmra.mxu0 %v678_v8  ;;  %v6479_v59 = vld [vmem:[#allocation28_spill] sm:$0xff] }
 0x21a   : > { %v1131_v13 = vadd.f32 %v6477_v6, %v1018_v54  ;;  %v3821_v50 = vld [vmem:[%s4525_s3 + $0x48] sm:$0xff]  ;;  %v3823_v6 = vld [vmem:[%s4525_s3 + $0x90] sm:$0xff] }
 0x21b   : > { %v5184_v51 = vadd.f32 %v1686_v32, %v1574_v42  ;;  %1736 = vmatmul.f32.gmra.mxu2 %v680_v61  ;;  %v1576_v45 = vpop.f32.mrf.mxu1  ;;  %v6481_v54 = vld [vmem:[#allocation31_spill] sm:$0xff] }
 0x21c   : > { %v1350_v39 = vpop.f32.mrf.mxu3  ;;  %v1244_v8 = vadd.f32 %v6479_v59, %v1131_v13 }
 0x21d   : > { %v1351_v43 = vadd.f32 %v1350_v39, %v1238_v23  ;;  %v1024_v39 = vadd.f32 %v4957_v53, %v4823_v12 }
 0x21e   : > { %v1466_v44 = vpop.f32.mrf.mxu0  ;;  %v1689_v24 = vpop.f32.mrf.mxu2  ;;  %1623 = vmatmul.f32.gmra.mxu1 %v679_v48  ;;  %v3819_v48 = vld [vmem:[%s4525_s3 + $0x40] sm:$0xff] }
 0x21f   : > { %v1464_v31 = vadd.f32 %v1463_v27, %v1351_v43  ;;  %v1021_v27 = vadd.f32 %v6478_v47, %v4823_v12  ;;  %v6480_v43 = vld [vmem:[#allocation30_spill] sm:$0xff]  ;;  %v1137_v58 = vadd.f32 %v6481_v54, %v1024_v39 }
 0x221   : > { %v1577_v30 = vadd.f32 %v1576_v45, %v1464_v31  ;;  %1400 = vmatmul.f32.gmra.mxu3 %v685_v55  ;;  %1513 = vmatmul.f32.gmra.mxu0 %v686_v26  ;;  %v1134_v52 = vadd.f32 %v4951_v40, %v1021_v27  ;;  %v3820_v26 = vld [vmem:[%s4525_s3 + $0x50] sm:$0xff]  ;;  %v3824_v27 = vld [vmem:[%s4525_s3 + $0x88] sm:$0xff] }
 0x223   : > { %v5194_v57 = vadd.f32 %v1689_v24, %v1577_v30  ;;  %1739 = vmatmul.f32.gmra.mxu2 %v688_v11  ;;  %v1579_v33 = vpop.f32.mrf.mxu1  ;;  %v457_v11 = vld [vmem:[%s4525_s3 + $0xb8] sm:$0xff] }
 0x224   : > { %v1353_v28 = vpop.f32.mrf.mxu3 }
 0x225   : > { %v1354_v62 = vadd.f32 %v1353_v28, %v1241_v0  ;;  %v6482_v28 = vld [vmem:[#allocation33_spill] sm:$0xff] }
 0x226   : > { %v1469_v35 = vpop.f32.mrf.mxu0  ;;  %v1692_v14 = vpop.f32.mrf.mxu2  ;;  %1626 = vmatmul.f32.gmra.mxu1 %v687_v25  ;;  %v811_v25 = vld [vmem:[#allocation6 + $0x3c8] sm:$0xff] }
 0x227   : > { %v1467_v38 = vadd.f32 %v1466_v44, %v1354_v62  ;;  %v1247_v44 = vadd.f32 %v6480_v43, %v1134_v52  ;;  %2198 = vmatpush.msrb.mxu3 %v811_v25  ;;  %v1027_v62 = vadd.f32 %v6482_v28, %v4823_v12  ;;  %v3827_v43 = vld [vmem:[%s4525_s3 + $0xc8] sm:$0xff]  ;;  %v481_v25 = vld [vmem:[%s4525_s3 + $0x178] sm:$0xff] }
 0x229   : > { %v1580_v3 = vadd.f32 %v1579_v33, %v1467_v38  ;;  %1759 = vmatmul.f32.vlgmr.msra.gmra.mxu3 %v441_v5  ;;  %1872 = vmatmul.f32.vlgmr.msra.gmra.mxu0 %v3816_v4  ;;  %v3822_v33 = vld [vmem:[%s4525_s3 + $0x80] sm:$0xff]  ;;  %v1140_v59 = vadd.f32 %v4977_v49, %v1027_v62  ;;  %v3830_v62 = vld [vmem:[%s4525_s3 + $0x108] sm:$0xff] }
 0x22b   : > { %v5203_v32 = vadd.f32 %v1692_v14, %v1580_v3  ;;  %2098 = vmatmul.f32.vlgmr.msra.gmra.mxu2 %v3817_v7  ;;  %v1582_v29 = vpop.f32.mrf.mxu1 }
 0x22c   : > { %v1356_v9 = vpop.f32.mrf.mxu3 }
 0x22d   : > { %v1357_v61 = vadd.f32 %v1356_v9, %v1244_v8  ;;  %v6484_v9 = vld [vmem:[#allocation36_spill] sm:$0xff] }
 0x22e   : > { %v1472_v42 = vpop.f32.mrf.mxu0  ;;  %v1695_v17 = vpop.f32.mrf.mxu2  ;;  %1985 = vmatmul.f32.vlgmr.msra.gmra.mxu1 %v3818_v18  ;;  %v3826_v18 = vld [vmem:[%s4525_s3 + $0xd0] sm:$0xff] }
 0x22f   : > { %v1470_v23 = vadd.f32 %v1469_v35, %v1357_v61  ;;  %v6483_v35 = vld [vmem:[#allocation34_spill] sm:$0xff]  ;;  %v1030_v61 = vadd.f32 %v6484_v9, %v4823_v12 }
 0x230   : > { %v1250_v5 = vadd.f32 %v6483_v35, %v1137_v58  ;;  %v3829_v58 = vld [vmem:[%s4525_s3 + $0x110] sm:$0xff] }
 0x231   : > { %v1583_v45 = vadd.f32 %v1582_v29, %v1470_v23  ;;  %1762 = vmatmul.f32.gmra.mxu3 %v449_v46  ;;  %1875 = vmatmul.f32.gmra.mxu0 %v3819_v48  ;;  %v3825_v29 = vld [vmem:[%s4525_s3 + $0xc0] sm:$0xff]  ;;  %v473_v48 = vld [vmem:[%s4525_s3 + $0x138] sm:$0xff] }
 0x232   : > { %v6488_v35 = vld [vmem:[#allocation41_spill] sm:$0xff] }
 0x233   : > { %v5213_v55 = vadd.f32 %v1695_v17, %v1583_v45  ;;  %2101 = vmatmul.f32.gmra.mxu2 %v3820_v26  ;;  %v1585_v24 = vpop.f32.mrf.mxu1 }
 0x234   : > { %v1359_v63 = vpop.f32.mrf.mxu3 }
 0x235   : > { %v1360_v31 = vadd.f32 %v1359_v63, %v1247_v44  ;;  %v1143_v44 = vadd.f32 %v4990_v1, %v1030_v61  ;;  %v3828_v63 = vld [vmem:[%s4525_s3 + $0x100] sm:$0xff]  ;;  %v489_v61 = vld [vmem:[%s4525_s3 + $0x1b8] sm:$0xff] }
 0x236   : > { %v1475_v40 = vpop.f32.mrf.mxu0  ;;  %v1698_v30 = vpop.f32.mrf.mxu2  ;;  %1988 = vmatmul.f32.gmra.mxu1 %v3821_v50 }
 0x237   : > { %v1473_v0 = vadd.f32 %v1472_v42, %v1360_v31  ;;  %v6485_v42 = vld [vmem:[#allocation37_spill] sm:$0xff] }
 0x238   : > { %v1253_v46 = vadd.f32 %v6485_v42, %v1140_v59  ;;  %v809_v31 = vld [vmem:[#allocation6 + $0x3b8] sm:$0xff]  ;;  %v3832_v59 = vld [vmem:[%s4525_s3 + $0x150] sm:$0xff] }
 0x239   : > { %v1586_v53 = vadd.f32 %v1585_v24, %v1473_v0  ;;  %1765 = vmatmul.f32.gmra.mxu3 %v457_v11  ;;  %1878 = vmatmul.f32.gmra.mxu0 %v3822_v33 }
 0x23a   : > { %2199 = vmatpush.msrb.mxu3 %v809_v31 }
 0x23b   : > { %v5223_v14 = vadd.f32 %v1698_v30, %v1586_v53  ;;  %2104 = vmatmul.f32.gmra.mxu2 %v3823_v6  ;;  %v1588_v13 = vpop.f32.mrf.mxu1  ;;  %v6487_v30 = vld [vmem:[#allocation40_spill] sm:$0xff] }
 0x23c   : > { %v1362_v38 = vpop.f32.mrf.mxu3  ;;  %v1256_v50 = vadd.f32 %v6487_v30, %v1143_v44  ;;  %v6493_v44 = vld [vmem:[#allocation48_spill] sm:$0xff] }
 0x23d   : > { %v1363_v3 = vadd.f32 %v1362_v38, %v1250_v5  ;;  %v3831_v38 = vld [vmem:[%s4525_s3 + $0x140] sm:$0xff] }
 0x23e   : > { %v1478_v4 = vpop.f32.mrf.mxu0  ;;  %v1701_v47 = vpop.f32.mrf.mxu2  ;;  %1991 = vmatmul.f32.gmra.mxu1 %v3824_v27 }
 0x23f   : > { %v1476_v8 = vadd.f32 %v1475_v40, %v1363_v3  ;;  %v6486_v40 = vld [vmem:[#allocation39_spill] sm:$0xff] }
 0x240   : > { %v1033_v11 = vadd.f32 %v6486_v40, %v4823_v12  ;;  %v6489_v3 = vld [vmem:[#allocation43_spill] sm:$0xff] }
 0x241   : > { %v1589_v7 = vadd.f32 %v1588_v13, %v1476_v8  ;;  %1768 = vmatmul.f32.gmra.mxu3 %v465_v41  ;;  %1881 = vmatmul.f32.gmra.mxu0 %v3825_v29  ;;  %v6490_v41 = vld [vmem:[#allocation44_spill] sm:$0xff] }
 0x242   : > { %v1146_v5 = vadd.f32 %v6488_v35, %v1033_v11 }
 0x243   : > { %v5233_v17 = vadd.f32 %v1701_v47, %v1589_v7  ;;  %2107 = vmatmul.f32.gmra.mxu2 %v3826_v18  ;;  %v1591_v52 = vpop.f32.mrf.mxu1  ;;  %v6491_v18 = vld [vmem:[#allocation45_spill] sm:$0xff] }
 0x244   : > { %v1365_v23 = vpop.f32.mrf.mxu3  ;;  %v1259_v47 = vadd.f32 %v6490_v41, %v1146_v5  ;;  %v3838_v5 = vld [vmem:[%s4525_s3 + $0x1d0] sm:$0xff] }
 0x245   : > { %v1366_v45 = vadd.f32 %v1365_v23, %v1253_v46  ;;  %v3833_v46 = vld [vmem:[%s4525_s3 + $0x148] sm:$0xff] }
 0x246   : > { %v1481_v49 = vpop.f32.mrf.mxu0  ;;  %v1704_v39 = vpop.f32.mrf.mxu2  ;;  %1994 = vmatmul.f32.gmra.mxu1 %v3827_v43 }
 0x247   : > { %v1479_v26 = vadd.f32 %v1478_v4, %v1366_v45  ;;  %v1036_v4 = vadd.f32 %v6489_v3, %v4823_v12 }
 0x249   : > { %v1592_v24 = vadd.f32 %v1591_v52, %v1479_v26  ;;  %1771 = vmatmul.f32.gmra.mxu3 %v473_v48  ;;  %1884 = vmatmul.f32.gmra.mxu0 %v3828_v63  ;;  %v1149_v52 = vadd.f32 %v6491_v18, %v1036_v4  ;;  %v807_v48 = vld [vmem:[#allocation6 + $0x3a8] sm:$0xff]  ;;  %v3835_v63 = vld [vmem:[%s4525_s3 + $0x190] sm:$0xff]  ;;  %v505_v4 = vld [vmem:[%s4525_s3 + $0x238] sm:$0xff] }
 0x24a   : > { %2200 = vmatpush.msrb.mxu3 %v807_v48  ;;  %v6496_v18 = vld [vmem:[#allocation26_spill] sm:$0xff]  ;;  %v3842_v48 = vld [vmem:[%s4525_s3 + $0x208] sm:$0xff] }
 0x24b   : > { %v5243_v54 = vadd.f32 %v1704_v39, %v1592_v24  ;;  %2110 = vmatmul.f32.gmra.mxu2 %v3829_v58  ;;  %v1594_v1 = vpop.f32.mrf.mxu1  ;;  %v6492_v39 = vld [vmem:[#allocation47_spill] sm:$0xff]  ;;  %v1262_v26 = vadd.f32 %v6493_v44, %v1149_v52 }
 0x24c   : > { %v1368_v0 = vpop.f32.mrf.mxu3  ;;  %v1039_v43 = vadd.f32 %v6492_v39, %v4823_v12  ;;  %v3843_v44 = vld [vmem:[%s4525_s3 + $0x240] sm:$0xff] }
 0x24d   : > { %v1369_v53 = vadd.f32 %v1368_v0, %v1256_v50  ;;  %v497_v50 = vld [vmem:[%s4525_s3 + $0x1f8] sm:$0xff] }
 0x24e   : > { %v1484_v33 = vpop.f32.mrf.mxu0  ;;  %v1707_v28 = vpop.f32.mrf.mxu2  ;;  %1997 = vmatmul.f32.gmra.mxu1 %v3830_v62  ;;  %v6494_v0 = vld [vmem:[#allocation49_spill] sm:$0xff] }
 0x24f   : > { %v1482_v6 = vadd.f32 %v1481_v49, %v1369_v53  ;;  %v3834_v49 = vld [vmem:[%s4525_s3 + $0x180] sm:$0xff]  ;;  %v1152_v53 = vadd.f32 %v6494_v0, %v1039_v43  ;;  %v3845_v0 = vld [vmem:[%s4525_s3 + $0x248] sm:$0xff] }
 0x251   : > { %v1595_v13 = vadd.f32 %v1594_v1, %v1482_v6  ;;  %1774 = vmatmul.f32.gmra.mxu3 %v481_v25  ;;  %1887 = vmatmul.f32.gmra.mxu0 %v3831_v38  ;;  %v3836_v1 = vld [vmem:[%s4525_s3 + $0x188] sm:$0xff]  ;;  %v3837_v25 = vld [vmem:[%s4525_s3 + $0x1c0] sm:$0xff] }
 0x253   : > { %v5253_v27 = vadd.f32 %v1707_v28, %v1595_v13  ;;  %2113 = vmatmul.f32.gmra.mxu2 %v3832_v59  ;;  %v1597_v8 = vpop.f32.mrf.mxu1  ;;  %v6495_v28 = vld [vmem:[#allocation51_spill] sm:$0xff] }
 0x254   : > { %v1371_v7 = vpop.f32.mrf.mxu3  ;;  %v1265_v62 = vadd.f32 %v6495_v28, %v1152_v53 }
 0x255   : > { %v1372_v29 = vadd.f32 %v1371_v7, %v1259_v47  ;;  %v3839_v47 = vld [vmem:[%s4525_s3 + $0x1c8] sm:$0xff]  ;;  %v3840_v7 = vld [vmem:[%s4525_s3 + $0x200] sm:$0xff] }
 0x256   : > { %v1487_v9 = vpop.f32.mrf.mxu0  ;;  %v1710_v42 = vpop.f32.mrf.mxu2  ;;  %2000 = vmatmul.f32.gmra.mxu1 %v3833_v46 }
 0x257   : > { %v1485_v23 = vadd.f32 %v1484_v33, %v1372_v29  ;;  %v805_v29 = vld [vmem:[#allocation6 + $0x398] sm:$0xff] }
 0x258   : > { %2201 = vmatpush.msrb.mxu3 %v805_v29 }
 0x259   : > { %v1598_v45 = vadd.f32 %v1597_v8, %v1485_v23  ;;  %1777 = vmatmul.f32.gmra.mxu3 %v489_v61  ;;  %1890 = vmatmul.f32.gmra.mxu0 %v3834_v49  ;;  %v3841_v61 = vld [vmem:[%s4525_s3 + $0x210] sm:$0xff] }
 0x25b   : > { %v5263_v24 = vadd.f32 %v1710_v42, %v1598_v45  ;;  %2116 = vmatmul.f32.gmra.mxu2 %v3835_v63  ;;  %v1600_v31 = vpop.f32.mrf.mxu1  ;;  %v513_v45 = vld [vmem:[%s4525_s3 + $0x278] sm:$0xff]  ;;  %v3844_v63 = vld [vmem:[%s4525_s3 + $0x250] sm:$0xff] }
 0x25c   : > { %v1374_v40 = vpop.f32.mrf.mxu3 }
 0x25d   : > { %v1375_v11 = vadd.f32 %v1374_v40, %v1262_v26 }
 0x25e   : > { %v1490_v30 = vpop.f32.mrf.mxu0  ;;  %v1713_v58 = vpop.f32.mrf.mxu2  ;;  %2003 = vmatmul.f32.gmra.mxu1 %v3836_v1 }
 0x25f   : > { %v1488_v12 = vadd.f32 %v1487_v9, %v1375_v11  ;;  %v6497_v11 = vld [vmem:[#allocation29_spill] sm:$0xff] }
 0x261   : > { %v1601_v33 = vadd.f32 %v1600_v31, %v1488_v12  ;;  %1780 = vmatmul.f32.gmra.mxu3 %v497_v50  ;;  %1893 = vmatmul.f32.gmra.mxu0 %v3837_v25  ;;  %v803_v25 = vld [vmem:[#allocation6 + $0x388] sm:$0xff] }
 0x262   : > { %2202 = vmatpush.msrb.mxu3 %v803_v25  ;;  %v849_v25 = vld [vmem:[#allocation6 + $0x4f8] sm:$0xff] }
 0x263   : > { %v5271_v35 = vadd.f32 %v1713_v58, %v1601_v33  ;;  %2119 = vmatmul.f32.gmra.mxu2 %v3838_v5  ;;  %v1603_v6 = vpop.f32.mrf.mxu1  ;;  %v521_v58 = vld [vmem:[%s4525_s3 + $0x2b8] sm:$0xff]  ;;  %v3846_v33 = vld [vmem:[%s4525_s3 + $0x280] sm:$0xff]  ;;  %2308 = vmatpush.msrb.mxu0 %v849_v25 }
 0x264   : > { %v1377_v13 = vpop.f32.mrf.mxu3 }
 0x265   : > { %v1378_v38 = vadd.f32 %v1377_v13, %v1265_v62  ;;  %v3847_v62 = vld [vmem:[%s4525_s3 + $0x290] sm:$0xff] }
 0x266   : > { %v1493_v3 = vpop.f32.mrf.mxu0  ;;  %v1716_v41 = vpop.f32.mrf.mxu2  ;;  %2006 = vmatmul.f32.gmra.mxu1 %v3839_v47  ;;  %v6498_v13 = vld [vmem:[#allocation32_spill] sm:$0xff] }
 0x267   : > { %v1491_v59 = vadd.f32 %v1490_v30, %v1378_v38  ;;  %v3848_v47 = vld [vmem:[%s4525_s3 + $0x288] sm:$0xff] }
 0x269   : > { %v1604_v8 = vadd.f32 %v1603_v6, %v1491_v59  ;;  %1783 = vmatmul.f32.gmra.mxu3 %v505_v4  ;;  %1896 = vmatmul.f32.gmra.mxu0 %v3840_v7  ;;  %v529_v4 = vld [vmem:[%s4525_s3 + $0x2f8] sm:$0xff]  ;;  %v3849_v7 = vld [vmem:[%s4525_s3 + $0x2c0] sm:$0xff] }
 0x26b   : > { %v5277_v9 = vadd.f32 %v1716_v41, %v1604_v8  ;;  %2122 = vmatmul.f32.gmra.mxu2 %v3841_v61  ;;  %v1606_v42 = vpop.f32.mrf.mxu1  ;;  %v3850_v61 = vld [vmem:[%s4525_s3 + $0x2d0] sm:$0xff] }
 0x26c   : > { %v1380_v46 = vpop.f32.mrf.mxu3 }
 0x26d   : > { %v1381_v52 = vadd.f32 %v1380_v46, %v6496_v18  ;;  %v6499_v18 = vld [vmem:[#allocation35_spill] sm:$0xff] }
 0x26e   : > { %v1496_v23 = vpop.f32.mrf.mxu0  ;;  %v1719_v49 = vpop.f32.mrf.mxu2  ;;  %2009 = vmatmul.f32.gmra.mxu1 %v3842_v48  ;;  %v3851_v48 = vld [vmem:[%s4525_s3 + $0x2c8] sm:$0xff] }
 0x26f   : > { %v1494_v39 = vadd.f32 %v1493_v3, %v1381_v52 }
 0x271   : > { %v1607_v43 = vadd.f32 %v1606_v42, %v1494_v39  ;;  %1786 = vmatmul.f32.gmra.mxu3 %v513_v45  ;;  %1899 = vmatmul.f32.gmra.mxu0 %v3843_v44  ;;  %v537_v45 = vld [vmem:[%s4525_s3 + $0x338] sm:$0xff]  ;;  %v3852_v44 = vld [vmem:[%s4525_s3 + $0x300] sm:$0xff] }
 0x273   : > { %v5284_v26 = vadd.f32 %v1719_v49, %v1607_v43  ;;  %2125 = vmatmul.f32.gmra.mxu2 %v3844_v63  ;;  %v1609_v31 = vpop.f32.mrf.mxu1  ;;  %v801_v63 = vld [vmem:[#allocation6 + $0x378] sm:$0xff] }
 0x274   : > { %v1383_v40 = vpop.f32.mrf.mxu3  ;;  %2203 = vmatpush.msrb.mxu3 %v801_v63  ;;  %v561_v63 = vld [vmem:[%s4525_s3 + $0x3f8] sm:$0xff] }
 0x275   : > { %v1384_v30 = vadd.f32 %v1383_v40, %v6497_v11  ;;  %v3853_v40 = vld [vmem:[%s4525_s3 + $0x310] sm:$0xff] }
 0x276   : > { %v1499_v50 = vpop.f32.mrf.mxu0  ;;  %v1722_v1 = vpop.f32.mrf.mxu2  ;;  %2012 = vmatmul.f32.gmra.mxu1 %v3845_v0  ;;  %v545_v0 = vld [vmem:[%s4525_s3 + $0x378] sm:$0xff] }
 0x277   : > { %v1497_v53 = vadd.f32 %v1496_v23, %v1384_v30 }
 0x279   : > { %v1610_v12 = vadd.f32 %v1609_v31, %v1497_v53  ;;  %1789 = vmatmul.f32.gmra.mxu3 %v521_v58  ;;  %1902 = vmatmul.f32.gmra.mxu0 %v3846_v33 }
 0x27b   : > { %v5291_v28 = vadd.f32 %v1722_v1, %v1610_v12  ;;  %2128 = vmatmul.f32.gmra.mxu2 %v3847_v62  ;;  %v1612_v5 = vpop.f32.mrf.mxu1  ;;  %v3854_v12 = vld [vmem:[%s4525_s3 + $0x308] sm:$0xff] }
 0x27c   : > { %v1386_v6 = vpop.f32.mrf.mxu3 }
 0x27d   : > { %v1387_v38 = vadd.f32 %v1386_v6, %v6498_v13  ;;  %v881_v6 = vld [vmem:[#allocation6 + $0x5f8] sm:$0xff] }
 0x27e   : > { %v1502_v3 = vpop.f32.mrf.mxu0  ;;  %v1725_v41 = vpop.f32.mrf.mxu2  ;;  %2015 = vmatmul.f32.gmra.mxu1 %v3848_v47 }
 0x27f   : > { %v1500_v59 = vadd.f32 %v1499_v50, %v1387_v38  ;;  %v6500_v50 = vld [vmem:[#allocation38_spill] sm:$0xff]  ;;  %2421 = vmatpush.msrb.mxu1 %v881_v6  ;;  %v3856_v38 = vld [vmem:[%s4525_s3 + $0x350] sm:$0xff] }
 0x281   : > { %v1613_v8 = vadd.f32 %v1612_v5, %v1500_v59  ;;  %1792 = vmatmul.f32.gmra.mxu3 %v529_v4  ;;  %1905 = vmatmul.f32.gmra.mxu0 %v3849_v7  ;;  %v3855_v5 = vld [vmem:[%s4525_s3 + $0x340] sm:$0xff] }
 0x283   : > { %v5298_v29 = vadd.f32 %v1725_v41, %v1613_v8  ;;  %2131 = vmatmul.f32.gmra.mxu2 %v3850_v61  ;;  %v1615_v42 = vpop.f32.mrf.mxu1  ;;  %v6501_v41 = vld [vmem:[#allocation42_spill] sm:$0xff]  ;;  %v3857_v61 = vld [vmem:[%s4525_s3 + $0x348] sm:$0xff] }
 0x284   : > { %v1389_v46 = vpop.f32.mrf.mxu3  ;;  %v553_v8 = vld [vmem:[%s4525_s3 + $0x3b8] sm:$0xff] }
 0x285   : > { %v1390_v52 = vadd.f32 %v1389_v46, %v6499_v18  ;;  %v3858_v18 = vld [vmem:[%s4525_s3 + $0x380] sm:$0xff] }
 0x286   : > { %v1505_v23 = vpop.f32.mrf.mxu0  ;;  %v1728_v49 = vpop.f32.mrf.mxu2  ;;  %2018 = vmatmul.f32.gmra.mxu1 %v3851_v48 }
 0x287   : > { %v1503_v39 = vadd.f32 %v1502_v3, %v1390_v52  ;;  %v799_v52 = vld [vmem:[#allocation6 + $0x368] sm:$0xff] }
 0x288   : > { %2204 = vmatpush.msrb.mxu3 %v799_v52 }
 0x289   : > { %v1616_v43 = vadd.f32 %v1615_v42, %v1503_v39  ;;  %1795 = vmatmul.f32.gmra.mxu3 %v537_v45  ;;  %1908 = vmatmul.f32.gmra.mxu0 %v3852_v44  ;;  %v3859_v45 = vld [vmem:[%s4525_s3 + $0x390] sm:$0xff]  ;;  %v6502_v39 = vld [vmem:[#allocation46_spill] sm:$0xff] }
 0x28b   : > { %v5305_v31 = vadd.f32 %v1728_v49, %v1616_v43  ;;  %2134 = vmatmul.f32.gmra.mxu2 %v3853_v40  ;;  %v1618_v11 = vpop.f32.mrf.mxu1 }
 0x28c   : > { %v1392_v30 = vpop.f32.mrf.mxu3 }
 0x28d   : > { %v1393_v58 = vadd.f32 %v1392_v30, %v6500_v50  ;;  %v847_v50 = vld [vmem:[#allocation6 + $0x4e8] sm:$0xff] }
 0x28e   : > { %v1508_v1 = vpop.f32.mrf.mxu0  ;;  %v1731_v53 = vpop.f32.mrf.mxu2  ;;  %2021 = vmatmul.f32.gmra.mxu1 %v3854_v12  ;;  %2309 = vmatpush.msrb.mxu0 %v847_v50  ;;  %v3862_v12 = vld [vmem:[%s4525_s3 + $0x3d0] sm:$0xff]  ;;  %v585_v50 = vld [vmem:[%s4525_s3 + $0x4b8] sm:$0xff] }
 0x28f   : > { %v1506_v33 = vadd.f32 %v1505_v23, %v1393_v58 }
 0x291   : > { %v1619_v62 = vadd.f32 %v1618_v11, %v1506_v33  ;;  %1798 = vmatmul.f32.gmra.mxu3 %v545_v0  ;;  %1911 = vmatmul.f32.gmra.mxu0 %v3855_v5  ;;  %v3860_v11 = vld [vmem:[%s4525_s3 + $0x388] sm:$0xff] }
 0x292   : > { %v879_v0 = vld [vmem:[#allocation6 + $0x5e8] sm:$0xff] }
 0x293   : > { %v5312_v13 = vadd.f32 %v1731_v53, %v1619_v62  ;;  %2137 = vmatmul.f32.gmra.mxu2 %v3856_v38  ;;  %v1621_v3 = vpop.f32.mrf.mxu1  ;;  %2422 = vmatpush.msrb.mxu1 %v879_v0  ;;  %v6503_v62 = vld [vmem:[#allocation50_spill] sm:$0xff] }
 0x294   : > { %v1395_v4 = vpop.f32.mrf.mxu3  ;;  %v569_v38 = vld [vmem:[%s4525_s3 + $0x438] sm:$0xff]  ;;  %v3870_v0 = vld [vmem:[%s4525_s3 + $0x480] sm:$0xff] }
 0x295   : > { %v1396_v47 = vadd.f32 %v1395_v4, %v6501_v41  ;;  %v3863_v4 = vld [vmem:[%s4525_s3 + $0x3c8] sm:$0xff] }
 0x296   : > { %v1511_v59 = vpop.f32.mrf.mxu0  ;;  %v1734_v7 = vpop.f32.mrf.mxu2  ;;  %2024 = vmatmul.f32.gmra.mxu1 %v3857_v61  ;;  %v3865_v61 = vld [vmem:[%s4525_s3 + $0x410] sm:$0xff] }
 0x297   : > { %v1509_v42 = vadd.f32 %v1508_v1, %v1396_v47  ;;  %v3861_v1 = vld [vmem:[%s4525_s3 + $0x3c0] sm:$0xff] }
 0x299   : > { %v1622_v46 = vadd.f32 %v1621_v3, %v1509_v42  ;;  %1801 = vmatmul.f32.gmra.mxu3 %v553_v8  ;;  %1914 = vmatmul.f32.gmra.mxu0 %v3858_v18  ;;  %v797_v8 = vld [vmem:[#allocation6 + $0x358] sm:$0xff] }
 0x29a   : > { %2205 = vmatpush.msrb.mxu3 %v797_v8 }
 0x29b   : > { %v5319_v23 = vadd.f32 %v1734_v7, %v1622_v46  ;;  %2140 = vmatmul.f32.gmra.mxu2 %v3859_v45  ;;  %v1624_v49 = vpop.f32.mrf.mxu1  ;;  %v577_v45 = vld [vmem:[%s4525_s3 + $0x478] sm:$0xff] }
 0x29c   : > { %v1398_v48 = vpop.f32.mrf.mxu3 }
 0x29d   : > { %v1399_v43 = vadd.f32 %v1398_v48, %v6502_v39  ;;  %v3866_v48 = vld [vmem:[%s4525_s3 + $0x408] sm:$0xff]  ;;  %v845_v39 = vld [vmem:[#allocation6 + $0x4d8] sm:$0xff] }
 0x29e   : > { %v1514_v44 = vpop.f32.mrf.mxu0  ;;  %v1737_v40 = vpop.f32.mrf.mxu2  ;;  %2027 = vmatmul.f32.gmra.mxu1 %v3860_v11  ;;  %2310 = vmatpush.msrb.mxu0 %v845_v39 }
 0x29f   : > { %v1512_v30 = vadd.f32 %v1511_v59, %v1399_v43  ;;  %v3864_v59 = vld [vmem:[%s4525_s3 + $0x400] sm:$0xff] }
 0x2a0   : > { %v3867_v43 = vld [vmem:[%s4525_s3 + $0x440] sm:$0xff] }
 0x2a1   : > { %v1625_v58 = vadd.f32 %v1624_v49, %v1512_v30  ;;  %1804 = vmatmul.f32.gmra.mxu3 %v561_v63  ;;  %1917 = vmatmul.f32.gmra.mxu0 %v3861_v1  ;;  %v3869_v1 = vld [vmem:[%s4525_s3 + $0x448] sm:$0xff] }
 0x2a3   : > { %v5326_v53 = vadd.f32 %v1737_v40, %v1625_v58  ;;  %2143 = vmatmul.f32.gmra.mxu2 %v3862_v12  ;;  %v1627_v33 = vpop.f32.mrf.mxu1  ;;  %v795_v12 = vld [vmem:[#allocation6 + $0x348] sm:$0xff] }
 0x2a4   : > { %v1401_v25 = vpop.f32.mrf.mxu3  ;;  %2206 = vmatpush.msrb.mxu3 %v795_v12  ;;  %v609_v12 = vld [vmem:[%s4525_s3 + $0x578] sm:$0xff] }
 0x2a5   : > { %v1402_v5 = vadd.f32 %v1401_v25, %v6503_v62 }
 0x2a6   : > { %v5330_v6 = vpop.f32.mrf.mxu0  ;;  %v1740_v3 = vpop.f32.mrf.mxu2  ;;  %2030 = vmatmul.f32.gmra.mxu1 %v3863_v4  ;;  %v3872_v4 = vld [vmem:[%s4525_s3 + $0x488] sm:$0xff] }
 0x2a7   : > { %v1515_v41 = vadd.f32 %v1514_v44, %v1402_v5  ;;  %v877_v44 = vld [vmem:[#allocation6 + $0x5d8] sm:$0xff] }
 0x2a8   : > { %2423 = vmatpush.msrb.mxu1 %v877_v44  ;;  %v3876_v44 = vld [vmem:[%s4525_s3 + $0x500] sm:$0xff] }
 0x2a9   : > { %v1628_v47 = vadd.f32 %v1627_v33, %v1515_v41  ;;  %1807 = vmatmul.f32.gmra.mxu3 %v569_v38  ;;  %1920 = vmatmul.f32.gmra.mxu0 %v3864_v59  ;;  %v3871_v33 = vld [vmem:[%s4525_s3 + $0x490] sm:$0xff]  ;;  %v593_v38 = vld [vmem:[%s4525_s3 + $0x4f8] sm:$0xff]  ;;  %v843_v41 = vld [vmem:[#allocation6 + $0x4c8] sm:$0xff] }
 0x2aa   : > { %2311 = vmatpush.msrb.mxu0 %v843_v41  ;;  %v875_v59 = vld [vmem:[#allocation6 + $0x5c8] sm:$0xff]  ;;  %v873_v41 = vld [vmem:[#allocation6 + $0x5b8] sm:$0xff] }
 0x2ab   : > { %v5335_v7 = vadd.f32 %v1740_v3, %v1628_v47  ;;  %2146 = vmatmul.f32.gmra.mxu2 %v3865_v61  ;;  %v5338_v42 = vpop.f32.mrf.mxu1  ;;  %v3873_v47 = vld [vmem:[%s4525_s3 + $0x4c0] sm:$0xff]  ;;  %2424 = vmatpush.msrb.mxu1 %v875_v59 }
 0x2ac   : > { %v1760_v46 = vpop.f32.mrf.mxu3 }
 0x2ad   : > { %v5341_v18 = vadd.f32 %v1760_v46, %v5054_v60  ;;  %v3868_v60 = vld [vmem:[%s4525_s3 + $0x450] sm:$0xff]  ;;  %2425 = vmatpush.msrb.mxu1 %v873_v41 }
 0x2ae   : > { %v5343_v52 = vpop.f32.mrf.mxu0  ;;  %v5346_v49 = vpop.f32.mrf.mxu2  ;;  %2033 = vmatmul.f32.gmra.mxu1 %v3866_v48  ;;  %v601_v48 = vld [vmem:[%s4525_s3 + $0x538] sm:$0xff] }
 0x2af   : > { %6504 = vst [vmem:[#allocation20_spill] sm:$0xff] %v5341_v18 }
 0x2b1   : > { %1810 = vmatmul.f32.gmra.mxu3 %v577_v45  ;;  %1923 = vmatmul.f32.gmra.mxu0 %v3867_v43  ;;  %v3875_v43 = vld [vmem:[%s4525_s3 + $0x4c8] sm:$0xff] }
 0x2b3   : > { %2149 = vmatmul.f32.gmra.mxu2 %v3868_v60  ;;  %v5351_v63 = vpop.f32.mrf.mxu1  ;;  %v793_v60 = vld [vmem:[#allocation6 + $0x338] sm:$0xff] }
 0x2b4   : > { %v1763_v40 = vpop.f32.mrf.mxu3  ;;  %2207 = vmatpush.msrb.mxu3 %v793_v60  ;;  %v3882_v60 = vld [vmem:[%s4525_s3 + $0x580] sm:$0xff] }
 0x2b5   : > { %v5354_v11 = vadd.f32 %v1763_v40, %v5064_v2  ;;  %v3877_v40 = vld [vmem:[%s4525_s3 + $0x510] sm:$0xff] }
 0x2b6   : > { %v5356_v30 = vpop.f32.mrf.mxu0  ;;  %v5359_v58 = vpop.f32.mrf.mxu2  ;;  %2036 = vmatmul.f32.gmra.mxu1 %v3869_v1 }
 0x2b7   : > { %6505 = vst [vmem:[#allocation21_spill] sm:$0xff] %v5354_v11  ;;  %v3894_v11 = vld [vmem:[%s4525_s3 + $0x680] sm:$0xff] }
 0x2b9   : > { %1813 = vmatmul.f32.gmra.mxu3 %v585_v50  ;;  %1926 = vmatmul.f32.gmra.mxu0 %v3870_v0 }
 0x2bb   : > { %2152 = vmatmul.f32.gmra.mxu2 %v3871_v33  ;;  %v5364_v2 = vpop.f32.mrf.mxu1 }
 0x2bc   : > { %v1766_v25 = vpop.f32.mrf.mxu3 }
 0x2bd   : > { %v5367_v62 = vadd.f32 %v1766_v25, %v5074_v22  ;;  %v3874_v22 = vld [vmem:[%s4525_s3 + $0x4d0] sm:$0xff]  ;;  %v3878_v25 = vld [vmem:[%s4525_s3 + $0x508] sm:$0xff] }
 0x2be   : > { %v5369_v5 = vpop.f32.mrf.mxu0  ;;  %v5372_v3 = vpop.f32.mrf.mxu2  ;;  %2039 = vmatmul.f32.gmra.mxu1 %v3872_v4  ;;  %v3879_v4 = vld [vmem:[%s4525_s3 + $0x540] sm:$0xff] }
 0x2bf   : > { %6506 = vst [vmem:[#allocation22_spill] sm:$0xff] %v5367_v62 }
 0x2c1   : > { %1816 = vmatmul.f32.gmra.mxu3 %v593_v38  ;;  %1929 = vmatmul.f32.gmra.mxu0 %v3873_v47  ;;  %v841_v38 = vld [vmem:[#allocation6 + $0x4b8] sm:$0xff] }
 0x2c2   : > { %2312 = vmatpush.msrb.mxu0 %v841_v38 }
 0x2c3   : > { %2155 = vmatmul.f32.gmra.mxu2 %v3874_v22  ;;  %v5377_v8 = vpop.f32.mrf.mxu1 }
 0x2c4   : > { %v1769_v61 = vpop.f32.mrf.mxu3 }
 0x2c5   : > { %v5380_v46 = vadd.f32 %v1769_v61, %v5084_v15 }
 0x2c6   : > { %v5382_v45 = vpop.f32.mrf.mxu0  ;;  %v5385_v39 = vpop.f32.mrf.mxu2  ;;  %2042 = vmatmul.f32.gmra.mxu1 %v3875_v43 }
 0x2c7   : > { %6507 = vst [vmem:[#allocation23_spill] sm:$0xff] %v5380_v46  ;;  %v909_v46 = vld [vmem:[#allocation6 + $0x6d8] sm:$0xff] }
 0x2c9   : > { %1819 = vmatmul.f32.gmra.mxu3 %v601_v48  ;;  %1932 = vmatmul.f32.gmra.mxu0 %v3876_v44  ;;  %v617_v48 = vld [vmem:[%s4525_s3 + $0x5b8] sm:$0xff]  ;;  %v3881_v44 = vld [vmem:[%s4525_s3 + $0x548] sm:$0xff] }
 0x2cb   : > { %2158 = vmatmul.f32.gmra.mxu2 %v3877_v40  ;;  %v5390_v15 = vpop.f32.mrf.mxu1  ;;  %v791_v40 = vld [vmem:[#allocation6 + $0x328] sm:$0xff] }
 0x2cc   : > { %v1772_v50 = vpop.f32.mrf.mxu3  ;;  %2208 = vmatpush.msrb.mxu3 %v791_v40 }
 0x2cd   : > { %v5393_v1 = vadd.f32 %v1772_v50, %v5094_v10  ;;  %v3880_v10 = vld [vmem:[%s4525_s3 + $0x550] sm:$0xff] }
 0x2ce   : > { %v5395_v0 = vpop.f32.mrf.mxu0  ;;  %v5398_v33 = vpop.f32.mrf.mxu2  ;;  %2045 = vmatmul.f32.gmra.mxu1 %v3878_v25  ;;  %v3883_v50 = vld [vmem:[%s4525_s3 + $0x590] sm:$0xff] }
 0x2cf   : > { %6508 = vst [vmem:[#allocation24_spill] sm:$0xff] %v5393_v1 }
 0x2d1   : > { %1822 = vmatmul.f32.gmra.mxu3 %v609_v12  ;;  %1935 = vmatmul.f32.gmra.mxu0 %v3879_v4  ;;  %v625_v4 = vld [vmem:[%s4525_s3 + $0x5f8] sm:$0xff] }
 0x2d3   : > { %2161 = vmatmul.f32.gmra.mxu2 %v3880_v10  ;;  %v5403_v47 = vpop.f32.mrf.mxu1  ;;  %v3884_v10 = vld [vmem:[%s4525_s3 + $0x588] sm:$0xff] }
 0x2d4   : > { %v1775_v59 = vpop.f32.mrf.mxu3 }
 0x2d5   : > { %v5406_v22 = vadd.f32 %v1775_v59, %v5104_v34  ;;  %v839_v59 = vld [vmem:[#allocation6 + $0x4a8] sm:$0xff] }
 0x2d6   : > { %v5408_v61 = vpop.f32.mrf.mxu0  ;;  %v5411_v43 = vpop.f32.mrf.mxu2  ;;  %2048 = vmatmul.f32.gmra.mxu1 %v3881_v44  ;;  %2313 = vmatpush.msrb.mxu0 %v839_v59  ;;  %v871_v44 = vld [vmem:[#allocation6 + $0x5a8] sm:$0xff] }
 0x2d7   : > { %6509 = vst [vmem:[#allocation25_spill] sm:$0xff] %v5406_v22  ;;  %2426 = vmatpush.msrb.mxu1 %v871_v44  ;;  %v789_v44 = vld [vmem:[#allocation6 + $0x318] sm:$0xff] }
 0x2d8   : > { %2209 = vmatpush.msrb.mxu3 %v789_v44  ;;  %v641_v22 = vld [vmem:[%s4525_s3 + $0x678] sm:$0xff]  ;;  %v3891_v44 = vld [vmem:[%s4525_s3 + $0x640] sm:$0xff] }
 0x2d9   : > { %1825 = vmatmul.f32.gmra.mxu3 %v617_v48  ;;  %1938 = vmatmul.f32.gmra.mxu0 %v3882_v60  ;;  %v3885_v48 = vld [vmem:[%s4525_s3 + $0x5c0] sm:$0xff] }
 0x2db   : > { %2164 = vmatmul.f32.gmra.mxu2 %v3883_v50  ;;  %v5416_v34 = vpop.f32.mrf.mxu1 }
 0x2dc   : > { %v1778_v12 = vpop.f32.mrf.mxu3 }
 0x2dd   : > { %v5419_v25 = vadd.f32 %v1778_v12, %v5114_v37  ;;  %v3886_v37 = vld [vmem:[%s4525_s3 + $0x5d0] sm:$0xff] }
 0x2de   : > { %v5421_v38 = vpop.f32.mrf.mxu0  ;;  %v5424_v41 = vpop.f32.mrf.mxu2  ;;  %2051 = vmatmul.f32.gmra.mxu1 %v3884_v10  ;;  %v633_v10 = vld [vmem:[%s4525_s3 + $0x638] sm:$0xff] }
 0x2df   : > { %6510 = vst [vmem:[#allocation27_spill] sm:$0xff] %v5419_v25 }
 0x2e1   : > { %1828 = vmatmul.f32.gmra.mxu3 %v625_v4  ;;  %1941 = vmatmul.f32.gmra.mxu0 %v3885_v48  ;;  %v3887_v4 = vld [vmem:[%s4525_s3 + $0x5c8] sm:$0xff]  ;;  %v3888_v48 = vld [vmem:[%s4525_s3 + $0x600] sm:$0xff] }
 0x2e3   : > { %2167 = vmatmul.f32.gmra.mxu2 %v3886_v37  ;;  %v5429_v60 = vpop.f32.mrf.mxu1  ;;  %v3889_v37 = vld [vmem:[%s4525_s3 + $0x610] sm:$0xff] }
 0x2e4   : > { %v1781_v40 = vpop.f32.mrf.mxu3 }
 0x2e5   : > { %v5432_v50 = vadd.f32 %v1781_v40, %v5124_v19 }
 0x2e6   : > { %v5434_v12 = vpop.f32.mrf.mxu0  ;;  %v5437_v59 = vpop.f32.mrf.mxu2  ;;  %2054 = vmatmul.f32.gmra.mxu1 %v3887_v4  ;;  %v837_v4 = vld [vmem:[#allocation6 + $0x498] sm:$0xff] }
 0x2e7   : > { %6511 = vst [vmem:[#allocation28_spill] sm:$0xff] %v5432_v50  ;;  %2314 = vmatpush.msrb.mxu0 %v837_v4 }
 0x2e9   : > { %1831 = vmatmul.f32.gmra.mxu3 %v633_v10  ;;  %1944 = vmatmul.f32.gmra.mxu0 %v3888_v48  ;;  %v3890_v10 = vld [vmem:[%s4525_s3 + $0x608] sm:$0xff]  ;;  %v913_v48 = vld [vmem:[#allocation6 + $0x6f8] sm:$0xff] }
 0x2ea   : > { %2534 = vmatpush.msrb.mxu2 %v913_v48 }
 0x2eb   : > { %2170 = vmatmul.f32.gmra.mxu2 %v3889_v37  ;;  %v5442_v25 = vpop.f32.mrf.mxu1  ;;  %v869_v37 = vld [vmem:[#allocation6 + $0x598] sm:$0xff] }
 0x2ec   : > { %v1784_v19 = vpop.f32.mrf.mxu3  ;;  %2427 = vmatpush.msrb.mxu1 %v869_v37  ;;  %v3893_v37 = vld [vmem:[%s4525_s3 + $0x648] sm:$0xff] }
 0x2ed   : > { %v5445_v40 = vadd.f32 %v1784_v19, %v5134_v56  ;;  %v911_v56 = vld [vmem:[#allocation6 + $0x6e8] sm:$0xff]  ;;  %v3892_v19 = vld [vmem:[%s4525_s3 + $0x650] sm:$0xff] }
 0x2ee   : > { %v5447_v50 = vpop.f32.mrf.mxu0  ;;  %v5450_v1 = vpop.f32.mrf.mxu2  ;;  %2057 = vmatmul.f32.gmra.mxu1 %v3890_v10  ;;  %2535 = vmatpush.msrb.mxu2 %v911_v56  ;;  %v835_v56 = vld [vmem:[#allocation6 + $0x488] sm:$0xff] }
 0x2ef   : > { %6512 = vst [vmem:[#allocation30_spill] sm:$0xff] %v5445_v40  ;;  %2315 = vmatpush.msrb.mxu0 %v835_v56  ;;  %v899_v56 = vld [vmem:[#allocation6 + $0x688] sm:$0xff] }
 0x2f0   : > { %2536 = vmatpush.msrb.mxu2 %v909_v46  ;;  %v787_v46 = vld [vmem:[#allocation6 + $0x308] sm:$0xff] }
 0x2f1   : > { %1834 = vmatmul.f32.gmra.mxu3 %v641_v22  ;;  %1947 = vmatmul.f32.gmra.mxu0 %v3891_v44  ;;  %v907_v22 = vld [vmem:[#allocation6 + $0x6c8] sm:$0xff]  ;;  %v649_v44 = vld [vmem:[%s4525_s3 + $0x6b8] sm:$0xff] }
 0x2f2   : > { %2537 = vmatpush.msrb.mxu2 %v907_v22  ;;  %2210 = vmatpush.msrb.mxu3 %v787_v46  ;;  %v901_v22 = vld [vmem:[#allocation6 + $0x698] sm:$0xff] }
 0x2f3   : > { %2173 = vmatmul.f32.gmra.mxu2 %v3892_v19  ;;  %v5455_v40 = vpop.f32.mrf.mxu1  ;;  %v905_v19 = vld [vmem:[#allocation6 + $0x6b8] sm:$0xff] }
 0x2f4   : > { %v1787_v10 = vpop.f32.mrf.mxu3  ;;  %2538 = vmatpush.msrb.mxu2 %v905_v19  ;;  %v657_v46 = vld [vmem:[%s4525_s3 + $0x6f8] sm:$0xff] }
 0x2f5   : > { %v5458_v4 = vadd.f32 %v1787_v10, %v5144_v16  ;;  %v833_v16 = vld [vmem:[#allocation6 + $0x478] sm:$0xff]  ;;  %v903_v10 = vld [vmem:[#allocation6 + $0x6a8] sm:$0xff] }
 0x2f6   : > { %v5460_v48 = vpop.f32.mrf.mxu0  ;;  %v5463_v62 = vpop.f32.mrf.mxu2  ;;  %2060 = vmatmul.f32.gmra.mxu1 %v3893_v37  ;;  %2316 = vmatpush.msrb.mxu0 %v833_v16  ;;  %v831_v37 = vld [vmem:[#allocation6 + $0x468] sm:$0xff] }
 0x2f7   : > { %6513 = vst [vmem:[#allocation31_spill] sm:$0xff] %v5458_v4  ;;  %v3895_v4 = vld [vmem:[%s4525_s3 + $0x690] sm:$0xff]  ;;  %2539 = vmatpush.msrb.mxu2 %v903_v10  ;;  %v827_v16 = vld [vmem:[#allocation6 + $0x448] sm:$0xff]  ;;  %v3897_v10 = vld [vmem:[%s4525_s3 + $0x6c0] sm:$0xff] }
 0x2f8   : > { %6514 = vst [vmem:[#allocation33_spill] sm:$0xff] %v5460_v48  ;;  %2317 = vmatpush.msrb.mxu0 %v831_v37  ;;  %v895_v37 = vld [vmem:[#allocation6 + $0x668] sm:$0xff] }
 0x2f9   : > { %6515 = vst [vmem:[#allocation34_spill] sm:$0xff] %v5463_v62  ;;  %1837 = vmatmul.f32.gmra.mxu3 %v649_v44  ;;  %1950 = vmatmul.f32.gmra.mxu0 %v3894_v11  ;;  %v829_v11 = vld [vmem:[#allocation6 + $0x458] sm:$0xff] }
 0x2fa   : > { %2540 = vmatpush.msrb.mxu2 %v901_v22  ;;  %2318 = vmatpush.msrb.mxu0 %v829_v11  ;;  %v823_v22 = vld [vmem:[#allocation6 + $0x428] sm:$0xff]  ;;  %v865_v11 = vld [vmem:[#allocation6 + $0x578] sm:$0xff] }
 0x2fb   : > { %2176 = vmatmul.f32.gmra.mxu2 %v3895_v4  ;;  %v5468_v18 = vpop.f32.mrf.mxu1  ;;  %v3896_v4 = vld [vmem:[%s4525_s3 + $0x688] sm:$0xff] }
 0x2fc   : > { %6516 = vst [vmem:[#allocation36_spill] sm:$0xff] %v5468_v18  ;;  %v1790_v62 = vpop.f32.mrf.mxu3  ;;  %v897_v18 = vld [vmem:[#allocation6 + $0x678] sm:$0xff]  ;;  %2541 = vmatpush.msrb.mxu2 %v899_v56  ;;  %2319 = vmatpush.msrb.mxu0 %v827_v16 }
 0x2fd   : > { %v5471_v44 = vadd.f32 %v1790_v62, %v5154_v20  ;;  %v867_v20 = vld [vmem:[#allocation6 + $0x588] sm:$0xff]  ;;  %v825_v62 = vld [vmem:[#allocation6 + $0x438] sm:$0xff] }
 0x2fe   : > { %v5473_v19 = vpop.f32.mrf.mxu0  ;;  %v5476_v48 = vpop.f32.mrf.mxu2  ;;  %2063 = vmatmul.f32.gmra.mxu1 %v3896_v4  ;;  %2542 = vmatpush.msrb.mxu2 %v897_v18  ;;  %v893_v56 = vld [vmem:[#allocation6 + $0x658] sm:$0xff]  ;;  %v863_v18 = vld [vmem:[#allocation6 + $0x568] sm:$0xff] }
 0x2ff   : > { %6517 = vst [vmem:[#allocation37_spill] sm:$0xff] %v5471_v44  ;;  %v3898_v44 = vld [vmem:[%s4525_s3 + $0x6d0] sm:$0xff]  ;;  %2428 = vmatpush.msrb.mxu1 %v867_v20  ;;  %2320 = vmatpush.msrb.mxu0 %v825_v62  ;;  %v821_v16 = vld [vmem:[#allocation6 + $0x418] sm:$0xff]  ;;  %v891_v20 = vld [vmem:[#allocation6 + $0x648] sm:$0xff] }
 0x300   : > { %6518 = vst [vmem:[#allocation39_spill] sm:$0xff] %v5473_v19  ;;  %2543 = vmatpush.msrb.mxu2 %v895_v37  ;;  %v819_v62 = vld [vmem:[#allocation6 + $0x408] sm:$0xff]  ;;  %v3900_v37 = vld [vmem:[%s4525_s3 + $0x700] sm:$0xff] }
 0x301   : > { %6519 = vst [vmem:[#allocation40_spill] sm:$0xff] %v5476_v48  ;;  %1840 = vmatmul.f32.gmra.mxu3 %v657_v46  ;;  %1953 = vmatmul.f32.gmra.mxu0 %v3897_v10 }
 0x302   : > { %2429 = vmatpush.msrb.mxu1 %v865_v11  ;;  %2321 = vmatpush.msrb.mxu0 %v823_v22  ;;  %v889_v11 = vld [vmem:[#allocation6 + $0x638] sm:$0xff]  ;;  %v887_v22 = vld [vmem:[#allocation6 + $0x628] sm:$0xff] }
 0x303   : > { %2179 = vmatmul.f32.gmra.mxu2 %v3898_v44  ;;  %v5481_v48 = vpop.f32.mrf.mxu1  ;;  %v665_v44 = vld [vmem:[%s4525_s3 + $0x738] sm:$0xff] }
 0x304   : > { %6520 = vst [vmem:[#allocation41_spill] sm:$0xff] %v5481_v48  ;;  %v1793_v4 = vpop.f32.mrf.mxu3  ;;  %v3899_v48 = vld [vmem:[%s4525_s3 + $0x6c8] sm:$0xff]  ;;  %2544 = vmatpush.msrb.mxu2 %v893_v56  ;;  %2430 = vmatpush.msrb.mxu1 %v863_v18 }
 0x305   : > { %v5484_v46 = vadd.f32 %v1793_v4, %v5164_v21  ;;  %2322 = vmatpush.msrb.mxu0 %v821_v16  ;;  %v861_v21 = vld [vmem:[#allocation6 + $0x558] sm:$0xff] }
 0x306   : > { %v5486_v10 = vpop.f32.mrf.mxu0  ;;  %v5489_v19 = vpop.f32.mrf.mxu2  ;;  %2066 = vmatmul.f32.gmra.mxu1 %v3899_v48  ;;  %v945_v4 = vld [vmem:[#allocation6 + $0x7f8] sm:$0xff]  ;;  %2545 = vmatpush.msrb.mxu2 %v891_v20 }
 0x307   : > { %6521 = vst [vmem:[#allocation43_spill] sm:$0xff] %v5484_v46  ;;  %2323 = vmatpush.msrb.mxu0 %v819_v62  ;;  %v859_v46 = vld [vmem:[#allocation6 + $0x548] sm:$0xff]  ;;  %2431 = vmatpush.msrb.mxu1 %v861_v21  ;;  %v857_v16 = vld [vmem:[#allocation6 + $0x538] sm:$0xff] }
 0x308   : > { %6522 = vst [vmem:[#allocation44_spill] sm:$0xff] %v5489_v19  ;;  %v3901_v19 = vld [vmem:[%s4525_s3 + $0x710] sm:$0xff]  ;;  %2546 = vmatpush.msrb.mxu2 %v889_v11  ;;  %2647 = vmatpush.msra.mxu3 %v945_v4  ;;  %v673_v62 = vld [vmem:[%s4525_s3 + $0x778] sm:$0xff]  ;;  %v855_v21 = vld [vmem:[#allocation6 + $0x528] sm:$0xff] }
 0x309   : > { %1843 = vmatmul.f32.gmra.mxu3 %v665_v44  ;;  %1956 = vmatmul.f32.gmra.mxu0 %v3900_v37  ;;  %v885_v44 = vld [vmem:[#allocation6 + $0x618] sm:$0xff]  ;;  %v883_v11 = vld [vmem:[#allocation6 + $0x608] sm:$0xff]  ;;  %v3904_v4 = vld [vmem:[%s4525_s3 + $0x750] sm:$0xff] }
 0x30a   : > { %2432 = vmatpush.msrb.mxu1 %v859_v46  ;;  %2547 = vmatpush.msrb.mxu2 %v887_v22  ;;  %v853_v46 = vld [vmem:[#allocation6 + $0x518] sm:$0xff]  ;;  %v851_v22 = vld [vmem:[#allocation6 + $0x508] sm:$0xff] }
 0x30b   : > { %2182 = vmatmul.f32.gmra.mxu2 %v3901_v19  ;;  %v5494_v48 = vpop.f32.mrf.mxu1  ;;  %v3902_v19 = vld [vmem:[%s4525_s3 + $0x708] sm:$0xff] }
 0x30c   : > { %v1796_v56 = vpop.f32.mrf.mxu3  ;;  %2433 = vmatpush.msrb.mxu1 %v857_v16  ;;  %2548 = vmatpush.msrb.mxu2 %v885_v44 }
 0x30d   : > { %v5497_v18 = vadd.f32 %v1796_v56, %v5174_v36  ;;  %v3903_v36 = vld [vmem:[%s4525_s3 + $0x740] sm:$0xff] }
 0x30e   : > { %v5499_v20 = vpop.f32.mrf.mxu0  ;;  %v5502_v37 = vpop.f32.mrf.mxu2  ;;  %2069 = vmatmul.f32.gmra.mxu1 %v3902_v19  ;;  %2549 = vmatpush.msrb.mxu2 %v883_v11  ;;  %v3906_v11 = vld [vmem:[%s4525_s3 + $0x780] sm:$0xff] }
 0x30f   : > { %6523 = vst [vmem:[#allocation45_spill] sm:$0xff] %v5497_v18  ;;  %2434 = vmatpush.msrb.mxu1 %v855_v21  ;;  %v3905_v21 = vld [vmem:[%s4525_s3 + $0x748] sm:$0xff] }
 0x311   : > { %1846 = vmatmul.f32.gmra.mxu3 %v673_v62  ;;  %1959 = vmatmul.f32.gmra.mxu0 %v3903_v36  ;;  %v681_v62 = vld [vmem:[%s4525_s3 + $0x7b8] sm:$0xff] }
 0x312   : > { %2435 = vmatpush.msrb.mxu1 %v853_v46  ;;  %v943_v46 = vld [vmem:[#allocation6 + $0x7e8] sm:$0xff] }
 0x313   : > { %2185 = vmatmul.f32.gmra.mxu2 %v3904_v4  ;;  %v5507_v56 = vpop.f32.mrf.mxu1  ;;  %2648 = vmatpush.msra.mxu3 %v943_v46  ;;  %v3907_v4 = vld [vmem:[%s4525_s3 + $0x790] sm:$0xff] }
 0x314   : > { %v1799_v19 = vpop.f32.mrf.mxu3  ;;  %2436 = vmatpush.msrb.mxu1 %v851_v22  ;;  %v3910_v46 = vld [vmem:[%s4525_s3 + $0x7d0] sm:$0xff] }
 0x315   : > { %v5510_v16 = vadd.f32 %v1799_v19, %v5184_v51 }
 0x316   : > { %v5512_v44 = vpop.f32.mrf.mxu0  ;;  %v5515_v36 = vpop.f32.mrf.mxu2  ;;  %2072 = vmatmul.f32.gmra.mxu1 %v3905_v21  ;;  %v689_v21 = vld [vmem:[%s4525_s3 + $0x7f8] sm:$0xff] }
 0x317   : > { %6524 = vst [vmem:[#allocation47_spill] sm:$0xff] %v5510_v16 }
 0x319   : > { %1849 = vmatmul.f32.gmra.mxu3 %v681_v62  ;;  %1962 = vmatmul.f32.gmra.mxu0 %v3906_v11  ;;  %v3908_v62 = vld [vmem:[%s4525_s3 + $0x788] sm:$0xff]  ;;  %v3909_v11 = vld [vmem:[%s4525_s3 + $0x7c0] sm:$0xff] }
 0x31b   : > { %2188 = vmatmul.f32.gmra.mxu2 %v3907_v4  ;;  %v5520_v51 = vpop.f32.mrf.mxu1 }
 0x31c   : > { %v1802_v19 = vpop.f32.mrf.mxu3 }
 0x31d   : > { %v5523_v16 = vadd.f32 %v1802_v19, %v5194_v57 }
 0x31e   : > { %v5525_v18 = vpop.f32.mrf.mxu0  ;;  %v5528_v22 = vpop.f32.mrf.mxu2  ;;  %2075 = vmatmul.f32.gmra.mxu1 %v3908_v62  ;;  %v3913_v62 = vld [vmem:[%s4525_s3 + $0x20] sm:$0xff] }
 0x31f   : > { %6525 = vst [vmem:[#allocation48_spill] sm:$0xff] %v5523_v16 }
 0x320   : > { %6526 = vst [vmem:[#allocation49_spill] sm:$0xff] %v5525_v18 }
 0x321   : > { %6527 = vst [vmem:[#allocation51_spill] sm:$0xff] %v5528_v22  ;;  %1852 = vmatmul.f32.gmra.mxu3 %v689_v21  ;;  %1965 = vmatmul.f32.gmra.mxu0 %v3909_v11  ;;  %v3911_v22 = vld [vmem:[%s4525_s3 + $0x7c8] sm:$0xff]  ;;  %v3912_v21 = vld [vmem:[%s4525_s3 + $0x18] sm:$0xff] }
 0x322   : > { %v941_v11 = vld [vmem:[#allocation6 + $0x7d8] sm:$0xff] }
 0x323   : > { %2191 = vmatmul.f32.gmra.mxu2 %v3910_v46  ;;  %v5533_v4 = vpop.f32.mrf.mxu1  ;;  %2649 = vmatpush.msra.mxu3 %v941_v11  ;;  %v3914_v46 = vld [vmem:[%s4525_s3 + $0x30] sm:$0xff]  ;;  %v3917_v11 = vld [vmem:[%s4525_s3 + $0x60] sm:$0xff] }
 0x324   : > { %v1805_v57 = vpop.f32.mrf.mxu3 }
 0x325   : > { %v5536_v19 = vadd.f32 %v1805_v57, %v5203_v32 }
 0x326   : > { %v5538_v16 = vpop.f32.mrf.mxu0  ;;  %v5540_v18 = vpop.f32.mrf.mxu2  ;;  %2078 = vmatmul.f32.gmra.mxu1 %v3911_v22 }
 0x327   : > { %6528 = vst [vmem:[#allocation26_spill] sm:$0xff] %v5536_v19 }
 0x328   : > { %6529 = vst [vmem:[#allocation29_spill] sm:$0xff] %v5540_v18 }
 0x329   : > { %2211 = vmatmul.f32.vlgmr.msrb.gmra.mxu3 %v3912_v21  ;;  %2324 = vmatmul.f32.vlgmr.msrb.gmra.mxu0 %v3913_v62  ;;  %v3915_v21 = vld [vmem:[%s4525_s3 + $0x28] sm:$0xff]  ;;  %v3916_v62 = vld [vmem:[%s4525_s3 + $0x58] sm:$0xff] }
 0x32b   : > { %2550 = vmatmul.f32.vlgmr.msrb.gmra.mxu2 %v3914_v46  ;;  %v5546_v32 = vpop.f32.mrf.mxu1  ;;  %v3918_v46 = vld [vmem:[%s4525_s3 + $0x70] sm:$0xff] }
 0x32c   : > { %6530 = vst [vmem:[#allocation32_spill] sm:$0xff] %v5546_v32  ;;  %v1808_v57 = vpop.f32.mrf.mxu3 }
 0x32d   : > { %v5549_v19 = vadd.f32 %v1808_v57, %v5213_v55 }
 0x32e   : > { %v5551_v18 = vpop.f32.mrf.mxu0  ;;  %v5553_v22 = vpop.f32.mrf.mxu2  ;;  %2437 = vmatmul.f32.vlgmr.msrb.gmra.mxu1 %v3915_v21  ;;  %v3919_v21 = vld [vmem:[%s4525_s3 + $0x68] sm:$0xff] }
 0x32f   : > { %6531 = vst [vmem:[#allocation35_spill] sm:$0xff] %v5549_v19 }
 0x330   : > { %6532 = vst [vmem:[#allocation38_spill] sm:$0xff] %v5553_v22 }
 0x331   : > { %2214 = vmatmul.f32.gmra.mxu3 %v3916_v62  ;;  %2327 = vmatmul.f32.gmra.mxu0 %v3917_v11  ;;  %v3920_v62 = vld [vmem:[%s4525_s3 + $0x98] sm:$0xff]  ;;  %v3921_v11 = vld [vmem:[%s4525_s3 + $0xa0] sm:$0xff] }
 0x333   : > { %2553 = vmatmul.f32.gmra.mxu2 %v3918_v46  ;;  %v5559_v32 = vpop.f32.mrf.mxu1  ;;  %v939_v46 = vld [vmem:[#allocation6 + $0x7c8] sm:$0xff] }
 0x334   : > { %6533 = vst [vmem:[#allocation42_spill] sm:$0xff] %v5559_v32  ;;  %v1811_v55 = vpop.f32.mrf.mxu3  ;;  %2650 = vmatpush.msra.mxu3 %v939_v46  ;;  %v3922_v32 = vld [vmem:[%s4525_s3 + $0xb0] sm:$0xff]  ;;  %v3925_v46 = vld [vmem:[%s4525_s3 + $0xe0] sm:$0xff] }
 0x335   : > { %v5562_v57 = vadd.f32 %v1811_v55, %v5223_v14 }
 0x336   : > { %v5564_v19 = vpop.f32.mrf.mxu0  ;;  %v5566_v22 = vpop.f32.mrf.mxu2  ;;  %2440 = vmatmul.f32.gmra.mxu1 %v3919_v21 }
 0x337   : > { %6534 = vst [vmem:[#allocation46_spill] sm:$0xff] %v5562_v57 }
 0x338   : > { %6535 = vst [vmem:[#allocation50_spill] sm:$0xff] %v5566_v22 }
 0x339   : > { %2217 = vmatmul.f32.gmra.mxu3 %v3920_v62  ;;  %2330 = vmatmul.f32.gmra.mxu0 %v3921_v11  ;;  %v3923_v62 = vld [vmem:[%s4525_s3 + $0xa8] sm:$0xff]  ;;  %v3924_v11 = vld [vmem:[%s4525_s3 + $0xd8] sm:$0xff] }
 0x33b   : > { %2556 = vmatmul.f32.gmra.mxu2 %v3922_v32  ;;  %v5572_v14 = vpop.f32.mrf.mxu1  ;;  %v3926_v32 = vld [vmem:[%s4525_s3 + $0xf0] sm:$0xff] }
 0x33c   : > { %6536 = vst [vmem:[#allocation52_spill] sm:$0xff] %v5572_v14  ;;  %v1814_v55 = vpop.f32.mrf.mxu3 }
 0x33d   : > { %v5575_v57 = vadd.f32 %v1814_v55, %v5233_v17 }
 0x33e   : > { %v5577_v22 = vpop.f32.mrf.mxu0  ;;  %v5579_v21 = vpop.f32.mrf.mxu2  ;;  %2443 = vmatmul.f32.gmra.mxu1 %v3923_v62  ;;  %v3927_v62 = vld [vmem:[%s4525_s3 + $0xe8] sm:$0xff] }
 0x33f   : > { %6537 = vst [vmem:[#allocation53_spill] sm:$0xff] %v5575_v57 }
 0x340   : > { %6538 = vst [vmem:[#allocation54_spill] sm:$0xff] %v5579_v21 }
 0x341   : > { %2220 = vmatmul.f32.gmra.mxu3 %v3924_v11  ;;  %2333 = vmatmul.f32.gmra.mxu0 %v3925_v46  ;;  %v3928_v11 = vld [vmem:[%s4525_s3 + $0x118] sm:$0xff]  ;;  %v3929_v46 = vld [vmem:[%s4525_s3 + $0x120] sm:$0xff] }
 0x343   : > { %2559 = vmatmul.f32.gmra.mxu2 %v3926_v32  ;;  %v5585_v14 = vpop.f32.mrf.mxu1  ;;  %v937_v32 = vld [vmem:[#allocation6 + $0x7b8] sm:$0xff] }
 0x344   : > { %6539 = vst [vmem:[#allocation55_spill] sm:$0xff] %v5585_v14  ;;  %v1817_v17 = vpop.f32.mrf.mxu3  ;;  %2651 = vmatpush.msra.mxu3 %v937_v32  ;;  %v3930_v14 = vld [vmem:[%s4525_s3 + $0x130] sm:$0xff]  ;;  %v3933_v32 = vld [vmem:[%s4525_s3 + $0x160] sm:$0xff] }
 0x345   : > { %v5588_v55 = vadd.f32 %v1817_v17, %v5243_v54 }
 0x346   : > { %v5590_v57 = vpop.f32.mrf.mxu0  ;;  %v5592_v21 = vpop.f32.mrf.mxu2  ;;  %2446 = vmatmul.f32.gmra.mxu1 %v3927_v62 }
 0x347   : > { %6540 = vst [vmem:[#allocation56_spill] sm:$0xff] %v5588_v55 }
 0x348   : > { %6541 = vst [vmem:[#allocation57_spill] sm:$0xff] %v5592_v21 }
 0x349   : > { %2223 = vmatmul.f32.gmra.mxu3 %v3928_v11  ;;  %2336 = vmatmul.f32.gmra.mxu0 %v3929_v46  ;;  %v3931_v11 = vld [vmem:[%s4525_s3 + $0x128] sm:$0xff]  ;;  %v3932_v46 = vld [vmem:[%s4525_s3 + $0x158] sm:$0xff] }
 0x34b   : > { %2562 = vmatmul.f32.gmra.mxu2 %v3930_v14  ;;  %v5598_v54 = vpop.f32.mrf.mxu1  ;;  %v3934_v14 = vld [vmem:[%s4525_s3 + $0x170] sm:$0xff] }
 0x34c   : > { %6542 = vst [vmem:[#allocation58_spill] sm:$0xff] %v5598_v54  ;;  %v1820_v17 = vpop.f32.mrf.mxu3 }
 0x34d   : > { %v5601_v55 = vadd.f32 %v1820_v17, %v5253_v27 }
 0x34e   : > { %v5603_v21 = vpop.f32.mrf.mxu0  ;;  %v5605_v62 = vpop.f32.mrf.mxu2  ;;  %2449 = vmatmul.f32.gmra.mxu1 %v3931_v11  ;;  %v3935_v11 = vld [vmem:[%s4525_s3 + $0x168] sm:$0xff] }
 0x34f   : > { %6543 = vst [vmem:[#allocation59_spill] sm:$0xff] %v5601_v55 }
 0x350   : > { %6544 = vst [vmem:[#allocation60_spill] sm:$0xff] %v5605_v62 }
 0x351   : > { %2226 = vmatmul.f32.gmra.mxu3 %v3932_v46  ;;  %2339 = vmatmul.f32.gmra.mxu0 %v3933_v32  ;;  %v3936_v46 = vld [vmem:[%s4525_s3 + $0x198] sm:$0xff]  ;;  %v3937_v32 = vld [vmem:[%s4525_s3 + $0x1a0] sm:$0xff] }
 0x353   : > { %2565 = vmatmul.f32.gmra.mxu2 %v3934_v14  ;;  %v5611_v54 = vpop.f32.mrf.mxu1  ;;  %v935_v14 = vld [vmem:[#allocation6 + $0x7a8] sm:$0xff] }
 0x354   : > { %6545 = vst [vmem:[#allocation61_spill] sm:$0xff] %v5611_v54  ;;  %v1823_v27 = vpop.f32.mrf.mxu3  ;;  %2652 = vmatpush.msra.mxu3 %v935_v14  ;;  %v3938_v54 = vld [vmem:[%s4525_s3 + $0x1b0] sm:$0xff]  ;;  %v3941_v14 = vld [vmem:[%s4525_s3 + $0x1e0] sm:$0xff] }
 0x355   : > { %v5614_v17 = vadd.f32 %v1823_v27, %v5263_v24 }
 0x356   : > { %v5616_v55 = vpop.f32.mrf.mxu0  ;;  %v5618_v62 = vpop.f32.mrf.mxu2  ;;  %2452 = vmatmul.f32.gmra.mxu1 %v3935_v11 }
 0x357   : > { %6546 = vst [vmem:[#allocation62_spill] sm:$0xff] %v5614_v17 }
 0x358   : > { %6547 = vst [vmem:[#allocation63_spill] sm:$0xff] %v5618_v62 }
 0x359   : > { %2229 = vmatmul.f32.gmra.mxu3 %v3936_v46  ;;  %2342 = vmatmul.f32.gmra.mxu0 %v3937_v32  ;;  %v3939_v46 = vld [vmem:[%s4525_s3 + $0x1a8] sm:$0xff]  ;;  %v3940_v32 = vld [vmem:[%s4525_s3 + $0x1d8] sm:$0xff] }
 0x35b   : > { %2568 = vmatmul.f32.gmra.mxu2 %v3938_v54  ;;  %v5624_v24 = vpop.f32.mrf.mxu1  ;;  %v3942_v54 = vld [vmem:[%s4525_s3 + $0x1f0] sm:$0xff] }
 0x35c   : > { %6548 = vst [vmem:[#allocation64_spill] sm:$0xff] %v5624_v24  ;;  %v1826_v27 = vpop.f32.mrf.mxu3 }
 0x35d   : > { %v5627_v17 = vadd.f32 %v1826_v27, %v5271_v35 }
 0x35e   : > { %v5629_v62 = vpop.f32.mrf.mxu0  ;;  %v5631_v11 = vpop.f32.mrf.mxu2  ;;  %2455 = vmatmul.f32.gmra.mxu1 %v3939_v46  ;;  %v3943_v46 = vld [vmem:[%s4525_s3 + $0x1e8] sm:$0xff] }
 0x35f   : > { %6549 = vst [vmem:[#allocation65_spill] sm:$0xff] %v5627_v17 }
 0x360   : > { %6550 = vst [vmem:[#allocation66_spill] sm:$0xff] %v5631_v11 }
 0x361   : > { %2232 = vmatmul.f32.gmra.mxu3 %v3940_v32  ;;  %2345 = vmatmul.f32.gmra.mxu0 %v3941_v14  ;;  %v3944_v32 = vld [vmem:[%s4525_s3 + $0x218] sm:$0xff]  ;;  %v3945_v14 = vld [vmem:[%s4525_s3 + $0x220] sm:$0xff] }
 0x363   : > { %2571 = vmatmul.f32.gmra.mxu2 %v3942_v54  ;;  %v5637_v24 = vpop.f32.mrf.mxu1  ;;  %v933_v54 = vld [vmem:[#allocation6 + $0x798] sm:$0xff] }
 0x364   : > { %6551 = vst [vmem:[#allocation67_spill] sm:$0xff] %v5637_v24  ;;  %v1829_v35 = vpop.f32.mrf.mxu3  ;;  %2653 = vmatpush.msra.mxu3 %v933_v54  ;;  %v3946_v24 = vld [vmem:[%s4525_s3 + $0x230] sm:$0xff]  ;;  %v3949_v54 = vld [vmem:[%s4525_s3 + $0x260] sm:$0xff] }
 0x365   : > { %v5640_v27 = vadd.f32 %v1829_v35, %v5277_v9 }
 0x366   : > { %v5642_v17 = vpop.f32.mrf.mxu0  ;;  %v5644_v11 = vpop.f32.mrf.mxu2  ;;  %2458 = vmatmul.f32.gmra.mxu1 %v3943_v46 }
 0x367   : > { %6552 = vst [vmem:[#allocation68_spill] sm:$0xff] %v5640_v27 }
 0x368   : > { %6553 = vst [vmem:[#allocation69_spill] sm:$0xff] %v5644_v11 }
 0x369   : > { %2235 = vmatmul.f32.gmra.mxu3 %v3944_v32  ;;  %2348 = vmatmul.f32.gmra.mxu0 %v3945_v14  ;;  %v3947_v32 = vld [vmem:[%s4525_s3 + $0x228] sm:$0xff]  ;;  %v3948_v14 = vld [vmem:[%s4525_s3 + $0x258] sm:$0xff] }
 0x36b   : > { %2574 = vmatmul.f32.gmra.mxu2 %v3946_v24  ;;  %v5650_v9 = vpop.f32.mrf.mxu1  ;;  %v3950_v24 = vld [vmem:[%s4525_s3 + $0x270] sm:$0xff] }
 0x36c   : > { %6554 = vst [vmem:[#allocation70_spill] sm:$0xff] %v5650_v9  ;;  %v1832_v35 = vpop.f32.mrf.mxu3 }
 0x36d   : > { %v5653_v27 = vadd.f32 %v1832_v35, %v5284_v26 }
 0x36e   : > { %v5655_v11 = vpop.f32.mrf.mxu0  ;;  %v5657_v46 = vpop.f32.mrf.mxu2  ;;  %2461 = vmatmul.f32.gmra.mxu1 %v3947_v32  ;;  %v3951_v32 = vld [vmem:[%s4525_s3 + $0x268] sm:$0xff] }
 0x36f   : > { %6555 = vst [vmem:[#allocation71_spill] sm:$0xff] %v5653_v27 }
 0x370   : > { %6556 = vst [vmem:[#allocation72_spill] sm:$0xff] %v5657_v46 }
 0x371   : > { %2238 = vmatmul.f32.gmra.mxu3 %v3948_v14  ;;  %2351 = vmatmul.f32.gmra.mxu0 %v3949_v54  ;;  %v3952_v14 = vld [vmem:[%s4525_s3 + $0x298] sm:$0xff]  ;;  %v3953_v54 = vld [vmem:[%s4525_s3 + $0x2a0] sm:$0xff] }
 0x373   : > { %2577 = vmatmul.f32.gmra.mxu2 %v3950_v24  ;;  %v5663_v9 = vpop.f32.mrf.mxu1  ;;  %v931_v24 = vld [vmem:[#allocation6 + $0x788] sm:$0xff] }
 0x374   : > { %6557 = vst [vmem:[#allocation73_spill] sm:$0xff] %v5663_v9  ;;  %v1835_v26 = vpop.f32.mrf.mxu3  ;;  %2654 = vmatpush.msra.mxu3 %v931_v24  ;;  %v3954_v9 = vld [vmem:[%s4525_s3 + $0x2b0] sm:$0xff]  ;;  %v3957_v24 = vld [vmem:[%s4525_s3 + $0x2e0] sm:$0xff] }
 0x375   : > { %v5666_v35 = vadd.f32 %v1835_v26, %v5291_v28 }
 0x376   : > { %v5668_v27 = vpop.f32.mrf.mxu0  ;;  %v5670_v46 = vpop.f32.mrf.mxu2  ;;  %2464 = vmatmul.f32.gmra.mxu1 %v3951_v32 }
 0x377   : > { %6558 = vst [vmem:[#allocation74_spill] sm:$0xff] %v5666_v35 }
 0x378   : > { %6559 = vst [vmem:[#allocation75_spill] sm:$0xff] %v5670_v46 }
 0x379   : > { %2241 = vmatmul.f32.gmra.mxu3 %v3952_v14  ;;  %2354 = vmatmul.f32.gmra.mxu0 %v3953_v54  ;;  %v3955_v14 = vld [vmem:[%s4525_s3 + $0x2a8] sm:$0xff]  ;;  %v3956_v54 = vld [vmem:[%s4525_s3 + $0x2d8] sm:$0xff] }
 0x37b   : > { %2580 = vmatmul.f32.gmra.mxu2 %v3954_v9  ;;  %v5676_v28 = vpop.f32.mrf.mxu1  ;;  %v3958_v9 = vld [vmem:[%s4525_s3 + $0x2f0] sm:$0xff] }
 0x37c   : > { %6560 = vst [vmem:[#allocation76_spill] sm:$0xff] %v5676_v28  ;;  %v1838_v26 = vpop.f32.mrf.mxu3 }
 0x37d   : > { %v5679_v35 = vadd.f32 %v1838_v26, %v5298_v29 }
 0x37e   : > { %v5681_v46 = vpop.f32.mrf.mxu0  ;;  %v5683_v32 = vpop.f32.mrf.mxu2  ;;  %2467 = vmatmul.f32.gmra.mxu1 %v3955_v14  ;;  %v3959_v14 = vld [vmem:[%s4525_s3 + $0x2e8] sm:$0xff] }
 0x37f   : > { %6561 = vst [vmem:[#allocation77_spill] sm:$0xff] %v5679_v35 }
 0x380   : > { %6562 = vst [vmem:[#allocation78_spill] sm:$0xff] %v5681_v46  ;;  %v3960_v46 = vld [vmem:[%s4525_s3 + $0x318] sm:$0xff] }
 0x381   : > { %6563 = vst [vmem:[#allocation79_spill] sm:$0xff] %v5683_v32  ;;  %2244 = vmatmul.f32.gmra.mxu3 %v3956_v54  ;;  %2357 = vmatmul.f32.gmra.mxu0 %v3957_v24  ;;  %v3961_v54 = vld [vmem:[%s4525_s3 + $0x320] sm:$0xff]  ;;  %v929_v24 = vld [vmem:[#allocation6 + $0x778] sm:$0xff] }
 0x382   : > { %2655 = vmatpush.msra.mxu3 %v929_v24  ;;  %v3964_v24 = vld [vmem:[%s4525_s3 + $0x358] sm:$0xff] }
 0x383   : > { %2583 = vmatmul.f32.gmra.mxu2 %v3958_v9  ;;  %v5689_v28 = vpop.f32.mrf.mxu1  ;;  %v3962_v9 = vld [vmem:[%s4525_s3 + $0x330] sm:$0xff] }
 0x384   : > { %v1841_v29 = vpop.f32.mrf.mxu3 }
 0x385   : > { %v5692_v26 = vadd.f32 %v1841_v29, %v5305_v31 }
 0x386   : > { %v5694_v35 = vpop.f32.mrf.mxu0  ;;  %v5696_v32 = vpop.f32.mrf.mxu2  ;;  %2470 = vmatmul.f32.gmra.mxu1 %v3959_v14 }
 0x387   : > { %6564 = vst [vmem:[#allocation80_spill] sm:$0xff] %v5692_v26 }
 0x388   : > { %6565 = vst [vmem:[#allocation81_spill] sm:$0xff] %v5694_v35  ;;  %v3981_v35 = vld [vmem:[%s4525_s3 + $0x458] sm:$0xff] }
 0x389   : > { %6566 = vst [vmem:[#allocation82_spill] sm:$0xff] %v5696_v32  ;;  %2247 = vmatmul.f32.gmra.mxu3 %v3960_v46  ;;  %2360 = vmatmul.f32.gmra.mxu0 %v3961_v54  ;;  %v3963_v46 = vld [vmem:[%s4525_s3 + $0x328] sm:$0xff]  ;;  %v2839_v54 = vld [vmem:[#allocation9 + $0x78] sm:$0xff] }
 0x38a   : > { %2860 = vmatpush.msra.mxu0 %v2839_v54 }
 0x38b   : > { %2586 = vmatmul.f32.gmra.mxu2 %v3962_v9  ;;  %v5702_v31 = vpop.f32.mrf.mxu1  ;;  %v3965_v9 = vld [vmem:[%s4525_s3 + $0x360] sm:$0xff] }
 0x38c   : > { %6567 = vst [vmem:[#allocation83_spill] sm:$0xff] %v5702_v31  ;;  %v1844_v29 = vpop.f32.mrf.mxu3  ;;  %v2855_v31 = vld [vmem:[#allocation9 + $0xf8] sm:$0xff] }
 0x38d   : > { %v5705_v26 = vadd.f32 %v1844_v29, %v5312_v13  ;;  %2973 = vmatpush.msra.mxu1 %v2855_v31  ;;  %v3966_v13 = vld [vmem:[%s4525_s3 + $0x370] sm:$0xff]  ;;  %v927_v31 = vld [vmem:[#allocation6 + $0x768] sm:$0xff] }
 0x38e   : > { %v5707_v32 = vpop.f32.mrf.mxu0  ;;  %v5709_v14 = vpop.f32.mrf.mxu2  ;;  %2473 = vmatmul.f32.gmra.mxu1 %v3963_v46  ;;  %2656 = vmatpush.msra.mxu3 %v927_v31  ;;  %v3973_v31 = vld [vmem:[%s4525_s3 + $0x3d8] sm:$0xff] }
 0x38f   : > { %6568 = vst [vmem:[#allocation84_spill] sm:$0xff] %v5705_v26 }
 0x390   : > { %6569 = vst [vmem:[#allocation85_spill] sm:$0xff] %v5707_v32  ;;  %v3968_v32 = vld [vmem:[%s4525_s3 + $0x398] sm:$0xff] }
 0x391   : > { %6570 = vst [vmem:[#allocation86_spill] sm:$0xff] %v5709_v14  ;;  %2250 = vmatmul.f32.gmra.mxu3 %v3964_v24  ;;  %2363 = vmatmul.f32.gmra.mxu0 %v3965_v9  ;;  %v3967_v24 = vld [vmem:[%s4525_s3 + $0x368] sm:$0xff]  ;;  %v3969_v9 = vld [vmem:[%s4525_s3 + $0x3a0] sm:$0xff] }
 0x393   : > { %2589 = vmatmul.f32.gmra.mxu2 %v3966_v13  ;;  %v5715_v29 = vpop.f32.mrf.mxu1  ;;  %v3970_v13 = vld [vmem:[%s4525_s3 + $0x3b0] sm:$0xff] }
 0x394   : > { %6571 = vst [vmem:[#allocation87_spill] sm:$0xff] %v5715_v29  ;;  %v1847_v26 = vpop.f32.mrf.mxu3 }
 0x395   : > { %v5718_v14 = vadd.f32 %v1847_v26, %v5319_v23 }
 0x396   : > { %v5720_v46 = vpop.f32.mrf.mxu0  ;;  %v5722_v54 = vpop.f32.mrf.mxu2  ;;  %2476 = vmatmul.f32.gmra.mxu1 %v3967_v24 }
 0x397   : > { %6572 = vst [vmem:[#allocation88_spill] sm:$0xff] %v5718_v14 }
 0x398   : > { %6573 = vst [vmem:[#allocation89_spill] sm:$0xff] %v5720_v46 }
 0x399   : > { %6574 = vst [vmem:[#allocation90_spill] sm:$0xff] %v5722_v54  ;;  %2253 = vmatmul.f32.gmra.mxu3 %v3968_v32  ;;  %2366 = vmatmul.f32.gmra.mxu0 %v3969_v9  ;;  %v3971_v32 = vld [vmem:[%s4525_s3 + $0x3a8] sm:$0xff]  ;;  %v2838_v9 = vld [vmem:[#allocation9 + $0x70] sm:$0xff]  ;;  %v3972_v54 = vld [vmem:[#allocation8] sm:$0x3] }
 0x39a   : > { %v5738_v46 = vperm.slane %v3972_v54, 1  ;;  %2861 = vmatpush.msra.mxu0 %v2838_v9 }
 0x39b   : > { %2592 = vmatmul.f32.gmra.mxu2 %v3970_v13  ;;  %v5728_v29 = vpop.f32.mrf.mxu1  ;;  %v3974_v13 = vld [vmem:[%s4525_s3 + $0x3e0] sm:$0xff] }
 0x39c   : > { %6575 = vst [vmem:[#allocation91_spill] sm:$0xff] %v5728_v29  ;;  %v1850_v23 = vpop.f32.mrf.mxu3  ;;  %v3980_v29 = vld [vmem:[%s4525_s3 + $0x428] sm:$0xff] }
 0x39d   : > { %v5731_v26 = vadd.f32 %v1850_v23, %v5326_v53  ;;  %v2854_v53 = vld [vmem:[#allocation9 + $0xf0] sm:$0xff]  ;;  %v1874_v23 = vadd.f32 %v5330_v6, %v5738_v46  ;;  %v3978_v6 = vld [vmem:[%s4525_s3 + $0x420] sm:$0xff] }
 0x39e   : > { %v5733_v14 = vpop.f32.mrf.mxu0  ;;  %v5735_v24 = vpop.f32.mrf.mxu2  ;;  %2479 = vmatmul.f32.gmra.mxu1 %v3971_v32 }
 0x39f   : > { %6576 = vst [vmem:[#allocation92_spill] sm:$0xff] %v5731_v26  ;;  %2974 = vmatpush.msra.mxu1 %v2854_v53  ;;  %v3975_v26 = vld [vmem:[%s4525_s3 + $0x3f0] sm:$0xff]  ;;  %v3977_v53 = vld [vmem:[%s4525_s3 + $0x418] sm:$0xff] }
 0x3a0   : > { %6577 = vst [vmem:[#allocation93_spill] sm:$0xff] %v5733_v14  ;;  %v3976_v14 = vld [vmem:[%s4525_s3 + $0x3e8] sm:$0xff] }
 0x3a1   : > { %6578 = vst [vmem:[#allocation94_spill] sm:$0xff] %v5735_v24  ;;  %2256 = vmatmul.f32.gmra.mxu3 %v3973_v31  ;;  %2369 = vmatmul.f32.gmra.mxu0 %v3974_v13  ;;  %v1987_v13 = vadd.f32 %v5338_v42, %v1874_v23 }
 0x3a3   : > { %2595 = vmatmul.f32.gmra.mxu2 %v3975_v26  ;;  %v5745_v32 = vpop.f32.mrf.mxu1  ;;  %v925_v26 = vld [vmem:[#allocation6 + $0x758] sm:$0xff] }
 0x3a4   : > { %6579 = vst [vmem:[#allocation95_spill] sm:$0xff] %v5745_v32  ;;  %v1853_v54 = vpop.f32.mrf.mxu3  ;;  %2657 = vmatpush.msra.mxu3 %v925_v26  ;;  %v1877_v32 = vadd.f32 %v5343_v52, %v5738_v46 }
 0x3a5   : > { %v5748_v24 = vadd.f32 %v1853_v54, %v5335_v7  ;;  %v2100_v7 = vadd.f32 %v5346_v49, %v1987_v13  ;;  %v3979_v54 = vld [vmem:[%s4525_s3 + $0x430] sm:$0xff]  ;;  %v3982_v49 = vld [vmem:[%s4525_s3 + $0x460] sm:$0xff] }
 0x3a6   : > { %v2325_v9 = vpop.f32.mrf.mxu0  ;;  %v5750_v31 = vpop.f32.mrf.mxu2  ;;  %2482 = vmatmul.f32.gmra.mxu1 %v3976_v14  ;;  %v2853_v13 = vld [vmem:[#allocation9 + $0xe8] sm:$0xff] }
 0x3a7   : > { %6580 = vst [vmem:[#allocation96_spill] sm:$0xff] %v5748_v24  ;;  %2975 = vmatpush.msra.mxu1 %v2853_v13 }
 0x3a8   : > { %6581 = vst [vmem:[#allocation97_spill] sm:$0xff] %v5750_v31 }
 0x3a9   : > { %2259 = vmatmul.f32.gmra.mxu3 %v3977_v53  ;;  %2372 = vmatmul.f32.gmra.mxu0 %v3978_v6  ;;  %v2837_v53 = vld [vmem:[#allocation9 + $0x68] sm:$0xff]  ;;  %v1990_v6 = vadd.f32 %v5351_v63, %v1877_v32 }
 0x3aa   : > { %2862 = vmatpush.msra.mxu0 %v2837_v53  ;;  %v3983_v63 = vld [vmem:[%s4525_s3 + $0x470] sm:$0xff] }
 0x3ab   : > { %2598 = vmatmul.f32.gmra.mxu2 %v3979_v54  ;;  %v2438_v24 = vpop.f32.mrf.mxu1  ;;  %v2103_v54 = vadd.f32 %v5359_v58, %v1990_v6  ;;  %v3986_v58 = vld [vmem:[%s4525_s3 + $0x4a0] sm:$0xff]  ;;  %v1883_v6 = vadd.f32 %v5369_v5, %v5738_v46 }
 0x3ac   : > { %v2212_v14 = vpop.f32.mrf.mxu3 }
 0x3ad   : > { %v2213_v31 = vadd.f32 %v2212_v14, %v2100_v7  ;;  %v1880_v7 = vadd.f32 %v5356_v30, %v5738_v46  ;;  %v3984_v14 = vld [vmem:[%s4525_s3 + $0x468] sm:$0xff]  ;;  %v3985_v30 = vld [vmem:[%s4525_s3 + $0x498] sm:$0xff] }
 0x3ae   : > { %v2328_v42 = vpop.f32.mrf.mxu0  ;;  %v2551_v23 = vpop.f32.mrf.mxu2  ;;  %2485 = vmatmul.f32.gmra.mxu1 %v3980_v29 }
 0x3af   : > { %v2326_v26 = vadd.f32 %v2325_v9, %v2213_v31  ;;  %v1993_v53 = vadd.f32 %v5364_v2, %v1880_v7 }
 0x3b1   : > { %v2439_v52 = vadd.f32 %v2438_v24, %v2326_v26  ;;  %2262 = vmatmul.f32.gmra.mxu3 %v3981_v35  ;;  %2375 = vmatmul.f32.gmra.mxu0 %v3982_v49 }
 0x3b3   : > { %v5767_v29 = vadd.f32 %v2551_v23, %v2439_v52  ;;  %2601 = vmatmul.f32.gmra.mxu2 %v3983_v63  ;;  %v2441_v32 = vpop.f32.mrf.mxu1  ;;  %v923_v23 = vld [vmem:[#allocation6 + $0x748] sm:$0xff]  ;;  %v2106_v52 = vadd.f32 %v5372_v3, %v1993_v53  ;;  %v3989_v53 = vld [vmem:[%s4525_s3 + $0x4d8] sm:$0xff] }
 0x3b4   : > { %v2215_v24 = vpop.f32.mrf.mxu3  ;;  %2658 = vmatpush.msra.mxu3 %v923_v23 }
 0x3b5   : > { %v2216_v9 = vadd.f32 %v2215_v24, %v2103_v54  ;;  %v3987_v54 = vld [vmem:[%s4525_s3 + $0x4b0] sm:$0xff]  ;;  %v3988_v24 = vld [vmem:[%s4525_s3 + $0x4a8] sm:$0xff] }
 0x3b6   : > { %v2331_v31 = vpop.f32.mrf.mxu0  ;;  %v2554_v35 = vpop.f32.mrf.mxu2  ;;  %2488 = vmatmul.f32.gmra.mxu1 %v3984_v14  ;;  %v1996_v14 = vadd.f32 %v5377_v8, %v1883_v6  ;;  %v3991_v8 = vld [vmem:[%s4525_s3 + $0x4f0] sm:$0xff] }
 0x3b7   : > { %v2329_v26 = vadd.f32 %v2328_v42, %v2216_v9  ;;  %v2836_v9 = vld [vmem:[#allocation9 + $0x60] sm:$0xff] }
 0x3b8   : > { %2863 = vmatpush.msra.mxu0 %v2836_v9  ;;  %v1889_v9 = vadd.f32 %v5395_v0, %v5738_v46 }
 0x3b9   : > { %v2442_v49 = vadd.f32 %v2441_v32, %v2329_v26  ;;  %2265 = vmatmul.f32.gmra.mxu3 %v3985_v30  ;;  %2378 = vmatmul.f32.gmra.mxu0 %v3986_v58  ;;  %v2852_v26 = vld [vmem:[#allocation9 + $0xe0] sm:$0xff]  ;;  %v2109_v30 = vadd.f32 %v5385_v39, %v1996_v14 }
 0x3ba   : > { %2976 = vmatpush.msra.mxu1 %v2852_v26  ;;  %v3994_v39 = vld [vmem:[%s4525_s3 + $0x520] sm:$0xff] }
 0x3bb   : > { %v5777_v13 = vadd.f32 %v2554_v35, %v2442_v49  ;;  %2604 = vmatmul.f32.gmra.mxu2 %v3987_v54  ;;  %v2444_v2 = vpop.f32.mrf.mxu1  ;;  %v3990_v35 = vld [vmem:[%s4525_s3 + $0x4e0] sm:$0xff]  ;;  %v1886_v49 = vadd.f32 %v5382_v45, %v5738_v46  ;;  %v3993_v45 = vld [vmem:[%s4525_s3 + $0x518] sm:$0xff] }
 0x3bc   : > { %v2218_v42 = vpop.f32.mrf.mxu3 }
 0x3bd   : > { %v2219_v7 = vadd.f32 %v2218_v42, %v2106_v52  ;;  %v1999_v42 = vadd.f32 %v5390_v15, %v1886_v49  ;;  %v3996_v49 = vld [vmem:[%s4525_s3 + $0x528] sm:$0xff] }
 0x3be   : > { %v2334_v63 = vpop.f32.mrf.mxu0  ;;  %v2557_v32 = vpop.f32.mrf.mxu2  ;;  %2491 = vmatmul.f32.gmra.mxu1 %v3988_v24 }
 0x3bf   : > { %v2332_v5 = vadd.f32 %v2331_v31, %v2219_v7  ;;  %v2112_v14 = vadd.f32 %v5398_v33, %v1999_v42 }
 0x3c1   : > { %v2445_v3 = vadd.f32 %v2444_v2, %v2332_v5  ;;  %2268 = vmatmul.f32.gmra.mxu3 %v3989_v53  ;;  %2381 = vmatmul.f32.gmra.mxu0 %v3990_v35  ;;  %v3992_v2 = vld [vmem:[%s4525_s3 + $0x4e8] sm:$0xff] }
 0x3c3   : > { %v5787_v58 = vadd.f32 %v2557_v32, %v2445_v3  ;;  %2607 = vmatmul.f32.gmra.mxu2 %v3991_v8  ;;  %v2447_v31 = vpop.f32.mrf.mxu1  ;;  %v921_v32 = vld [vmem:[#allocation6 + $0x738] sm:$0xff]  ;;  %v3995_v3 = vld [vmem:[%s4525_s3 + $0x530] sm:$0xff]  ;;  %v2002_v8 = vadd.f32 %v5403_v47, %v1889_v9 }
 0x3c4   : > { %v2221_v23 = vpop.f32.mrf.mxu3  ;;  %2659 = vmatpush.msra.mxu3 %v921_v32  ;;  %v3999_v47 = vld [vmem:[%s4525_s3 + $0x570] sm:$0xff]  ;;  %v4000_v32 = vld [vmem:[%s4525_s3 + $0x568] sm:$0xff] }
 0x3c5   : > { %v2222_v6 = vadd.f32 %v2221_v23, %v2109_v30  ;;  %v2835_v30 = vld [vmem:[#allocation9 + $0x58] sm:$0xff] }
 0x3c6   : > { %v2337_v52 = vpop.f32.mrf.mxu0  ;;  %v2560_v54 = vpop.f32.mrf.mxu2  ;;  %2494 = vmatmul.f32.gmra.mxu1 %v3992_v2  ;;  %2864 = vmatpush.msra.mxu0 %v2835_v30  ;;  %v3998_v23 = vld [vmem:[%s4525_s3 + $0x560] sm:$0xff]  ;;  %v2115_v2 = vadd.f32 %v5411_v43, %v2002_v8 }
 0x3c7   : > { %v2335_v7 = vadd.f32 %v2334_v63, %v2222_v6  ;;  %v2851_v6 = vld [vmem:[#allocation9 + $0xd8] sm:$0xff] }
 0x3c8   : > { %2977 = vmatpush.msra.mxu1 %v2851_v6  ;;  %v4002_v43 = vld [vmem:[%s4525_s3 + $0x5a0] sm:$0xff]  ;;  %v4005_v6 = vld [vmem:[%s4525_s3 + $0x5d8] sm:$0xff] }
 0x3c9   : > { %v2448_v24 = vadd.f32 %v2447_v31, %v2335_v7  ;;  %2271 = vmatmul.f32.gmra.mxu3 %v3993_v45  ;;  %2384 = vmatmul.f32.gmra.mxu0 %v3994_v39  ;;  %v3997_v31 = vld [vmem:[%s4525_s3 + $0x558] sm:$0xff] }
 0x3cb   : > { %v5797_v5 = vadd.f32 %v2560_v54, %v2448_v24  ;;  %2610 = vmatmul.f32.gmra.mxu2 %v3995_v3  ;;  %v2450_v15 = vpop.f32.mrf.mxu1  ;;  %v1892_v54 = vadd.f32 %v5408_v61, %v5738_v46  ;;  %v4001_v61 = vld [vmem:[%s4525_s3 + $0x598] sm:$0xff] }
 0x3cc   : > { %v2224_v63 = vpop.f32.mrf.mxu3 }
 0x3cd   : > { %v2225_v53 = vadd.f32 %v2224_v63, %v2112_v14  ;;  %v2005_v9 = vadd.f32 %v5416_v34, %v1892_v54  ;;  %v1895_v63 = vadd.f32 %v5421_v38, %v5738_v46  ;;  %v4006_v54 = vld [vmem:[%s4525_s3 + $0x5e0] sm:$0xff] }
 0x3ce   : > { %v2340_v35 = vpop.f32.mrf.mxu0  ;;  %v2563_v26 = vpop.f32.mrf.mxu2  ;;  %2497 = vmatmul.f32.gmra.mxu1 %v3996_v49  ;;  %v4003_v49 = vld [vmem:[%s4525_s3 + $0x5b0] sm:$0xff] }
 0x3cf   : > { %v2338_v0 = vadd.f32 %v2337_v52, %v2225_v53  ;;  %v2118_v53 = vadd.f32 %v5424_v41, %v2005_v9  ;;  %v4008_v9 = vld [vmem:[%s4525_s3 + $0x5e8] sm:$0xff] }
 0x3d1   : > { %v2451_v33 = vadd.f32 %v2450_v15, %v2338_v0  ;;  %2274 = vmatmul.f32.gmra.mxu3 %v3997_v31  ;;  %2387 = vmatmul.f32.gmra.mxu0 %v3998_v23  ;;  %v919_v15 = vld [vmem:[#allocation6 + $0x728] sm:$0xff]  ;;  %v2834_v31 = vld [vmem:[#allocation9 + $0x50] sm:$0xff]  ;;  %v2008_v23 = vadd.f32 %v5429_v60, %v1895_v63  ;;  %v1901_v63 = vadd.f32 %v5447_v50, %v5738_v46 }
 0x3d2   : > { %2660 = vmatpush.msra.mxu3 %v919_v15  ;;  %2865 = vmatpush.msra.mxu0 %v2834_v31  ;;  %v4007_v60 = vld [vmem:[%s4525_s3 + $0x5f0] sm:$0xff]  ;;  %v917_v15 = vld [vmem:[#allocation6 + $0x718] sm:$0xff] }
 0x3d3   : > { %v5807_v42 = vadd.f32 %v2563_v26, %v2451_v33  ;;  %2613 = vmatmul.f32.gmra.mxu2 %v3999_v47  ;;  %v2453_v52 = vpop.f32.mrf.mxu1  ;;  %v4004_v33 = vld [vmem:[%s4525_s3 + $0x5a8] sm:$0xff]  ;;  %v1898_v47 = vadd.f32 %v5434_v12, %v5738_v46  ;;  %v4013_v50 = vld [vmem:[%s4525_s3 + $0x658] sm:$0xff] }
 0x3d4   : > { %v2227_v7 = vpop.f32.mrf.mxu3  ;;  %2661 = vmatpush.msra.mxu3 %v917_v15 }
 0x3d5   : > { %v2228_v24 = vadd.f32 %v2227_v7, %v2115_v2  ;;  %v2850_v2 = vld [vmem:[#allocation9 + $0xd0] sm:$0xff] }
 0x3d6   : > { %v2343_v45 = vpop.f32.mrf.mxu0  ;;  %v2566_v39 = vpop.f32.mrf.mxu2  ;;  %2500 = vmatmul.f32.gmra.mxu1 %v4000_v32 }
 0x3d7   : > { %v2341_v14 = vadd.f32 %v2340_v35, %v2228_v24  ;;  %2978 = vmatpush.msra.mxu1 %v2850_v2  ;;  %v4015_v2 = vld [vmem:[%s4525_s3 + $0x670] sm:$0xff] }
 0x3d9   : > { %v2454_v3 = vadd.f32 %v2453_v52, %v2341_v14  ;;  %2277 = vmatmul.f32.gmra.mxu3 %v4001_v61  ;;  %2390 = vmatmul.f32.gmra.mxu0 %v4002_v43  ;;  %v2121_v52 = vadd.f32 %v5437_v59, %v2008_v23  ;;  %v2011_v14 = vadd.f32 %v5442_v25, %v1898_v47  ;;  %v4009_v43 = vld [vmem:[%s4525_s3 + $0x618] sm:$0xff]  ;;  %v4010_v59 = vld [vmem:[%s4525_s3 + $0x620] sm:$0xff]  ;;  %v4011_v25 = vld [vmem:[%s4525_s3 + $0x630] sm:$0xff] }
 0x3da   : > { %v2849_v23 = vld [vmem:[#allocation9 + $0xc8] sm:$0xff] }
 0x3db   : > { %v5817_v26 = vadd.f32 %v2566_v39, %v2454_v3  ;;  %2616 = vmatmul.f32.gmra.mxu2 %v4003_v49  ;;  %v2456_v35 = vpop.f32.mrf.mxu1  ;;  %2979 = vmatpush.msra.mxu1 %v2849_v23  ;;  %v4021_v23 = vld [vmem:[%s4525_s3 + $0x6d8] sm:$0xff] }
 0x3dc   : > { %v2230_v34 = vpop.f32.mrf.mxu3 }
 0x3dd   : > { %v2231_v30 = vadd.f32 %v2230_v34, %v2118_v53  ;;  %v2124_v53 = vadd.f32 %v5450_v1, %v2011_v14  ;;  %v4014_v1 = vld [vmem:[%s4525_s3 + $0x660] sm:$0xff] }
 0x3de   : > { %v2346_v8 = vpop.f32.mrf.mxu0  ;;  %v2569_v0 = vpop.f32.mrf.mxu2  ;;  %2503 = vmatmul.f32.gmra.mxu1 %v4004_v33  ;;  %v2014_v33 = vadd.f32 %v5455_v40, %v1901_v63  ;;  %v4018_v14 = vld [vmem:[%s4525_s3 + $0x6a0] sm:$0xff]  ;;  %v4019_v63 = vld [vmem:[%s4525_s3 + $0x6b0] sm:$0xff] }
 0x3df   : > { %v2344_v38 = vadd.f32 %v2343_v45, %v2231_v30 }
 0x3e1   : > { %v2457_v41 = vadd.f32 %v2456_v35, %v2344_v38  ;;  %2280 = vmatmul.f32.gmra.mxu3 %v4005_v6  ;;  %2393 = vmatmul.f32.gmra.mxu0 %v4006_v54  ;;  %v6582_v38 = vld [vmem:[#allocation33_spill] sm:$0xff]  ;;  %v6583_v6 = vld [vmem:[#allocation34_spill] sm:$0xff] }
 0x3e2   : > { %v2127_v54 = vadd.f32 %v6583_v6, %v2014_v33  ;;  %v2827_v6 = vld [vmem:[#allocation9 + $0x18] sm:$0xff] }
 0x3e3   : > { %v5827_v7 = vadd.f32 %v2569_v0, %v2457_v41  ;;  %2619 = vmatmul.f32.gmra.mxu2 %v4007_v60  ;;  %v2459_v32 = vpop.f32.mrf.mxu1  ;;  %v2833_v0 = vld [vmem:[#allocation9 + $0x48] sm:$0xff]  ;;  %v1904_v41 = vadd.f32 %v6582_v38, %v5738_v46  ;;  %v4022_v38 = vld [vmem:[%s4525_s3 + $0x6e0] sm:$0xff] }
 0x3e4   : > { %v2233_v24 = vpop.f32.mrf.mxu3  ;;  %2866 = vmatpush.msra.mxu0 %v2833_v0  ;;  %v4016_v60 = vld [vmem:[%s4525_s3 + $0x668] sm:$0xff]  ;;  %v6587_v0 = vld [vmem:[#allocation41_spill] sm:$0xff] }
 0x3e5   : > { %v2234_v45 = vadd.f32 %v2233_v24, %v2121_v52  ;;  %v6584_v24 = vld [vmem:[#allocation36_spill] sm:$0xff] }
 0x3e6   : > { %v2349_v39 = vpop.f32.mrf.mxu0  ;;  %2506 = vmatmul.f32.gmra.mxu1 %v4008_v9  ;;  %v2572_v61 = vpop.f32.mrf.mxu2  ;;  %v4017_v9 = vld [vmem:[%s4525_s3 + $0x698] sm:$0xff] }
 0x3e7   : > { %v2347_v3 = vadd.f32 %v2346_v8, %v2234_v45  ;;  %v4012_v8 = vld [vmem:[%s4525_s3 + $0x628] sm:$0xff]  ;;  %v2017_v45 = vadd.f32 %v6584_v24, %v1904_v41 }
 0x3e8   : > { %v2848_v41 = vld [vmem:[#allocation9 + $0xc0] sm:$0xff] }
 0x3e9   : > { %v2460_v12 = vadd.f32 %v2459_v32, %v2347_v3  ;;  %2283 = vmatmul.f32.gmra.mxu3 %v4009_v43  ;;  %2396 = vmatmul.f32.gmra.mxu0 %v4010_v59  ;;  %v2832_v32 = vld [vmem:[#allocation9 + $0x40] sm:$0xff]  ;;  %v6586_v59 = vld [vmem:[#allocation40_spill] sm:$0xff] }
 0x3ea   : > { %2867 = vmatpush.msra.mxu0 %v2832_v32  ;;  %v915_v3 = vld [vmem:[#allocation6 + $0x708] sm:$0xff]  ;;  %v2130_v15 = vadd.f32 %v6586_v59, %v2017_v45  ;;  %2980 = vmatpush.msra.mxu1 %v2848_v41 }
 0x3eb   : > { %v5837_v49 = vadd.f32 %v2572_v61, %v2460_v12  ;;  %2622 = vmatmul.f32.gmra.mxu2 %v4011_v25  ;;  %v2831_v61 = vld [vmem:[#allocation9 + $0x38] sm:$0xff]  ;;  %2662 = vmatpush.msra.mxu3 %v915_v3  ;;  %v6585_v12 = vld [vmem:[#allocation39_spill] sm:$0xff]  ;;  %v2825_v45 = vld [vmem:[#allocation9 + $0x8] sm:$0xff] }
 0x3ec   : > { %v2236_v34 = vpop.f32.mrf.mxu3  ;;  %2868 = vmatpush.msra.mxu0 %v2831_v61  ;;  %v1907_v43 = vadd.f32 %v6585_v12, %v5738_v46  ;;  %v2824_v3 = vld [vmem:[#allocation9] sm:$0xff]  ;;  %v4025_v61 = vld [vmem:[%s4525_s3 + $0x718] sm:$0xff] }
 0x3ed   : > { %v2237_v35 = vadd.f32 %v2236_v34, %v2124_v53  ;;  %v2830_v53 = vld [vmem:[#allocation9 + $0x30] sm:$0xff]  ;;  %v4026_v12 = vld [vmem:[%s4525_s3 + $0x720] sm:$0xff]  ;;  %v4032_v41 = vld [vmem:[%s4525_s3 + $0x768] sm:$0xff] }
 0x3ee   : > { %v2352_v30 = vpop.f32.mrf.mxu0  ;;  %2509 = vmatmul.f32.gmra.mxu1 %v4012_v8  ;;  %2869 = vmatpush.msra.mxu0 %v2830_v53  ;;  %v4020_v8 = vld [vmem:[%s4525_s3 + $0x6a8] sm:$0xff]  ;;  %v2020_v33 = vadd.f32 %v6587_v0, %v1907_v43  ;;  %v1913_v43 = vadd.f32 %v5499_v20, %v5738_v46  ;;  %v2847_v20 = vld [vmem:[#allocation9 + $0xb8] sm:$0xff] }
 0x3ef   : > { %v5842_v31 = vadd.f32 %v2349_v39, %v2237_v35  ;;  %v2829_v35 = vld [vmem:[#allocation9 + $0x28] sm:$0xff]  ;;  %2981 = vmatpush.msra.mxu1 %v2847_v20 }
 0x3f0   : > { %2870 = vmatpush.msra.mxu0 %v2829_v35  ;;  %v6593_v20 = vld [vmem:[#allocation32_spill] sm:$0xff] }
 0x3f1   : > { %2286 = vmatmul.f32.gmra.mxu3 %v4013_v50  ;;  %2399 = vmatmul.f32.gmra.mxu0 %v4014_v1  ;;  %v2828_v1 = vld [vmem:[#allocation9 + $0x20] sm:$0xff] }
 0x3f2   : > { %2871 = vmatpush.msra.mxu0 %v2828_v1 }
 0x3f3   : > { %2625 = vmatmul.f32.gmra.mxu2 %v4015_v2  ;;  %v6588_v2 = vld [vmem:[#allocation44_spill] sm:$0xff] }
 0x3f4   : > { %v2239_v40 = vpop.f32.mrf.mxu3  ;;  %2872 = vmatpush.msra.mxu0 %v2827_v6 }
 0x3f5   : > { %v2240_v47 = vadd.f32 %v2239_v40, %v2127_v54  ;;  %v1910_v54 = vadd.f32 %v5486_v10, %v5738_v46  ;;  %v2133_v40 = vadd.f32 %v6588_v2, %v2020_v33  ;;  %v4031_v33 = vld [vmem:[%s4525_s3 + $0x770] sm:$0xff] }
 0x3f6   : > { %v2355_v52 = vpop.f32.mrf.mxu0  ;;  %2512 = vmatmul.f32.gmra.mxu1 %v4016_v60  ;;  %v6589_v2 = vld [vmem:[#allocation49_spill] sm:$0xff] }
 0x3f7   : > { %v5852_v39 = vadd.f32 %v2352_v30, %v2240_v47  ;;  %v4023_v47 = vld [vmem:[%s4525_s3 + $0x6f0] sm:$0xff] }
 0x3f9   : > { %2289 = vmatmul.f32.gmra.mxu3 %v4017_v9  ;;  %2402 = vmatmul.f32.gmra.mxu0 %v4018_v14  ;;  %v4024_v9 = vld [vmem:[%s4525_s3 + $0x6e8] sm:$0xff]  ;;  %v2023_v14 = vadd.f32 %v5494_v48, %v1910_v54 }
 0x3fb   : > { %2628 = vmatmul.f32.gmra.mxu2 %v4019_v63  ;;  %v2136_v59 = vadd.f32 %v5502_v37, %v2023_v14  ;;  %v1916_v37 = vadd.f32 %v5512_v44, %v5738_v46  ;;  %v4033_v44 = vld [vmem:[%s4525_s3 + $0x798] sm:$0xff] }
 0x3fc   : > { %v2242_v25 = vpop.f32.mrf.mxu3 }
 0x3fd   : > { %v2243_v34 = vadd.f32 %v2242_v25, %v2130_v15  ;;  %v4027_v15 = vld [vmem:[%s4525_s3 + $0x730] sm:$0xff]  ;;  %v4028_v25 = vld [vmem:[%s4525_s3 + $0x728] sm:$0xff]  ;;  %v2029_v6 = vadd.f32 %v5520_v51, %v1916_v37 }
 0x3fe   : > { %v2358_v30 = vpop.f32.mrf.mxu0  ;;  %2515 = vmatmul.f32.gmra.mxu1 %v4020_v8  ;;  %v4030_v8 = vld [vmem:[%s4525_s3 + $0x760] sm:$0xff]  ;;  %v4036_v51 = vld [vmem:[%s4525_s3 + $0x7a8] sm:$0xff] }
 0x3ff   : > { %v5862_v50 = vadd.f32 %v2355_v52, %v2243_v34  ;;  %v2826_v52 = vld [vmem:[#allocation9 + $0x10] sm:$0xff]  ;;  %v2026_v34 = vadd.f32 %v5507_v56, %v1913_v43  ;;  %v1922_v43 = vadd.f32 %v5538_v16, %v5738_v46 }
 0x400   : > { %2873 = vmatpush.msra.mxu0 %v2826_v52  ;;  %v3133_v56 = vld [vmem:[%s6422_s5 + $0x78] sm:$0xff] }
 0x401   : > { %2292 = vmatmul.f32.gmra.mxu3 %v4021_v23  ;;  %2405 = vmatmul.f32.gmra.mxu0 %v4022_v38  ;;  %v2139_v0 = vadd.f32 %v5515_v36, %v2026_v34  ;;  %v4034_v36 = vld [vmem:[%s4525_s3 + $0x7a0] sm:$0xff]  ;;  %v4040_v34 = vld [vmem:[%s4525_s3 + $0x7e8] sm:$0xff]  ;;  %v2035_v37 = vadd.f32 %v6593_v20, %v1922_v43 }
 0x402   : > { %2874 = vmatpush.msra.mxu0 %v2825_v45  ;;  %3138 = vmatpush.msra.mxu2 %v3133_v56  ;;  %v6594_v56 = vld [vmem:[#allocation38_spill] sm:$0xff] }
 0x403   : > { %2631 = vmatmul.f32.gmra.mxu2 %v4023_v47  ;;  %v6590_v47 = vld [vmem:[#allocation51_spill] sm:$0xff] }
 0x404   : > { %v2245_v60 = vpop.f32.mrf.mxu3  ;;  %2875 = vmatpush.msra.mxu0 %v2824_v3  ;;  %v2142_v52 = vadd.f32 %v6590_v47, %v2029_v6  ;;  %v4037_v3 = vld [vmem:[%s4525_s3 + $0x7d8] sm:$0xff] }
 0x405   : > { %v2246_v24 = vadd.f32 %v2245_v60, %v2133_v40  ;;  %v1919_v40 = vadd.f32 %v6589_v2, %v5738_v46  ;;  %v4035_v60 = vld [vmem:[%s4525_s3 + $0x7b0] sm:$0xff]  ;;  %v4042_v47 = vld [vmem:[%s4525_s3 + $0x78] sm:$0xff] }
 0x406   : > { %v2361_v32 = vpop.f32.mrf.mxu0  ;;  %2518 = vmatmul.f32.gmra.mxu1 %v4024_v9  ;;  %v6595_v6 = vld [vmem:[#allocation21_spill] sm:$0xff] }
 0x407   : > { %v5872_v10 = vadd.f32 %v2358_v30, %v2246_v24  ;;  %v4029_v30 = vld [vmem:[%s4525_s3 + $0x758] sm:$0xff]  ;;  %v2032_v9 = vadd.f32 %v5533_v4, %v1919_v40  ;;  %v3132_v4 = vld [vmem:[%s6422_s5 + $0x70] sm:$0xff] }
 0x408   : > { %3139 = vmatpush.msra.mxu2 %v3132_v4 }
 0x409   : > { %2295 = vmatmul.f32.gmra.mxu3 %v4025_v61  ;;  %2408 = vmatmul.f32.gmra.mxu0 %v4026_v12  ;;  %v4038_v61 = vld [vmem:[%s4525_s3 + $0x7e0] sm:$0xff]  ;;  %v2846_v12 = vld [vmem:[#allocation9 + $0xb0] sm:$0xff] }
 0x40a   : > { %2982 = vmatpush.msra.mxu1 %v2846_v12  ;;  %v6599_v12 = vld [vmem:[#allocation52_spill] sm:$0xff] }
 0x40b   : > { %2634 = vmatmul.f32.gmra.mxu2 %v4027_v15 }
 0x40c   : > { %v2248_v63 = vpop.f32.mrf.mxu3 }
 0x40d   : > { %v2249_v48 = vadd.f32 %v2248_v63, %v2136_v59  ;;  %v6591_v59 = vld [vmem:[#allocation29_spill] sm:$0xff] }
 0x40e   : > { %v2364_v53 = vpop.f32.mrf.mxu0  ;;  %2521 = vmatmul.f32.gmra.mxu1 %v4028_v25  ;;  %v2145_v15 = vadd.f32 %v6591_v59, %v2032_v9  ;;  %v4039_v63 = vld [vmem:[%s4525_s3 + $0x7f0] sm:$0xff] }
 0x40f   : > { %v5882_v35 = vadd.f32 %v2361_v32, %v2249_v48 }
 0x411   : > { %2298 = vmatmul.f32.gmra.mxu3 %v4029_v30  ;;  %2411 = vmatmul.f32.gmra.mxu0 %v4030_v8  ;;  %v6592_v30 = vld [vmem:[#allocation20_spill] sm:$0xff] }
 0x412   : > { %v2760_v8 = vmax.f32 %v6592_v30, 0.0 }
 0x413   : > { %2637 = vmatmul.f32.gmra.mxu2 %v4031_v33  ;;  %v1925_v33 = vadd.f32 %v5551_v18, %v5738_v46  ;;  %v1928_v18 = vadd.f32 %v5564_v19, %v5738_v46  ;;  %v1931_v19 = vadd.f32 %v5577_v22, %v5738_v46  ;;  %v1934_v22 = vadd.f32 %v5590_v57, %v5738_v46 }
 0x414   : > { %v2251_v1 = vpop.f32.mrf.mxu3  ;;  %v1937_v57 = vadd.f32 %v5603_v21, %v5738_v46  ;;  %v1940_v21 = vadd.f32 %v5616_v55, %v5738_v46  ;;  %v4047_v55 = vld [vmem:[%s4525_s3 + $0x1b8] sm:$0xff] }
 0x415   : > { %v2252_v23 = vadd.f32 %v2251_v1, %v2139_v0  ;;  %v4041_v0 = vld [vmem:[%s4525_s3 + $0x38] sm:$0xff]  ;;  %v2148_v1 = vadd.f32 %v6594_v56, %v2035_v37  ;;  %v2041_v43 = vadd.f32 %v6599_v12, %v1928_v18  ;;  %v2844_v56 = vld [vmem:[#allocation9 + $0xa0] sm:$0xff] }
 0x416   : > { %v2367_v38 = vpop.f32.mrf.mxu0  ;;  %2524 = vmatmul.f32.gmra.mxu1 %v4032_v41 }
 0x417   : > { %v5895_v54 = vadd.f32 %v2364_v53, %v2252_v23 }
 0x419   : > { %2301 = vmatmul.f32.gmra.mxu3 %v4033_v44  ;;  %2414 = vmatmul.f32.gmra.mxu0 %v4034_v36  ;;  %v2762_v44 = vmax.f32 %v6595_v6, 0.0  ;;  %v6596_v36 = vld [vmem:[#allocation42_spill] sm:$0xff] }
 0x41a   : > { %v2038_v2 = vadd.f32 %v6596_v36, %v1925_v33  ;;  %v4044_v33 = vld [vmem:[%s4525_s3 + $0xf8] sm:$0xff]  ;;  %v6604_v36 = vld [vmem:[#allocation24_spill] sm:$0xff] }
 0x41b   : > { %2640 = vmatmul.f32.gmra.mxu2 %v4035_v60  ;;  %v6597_v60 = vld [vmem:[#allocation50_spill] sm:$0xff] }
 0x41c   : > { %v2254_v24 = vpop.f32.mrf.mxu3 }
 0x41d   : > { %v2255_v45 = vadd.f32 %v2254_v24, %v2142_v52  ;;  %v2845_v52 = vld [vmem:[#allocation9 + $0xa8] sm:$0xff]  ;;  %v2151_v24 = vadd.f32 %v6597_v60, %v2038_v2  ;;  %v2768_v2 = vmax.f32 %v6604_v36, 0.0  ;;  %v4045_v60 = vld [vmem:[%s4525_s3 + $0x138] sm:$0xff] }
 0x41e   : > { %v2370_v32 = vpop.f32.mrf.mxu0  ;;  %2527 = vmatmul.f32.gmra.mxu1 %v4036_v51 }
 0x41f   : > { %v5905_v14 = vadd.f32 %v2367_v38, %v2255_v45  ;;  %2983 = vmatpush.msra.mxu1 %v2845_v52  ;;  %v3131_v45 = vld [vmem:[%s6422_s5 + $0x68] sm:$0xff] }
 0x420   : > { %3140 = vmatpush.msra.mxu2 %v3131_v45 }
 0x421   : > { %2304 = vmatmul.f32.gmra.mxu3 %v4037_v3  ;;  %2417 = vmatmul.f32.gmra.mxu0 %v4038_v61  ;;  %v6598_v3 = vld [vmem:[#allocation22_spill] sm:$0xff] }
 0x422   : > { %v2764_v61 = vmax.f32 %v6598_v3, 0.0  ;;  %2984 = vmatpush.msra.mxu1 %v2844_v56 }
 0x423   : > { %2643 = vmatmul.f32.gmra.mxu2 %v4039_v63  ;;  %v6600_v63 = vld [vmem:[#allocation54_spill] sm:$0xff] }
 0x424   : > { %v2257_v48 = vpop.f32.mrf.mxu3  ;;  %v2154_v4 = vadd.f32 %v6600_v63, %v2041_v43  ;;  %v6608_v43 = vld [vmem:[#allocation61_spill] sm:$0xff] }
 0x425   : > { %v2258_v53 = vadd.f32 %v2257_v48, %v2145_v15  ;;  %v4043_v15 = vld [vmem:[%s4525_s3 + $0xb8] sm:$0xff] }
 0x426   : > { %v2373_v25 = vpop.f32.mrf.mxu0  ;;  %2530 = vmatmul.f32.gmra.mxu1 %v4040_v34  ;;  %v6601_v34 = vld [vmem:[#allocation23_spill] sm:$0xff]  ;;  %v4046_v63 = vld [vmem:[%s4525_s3 + $0x178] sm:$0xff] }
 0x427   : > { %v5919_v16 = vadd.f32 %v2370_v32, %v2258_v53  ;;  %v2766_v30 = vmax.f32 %v6601_v34, 0.0 }
 0x429   : > { %2663 = vmatmul.f32.vlgmr.msra.gmra.mxu3 %v4041_v0  ;;  %2876 = vmatmul.f32.vlgmr.msra.gmra.mxu0 %v2760_v8  ;;  %v6602_v8 = vld [vmem:[#allocation55_spill] sm:$0xff]  ;;  %v5948_v0 = vpop.f32.mrf.mxu1 }
 0x42a   : > { %v2044_v20 = vadd.f32 %v6602_v8, %v1931_v19 }
 0x42c   : > { %v2260_v23 = vpop.f32.mrf.mxu3 }
 0x42d   : > { %v2261_v38 = vadd.f32 %v2260_v23, %v2148_v1  ;;  %v6603_v1 = vld [vmem:[#allocation57_spill] sm:$0xff] }
 0x42e   : > { %v2376_v41 = vpop.f32.mrf.mxu0  ;;  %v2157_v23 = vadd.f32 %v6603_v1, %v2044_v20 }
 0x42f   : > { %v5927_v40 = vadd.f32 %v2373_v25, %v2261_v38  ;;  %v3130_v38 = vld [vmem:[%s6422_s5 + $0x60] sm:$0xff] }
 0x430   : > { %3141 = vmatpush.msra.mxu2 %v3130_v38  ;;  %v1943_v38 = vadd.f32 %v5629_v62, %v5738_v46  ;;  %v1946_v62 = vadd.f32 %v5642_v17, %v5738_v46  ;;  %v4049_v17 = vld [vmem:[%s4525_s3 + $0x238] sm:$0xff] }
 0x431   : > { %2666 = vmatmul.f32.gmra.mxu3 %v4042_v47  ;;  %2879 = vmatmul.f32.gmra.mxu0 %v2762_v44  ;;  %v6605_v47 = vld [vmem:[#allocation58_spill] sm:$0xff] }
 0x432   : > { %v2047_v52 = vadd.f32 %v6605_v47, %v1934_v22  ;;  %v6611_v22 = vld [vmem:[#allocation64_spill] sm:$0xff] }
 0x433   : > { %v2053_v1 = vadd.f32 %v6611_v22, %v1940_v21  ;;  %v6613_v47 = vld [vmem:[#allocation28_spill] sm:$0xff] }
 0x434   : > { %v2263_v32 = vpop.f32.mrf.mxu3 }
 0x435   : > { %v2264_v51 = vadd.f32 %v2263_v32, %v2151_v24  ;;  %v6606_v24 = vld [vmem:[#allocation60_spill] sm:$0xff]  ;;  %v5965_v32 = vpop.f32.mrf.mxu1 }
 0x436   : > { %v2379_v9 = vpop.f32.mrf.mxu0  ;;  %v2160_v45 = vadd.f32 %v6606_v24, %v2047_v52  ;;  %v2774_v52 = vmax.f32 %v6613_v47, 0.0  ;;  %v6621_v47 = vld [vmem:[#allocation75_spill] sm:$0xff] }
 0x437   : > { %v5938_v59 = vadd.f32 %v2376_v41, %v2264_v51 }
 0x439   : > { %2669 = vmatmul.f32.gmra.mxu3 %v4043_v15  ;;  %2882 = vmatmul.f32.gmra.mxu0 %v2764_v61  ;;  %v6607_v61 = vld [vmem:[#allocation25_spill] sm:$0xff]  ;;  %v2050_v15 = vadd.f32 %v6608_v43, %v1937_v57 }
 0x43a   : > { %v2770_v12 = vmax.f32 %v6607_v61, 0.0 }
 0x43c   : > { %v2266_v48 = vpop.f32.mrf.mxu3 }
 0x43d   : > { %v2267_v53 = vadd.f32 %v2266_v48, %v2154_v4  ;;  %v2843_v4 = vld [vmem:[#allocation9 + $0x98] sm:$0xff]  ;;  %v6609_v48 = vld [vmem:[#allocation63_spill] sm:$0xff] }
 0x43e   : > { %v2382_v25 = vpop.f32.mrf.mxu0  ;;  %2985 = vmatpush.msra.mxu1 %v2843_v4  ;;  %v6616_v4 = vld [vmem:[#allocation30_spill] sm:$0xff] }
 0x43f   : > { %v5946_v37 = vadd.f32 %v2379_v9, %v2267_v53  ;;  %v2163_v53 = vadd.f32 %v6609_v48, %v2050_v15  ;;  %v2776_v21 = vmax.f32 %v6616_v4, 0.0  ;;  %v6617_v48 = vld [vmem:[#allocation70_spill] sm:$0xff] }
 0x441   : > { %2672 = vmatmul.f32.gmra.mxu3 %v4044_v33  ;;  %2885 = vmatmul.f32.gmra.mxu0 %v2766_v30  ;;  %v5978_v30 = vpop.f32.mrf.mxu1  ;;  %v6610_v33 = vld [vmem:[#allocation27_spill] sm:$0xff] }
 0x442   : > { %v2772_v56 = vmax.f32 %v6610_v33, 0.0 }
 0x444   : > { %v2269_v41 = vpop.f32.mrf.mxu3 }
 0x445   : > { %v2270_v6 = vadd.f32 %v2269_v41, %v2157_v23  ;;  %v6612_v41 = vld [vmem:[#allocation66_spill] sm:$0xff] }
 0x446   : > { %v2385_v44 = vpop.f32.mrf.mxu0 }
 0x447   : > { %v5959_v18 = vadd.f32 %v2382_v25, %v2270_v6  ;;  %v3129_v25 = vld [vmem:[%s6422_s5 + $0x58] sm:$0xff]  ;;  %v2166_v6 = vadd.f32 %v6612_v41, %v2053_v1 }
 0x448   : > { %3142 = vmatpush.msra.mxu2 %v3129_v25  ;;  %v6620_v41 = vld [vmem:[#allocation73_spill] sm:$0xff] }
 0x449   : > { %2675 = vmatmul.f32.gmra.mxu3 %v4045_v60  ;;  %2888 = vmatmul.f32.gmra.mxu0 %v2768_v2  ;;  %v6614_v60 = vld [vmem:[#allocation67_spill] sm:$0xff]  ;;  %v5990_v24 = vpop.f32.mrf.mxu1 }
 0x44a   : > { %v2056_v57 = vadd.f32 %v6614_v60, %v1943_v38 }
 0x44c   : > { %v2272_v51 = vpop.f32.mrf.mxu3 }
 0x44d   : > { %v2273_v9 = vadd.f32 %v2272_v51, %v2160_v45  ;;  %v4048_v51 = vld [vmem:[%s4525_s3 + $0x1f8] sm:$0xff] }
 0x44e   : > { %v2388_v3 = vpop.f32.mrf.mxu0 }
 0x44f   : > { %v5969_v19 = vadd.f32 %v2385_v44, %v2273_v9  ;;  %v2842_v9 = vld [vmem:[#allocation9 + $0x90] sm:$0xff] }
 0x450   : > { %2986 = vmatpush.msra.mxu1 %v2842_v9 }
 0x451   : > { %2678 = vmatmul.f32.gmra.mxu3 %v4046_v63  ;;  %2891 = vmatmul.f32.gmra.mxu0 %v2770_v12  ;;  %v3128_v12 = vld [vmem:[%s6422_s5 + $0x50] sm:$0xff] }
 0x452   : > { %3143 = vmatpush.msra.mxu2 %v3128_v12  ;;  %v6623_v12 = vld [vmem:[#allocation76_spill] sm:$0xff] }
 0x454   : > { %v2275_v34 = vpop.f32.mrf.mxu3 }
 0x455   : > { %v2276_v8 = vadd.f32 %v2275_v34, %v2163_v53  ;;  %v2059_v53 = vadd.f32 %v6617_v48, %v1946_v62  ;;  %v6005_v34 = vpop.f32.mrf.mxu1 }
 0x456   : > { %v2391_v20 = vpop.f32.mrf.mxu0 }
 0x457   : > { %v5982_v23 = vadd.f32 %v2388_v3, %v2276_v8  ;;  %v6615_v3 = vld [vmem:[#allocation69_spill] sm:$0xff]  ;;  %v1949_v8 = vadd.f32 %v5655_v11, %v5738_v46  ;;  %v1952_v11 = vadd.f32 %v5668_v27, %v5738_v46 }
 0x458   : > { %v2169_v61 = vadd.f32 %v6615_v3, %v2056_v57  ;;  %v3127_v57 = vld [vmem:[%s6422_s5 + $0x48] sm:$0xff]  ;;  %v6622_v3 = vld [vmem:[#allocation37_spill] sm:$0xff] }
 0x459   : > { %2681 = vmatmul.f32.gmra.mxu3 %v4047_v55  ;;  %2894 = vmatmul.f32.gmra.mxu0 %v2772_v56  ;;  %v6619_v55 = vld [vmem:[#allocation31_spill] sm:$0xff]  ;;  %v4051_v27 = vld [vmem:[%s4525_s3 + $0x2b8] sm:$0xff] }
 0x45a   : > { %v2778_v38 = vmax.f32 %v6619_v55, 0.0  ;;  %3144 = vmatpush.msra.mxu2 %v3127_v57 }
 0x45c   : > { %v2278_v44 = vpop.f32.mrf.mxu3 }
 0x45d   : > { %v2279_v36 = vadd.f32 %v2278_v44, %v2166_v6  ;;  %v2062_v6 = vadd.f32 %v6620_v41, %v1949_v8  ;;  %v6019_v60 = vpop.f32.mrf.mxu1  ;;  %v6627_v41 = vld [vmem:[#allocation81_spill] sm:$0xff] }
 0x45e   : > { %v2394_v2 = vpop.f32.mrf.mxu0 }
 0x45f   : > { %v5992_v45 = vadd.f32 %v2391_v20, %v2279_v36  ;;  %v6618_v20 = vld [vmem:[#allocation72_spill] sm:$0xff]  ;;  %v4050_v36 = vld [vmem:[%s4525_s3 + $0x278] sm:$0xff] }
 0x460   : > { %v2172_v33 = vadd.f32 %v6618_v20, %v2059_v53 }
 0x461   : > { %2684 = vmatmul.f32.gmra.mxu3 %v4048_v51  ;;  %2897 = vmatmul.f32.gmra.mxu0 %v2774_v52  ;;  %v2175_v52 = vadd.f32 %v6621_v47, %v2062_v6  ;;  %v1958_v6 = vadd.f32 %v6627_v41, %v5738_v46  ;;  %v3125_v41 = vld [vmem:[%s6422_s5 + $0x38] sm:$0xff] }
 0x464   : > { %v2281_v43 = vpop.f32.mrf.mxu3 }
 0x465   : > { %v2282_v15 = vadd.f32 %v2281_v43, %v2169_v61  ;;  %v2780_v61 = vmax.f32 %v6622_v3, 0.0  ;;  %v2065_v43 = vadd.f32 %v6623_v12, %v1952_v11  ;;  %v3126_v11 = vld [vmem:[%s6422_s5 + $0x40] sm:$0xff]  ;;  %v4053_v12 = vld [vmem:[%s4525_s3 + $0x338] sm:$0xff] }
 0x466   : > { %v2397_v63 = vpop.f32.mrf.mxu0  ;;  %3145 = vmatpush.msra.mxu2 %v3126_v11 }
 0x467   : > { %v6003_v25 = vadd.f32 %v2394_v2, %v2282_v15  ;;  %v2841_v2 = vld [vmem:[#allocation9 + $0x88] sm:$0xff] }
 0x468   : > { %2987 = vmatpush.msra.mxu1 %v2841_v2  ;;  %3146 = vmatpush.msra.mxu2 %v3125_v41 }
 0x469   : > { %2687 = vmatmul.f32.gmra.mxu3 %v4049_v17  ;;  %2900 = vmatmul.f32.gmra.mxu0 %v2776_v21  ;;  %v6625_v21 = vld [vmem:[#allocation79_spill] sm:$0xff]  ;;  %v6032_v17 = vpop.f32.mrf.mxu1 }
 0x46a   : > { %v2178_v48 = vadd.f32 %v6625_v21, %v2065_v43  ;;  %v6631_v43 = vld [vmem:[#allocation85_spill] sm:$0xff] }
 0x46c   : > { %v2284_v56 = vpop.f32.mrf.mxu3 }
 0x46d   : > { %v2285_v22 = vadd.f32 %v2284_v56, %v2172_v33  ;;  %v6626_v33 = vld [vmem:[#allocation43_spill] sm:$0xff] }
 0x46e   : > { %v2400_v1 = vpop.f32.mrf.mxu0  ;;  %v2782_v56 = vmax.f32 %v6626_v33, 0.0  ;;  %v6634_v33 = vld [vmem:[#allocation87_spill] sm:$0xff] }
 0x46f   : > { %v6013_v44 = vadd.f32 %v2397_v63, %v2285_v22  ;;  %v6624_v63 = vld [vmem:[#allocation78_spill] sm:$0xff] }
 0x470   : > { %v1955_v4 = vadd.f32 %v6624_v63, %v5738_v46  ;;  %v6632_v63 = vld [vmem:[#allocation86_spill] sm:$0xff] }
 0x471   : > { %2690 = vmatmul.f32.gmra.mxu3 %v4050_v36  ;;  %2903 = vmatmul.f32.gmra.mxu0 %v2778_v38  ;;  %v2840_v38 = vld [vmem:[#allocation9 + $0x80] sm:$0xff]  ;;  %v6628_v36 = vld [vmem:[#allocation82_spill] sm:$0xff] }
 0x472   : > { %v2068_v22 = vadd.f32 %v5689_v28, %v1955_v4  ;;  %2988 = vmatpush.msra.mxu1 %v2840_v38 }
 0x474   : > { %v2287_v51 = vpop.f32.mrf.mxu3  ;;  %v2181_v2 = vadd.f32 %v6628_v36, %v2068_v22 }
 0x475   : > { %v2288_v9 = vadd.f32 %v2287_v51, %v2175_v52  ;;  %v6629_v52 = vld [vmem:[#allocation45_spill] sm:$0xff]  ;;  %v6630_v51 = vld [vmem:[#allocation83_spill] sm:$0xff] }
 0x476   : > { %v2403_v62 = vpop.f32.mrf.mxu0  ;;  %v2784_v57 = vmax.f32 %v6629_v52, 0.0  ;;  %v6637_v52 = vld [vmem:[#allocation48_spill] sm:$0xff] }
 0x477   : > { %v6026_v15 = vadd.f32 %v2400_v1, %v2288_v9  ;;  %v4052_v1 = vld [vmem:[%s4525_s3 + $0x2f8] sm:$0xff]  ;;  %v2071_v9 = vadd.f32 %v6630_v51, %v1958_v6  ;;  %v6638_v51 = vld [vmem:[#allocation91_spill] sm:$0xff] }
 0x478   : > { %v6635_v6 = vld [vmem:[#allocation89_spill] sm:$0xff] }
 0x479   : > { %2693 = vmatmul.f32.gmra.mxu3 %v4051_v27  ;;  %2906 = vmatmul.f32.gmra.mxu0 %v2780_v61  ;;  %v1961_v27 = vadd.f32 %v6631_v43, %v5738_v46  ;;  %v2184_v4 = vadd.f32 %v6632_v63, %v2071_v9  ;;  %v1964_v36 = vadd.f32 %v6635_v6, %v5738_v46  ;;  %v6639_v43 = vld [vmem:[#allocation93_spill] sm:$0xff]  ;;  %v6640_v63 = vld [vmem:[#allocation94_spill] sm:$0xff] }
 0x47a   : > { %v4056_v6 = vld [vmem:[%s4525_s3 + $0x3f8] sm:$0xff] }
 0x47b   : > { %v2077_v9 = vadd.f32 %v6638_v51, %v1964_v36  ;;  %v6643_v36 = vld [vmem:[#allocation97_spill] sm:$0xff] }
 0x47c   : > { %v2290_v53 = vpop.f32.mrf.mxu3 }
 0x47d   : > { %v2291_v8 = vadd.f32 %v2290_v53, %v2178_v48  ;;  %v6633_v53 = vld [vmem:[#allocation47_spill] sm:$0xff] }
 0x47e   : > { %v2406_v20 = vpop.f32.mrf.mxu0 }
 0x47f   : > { %v6036_v55 = vadd.f32 %v2403_v62, %v2291_v8  ;;  %v6047_v62 = vpop.f32.mrf.mxu1  ;;  %v2786_v8 = vmax.f32 %v6633_v53, 0.0 }
 0x481   : > { %2696 = vmatmul.f32.gmra.mxu3 %v4052_v1  ;;  %2909 = vmatmul.f32.gmra.mxu0 %v2782_v56  ;;  %v2074_v56 = vadd.f32 %v6634_v33, %v1961_v27  ;;  %v4054_v1 = vld [vmem:[%s4525_s3 + $0x378] sm:$0xff]  ;;  %v1967_v27 = vadd.f32 %v6639_v43, %v5738_v46  ;;  %v3124_v46 = vld [vmem:[%s6422_s5 + $0x30] sm:$0xff] }
 0x482   : > { %v6641_v33 = vld [vmem:[#allocation26_spill] sm:$0xff]  ;;  %3147 = vmatpush.msra.mxu2 %v3124_v46  ;;  %v6103_v46 = vpop.f32.mrf.mxu2 }
 0x484   : > { %v2293_v47 = vpop.f32.mrf.mxu3 }
 0x485   : > { %v2294_v28 = vadd.f32 %v2293_v47, %v2181_v2  ;;  %v6636_v2 = vld [vmem:[#allocation90_spill] sm:$0xff] }
 0x486   : > { %v2409_v61 = vpop.f32.mrf.mxu0  ;;  %v2187_v11 = vadd.f32 %v6636_v2, %v2074_v56  ;;  %v2790_v56 = vmax.f32 %v6641_v33, 0.0  ;;  %v3123_v33 = vld [vmem:[%s6422_s5 + $0x28] sm:$0xff] }
 0x487   : > { %v6049_v3 = vadd.f32 %v2406_v20, %v2294_v28  ;;  %v6059_v20 = vpop.f32.mrf.mxu1  ;;  %3148 = vmatpush.msra.mxu2 %v3123_v33  ;;  %v4061_v33 = vld [vmem:[%s4525_s3 + $0x538] sm:$0xff] }
 0x489   : > { %2699 = vmatmul.f32.gmra.mxu3 %v4053_v12  ;;  %2912 = vmatmul.f32.gmra.mxu0 %v2784_v57  ;;  %v2788_v57 = vmax.f32 %v6637_v52, 0.0  ;;  %v4055_v12 = vld [vmem:[%s4525_s3 + $0x3b8] sm:$0xff] }
 0x48c   : > { %v2296_v21 = vpop.f32.mrf.mxu3 }
 0x48d   : > { %v2297_v48 = vadd.f32 %v2296_v21, %v2184_v4  ;;  %v2190_v4 = vadd.f32 %v6640_v63, %v2077_v9  ;;  %v6645_v63 = vld [vmem:[#allocation46_spill] sm:$0xff] }
 0x48e   : > { %v2412_v38 = vpop.f32.mrf.mxu0 }
 0x48f   : > { %v6057_v22 = vadd.f32 %v2409_v61, %v2297_v48  ;;  %v6076_v21 = vpop.f32.mrf.mxu1 }
 0x491   : > { %2702 = vmatmul.f32.gmra.mxu3 %v4054_v1  ;;  %2915 = vmatmul.f32.gmra.mxu0 %v2786_v8  ;;  %v6642_v1 = vld [vmem:[#allocation95_spill] sm:$0xff] }
 0x492   : > { %v2080_v41 = vadd.f32 %v6642_v1, %v1967_v27 }
 0x494   : > { %v2299_v47 = vpop.f32.mrf.mxu3  ;;  %v2193_v2 = vadd.f32 %v6643_v36, %v2080_v41 }
 0x495   : > { %v2300_v28 = vadd.f32 %v2299_v47, %v2187_v11 }
 0x496   : > { %v2415_v48 = vpop.f32.mrf.mxu0 }
 0x497   : > { %v6070_v61 = vadd.f32 %v2412_v38, %v2300_v28  ;;  %v6087_v47 = vpop.f32.mrf.mxu1 }
 0x499   : > { %2705 = vmatmul.f32.gmra.mxu3 %v4055_v12  ;;  %2918 = vmatmul.f32.gmra.mxu0 %v2788_v57  ;;  %v6644_v57 = vld [vmem:[#allocation35_spill] sm:$0xff]  ;;  %v4057_v12 = vld [vmem:[%s4525_s3 + $0x438] sm:$0xff] }
 0x49a   : > { %v2792_v51 = vmax.f32 %v6644_v57, 0.0 }
 0x49c   : > { %v2302_v53 = vpop.f32.mrf.mxu3 }
 0x49d   : > { %v2303_v8 = vadd.f32 %v2302_v53, %v2190_v4  ;;  %v2794_v4 = vmax.f32 %v6645_v63, 0.0 }
 0x49e   : > { %v2418_v52 = vpop.f32.mrf.mxu0 }
 0x49f   : > { %v6080_v38 = vadd.f32 %v2415_v48, %v2303_v8  ;;  %v6095_v48 = vpop.f32.mrf.mxu1  ;;  %v4058_v8 = vld [vmem:[%s4525_s3 + $0x478] sm:$0xff] }
 0x4a1   : > { %2708 = vmatmul.f32.gmra.mxu3 %v4056_v6  ;;  %2921 = vmatmul.f32.gmra.mxu0 %v2790_v56 }
 0x4a4   : > { %v2305_v11 = vpop.f32.mrf.mxu3 }
 0x4a5   : > { %v2306_v28 = vadd.f32 %v2305_v11, %v2193_v2  ;;  %v4059_v2 = vld [vmem:[%s4525_s3 + $0x4b8] sm:$0xff] }
 0x4a7   : > { %v6090_v9 = vadd.f32 %v2418_v52, %v2306_v28  ;;  %v6105_v36 = vpop.f32.mrf.mxu1  ;;  %v6647_v52 = vld [vmem:[#allocation56_spill] sm:$0xff] }
 0x4a8   : > { %v2798_v57 = vmax.f32 %v6647_v52, 0.0 }
 0x4a9   : > { %2711 = vmatmul.f32.gmra.mxu3 %v4057_v12  ;;  %2924 = vmatmul.f32.gmra.mxu0 %v2792_v51  ;;  %v4060_v12 = vld [vmem:[%s4525_s3 + $0x4f8] sm:$0xff] }
 0x4ac   : > { %v2664_v43 = vpop.f32.mrf.mxu3 }
 0x4ad   : > { %v2665_v27 = vadd.f32 %v2664_v43, %v5767_v29  ;;  %v6646_v29 = vld [vmem:[#allocation53_spill] sm:$0xff]  ;;  %v6114_v43 = vpop.f32.mrf.mxu2 }
 0x4ae   : > { %v2796_v41 = vmax.f32 %v6646_v29, 0.0 }
 0x4af   : > { %v2761_v53 = vmax.f32 %v2665_v27, 0.0  ;;  %v6116_v27 = vpop.f32.mrf.mxu1 }
 0x4b1   : > { %2714 = vmatmul.f32.gmra.mxu3 %v4058_v8  ;;  %2927 = vmatmul.f32.gmra.mxu0 %v2794_v4  ;;  %v6648_v4 = vld [vmem:[#allocation59_spill] sm:$0xff] }
 0x4b2   : > { %2989 = vmatmul.f32.vlgmr.msra.gmra.mxu1 %v2761_v53  ;;  %v2800_v53 = vmax.f32 %v6648_v4, 0.0  ;;  %v6138_v4 = vpop.f32.mrf.mxu0 }
 0x4b4   : > { %v2667_v56 = vpop.f32.mrf.mxu3 }
 0x4b5   : > { %v2668_v1 = vadd.f32 %v2667_v56, %v5777_v13  ;;  %v3122_v13 = vld [vmem:[%s6422_s5 + $0x20] sm:$0xff] }
 0x4b6   : > { %3149 = vmatpush.msra.mxu2 %v3122_v13 }
 0x4b7   : > { %v2763_v6 = vmax.f32 %v2668_v1, 0.0  ;;  %v6121_v1 = vpop.f32.mrf.mxu2  ;;  %v6123_v29 = vpop.f32.mrf.mxu1 }
 0x4b9   : > { %2717 = vmatmul.f32.gmra.mxu3 %v4059_v2  ;;  %2930 = vmatmul.f32.gmra.mxu0 %v2796_v41 }
 0x4ba   : > { %2992 = vmatmul.f32.gmra.mxu1 %v2763_v6  ;;  %v6649_v6 = vld [vmem:[#allocation62_spill] sm:$0xff] }
 0x4bb   : > { %v2802_v2 = vmax.f32 %v6649_v6, 0.0 }
 0x4bc   : > { %v2670_v11 = vpop.f32.mrf.mxu3 }
 0x4bd   : > { %v2671_v28 = vadd.f32 %v2670_v11, %v5787_v58 }
 0x4bf   : > { %v2765_v51 = vmax.f32 %v2671_v28, 0.0  ;;  %v4062_v28 = vld [vmem:[%s4525_s3 + $0x578] sm:$0xff]  ;;  %v6133_v13 = vpop.f32.mrf.mxu2 }
 0x4c1   : > { %2720 = vmatmul.f32.gmra.mxu3 %v4060_v12  ;;  %2933 = vmatmul.f32.gmra.mxu0 %v2798_v57 }
 0x4c2   : > { %2995 = vmatmul.f32.gmra.mxu1 %v2765_v51  ;;  %v6650_v51 = vld [vmem:[#allocation65_spill] sm:$0xff] }
 0x4c3   : > { %v2804_v12 = vmax.f32 %v6650_v51, 0.0  ;;  %v2463_v51 = vadd.f32 %v5948_v0, %v5842_v31  ;;  %v4066_v0 = vld [vmem:[%s4525_s3 + $0x678] sm:$0xff] }
 0x4c4   : > { %v2673_v63 = vpop.f32.mrf.mxu3 }
 0x4c5   : > { %v2674_v58 = vadd.f32 %v2673_v63, %v5797_v5  ;;  %v3121_v5 = vld [vmem:[%s6422_s5 + $0x18] sm:$0xff] }
 0x4c6   : > { %3150 = vmatpush.msra.mxu2 %v3121_v5  ;;  %v6150_v5 = vpop.f32.mrf.mxu0 }
 0x4c7   : > { %v2767_v8 = vmax.f32 %v2674_v58, 0.0  ;;  %v4063_v58 = vld [vmem:[%s4525_s3 + $0x5b8] sm:$0xff] }
 0x4c9   : > { %2723 = vmatmul.f32.gmra.mxu3 %v4061_v33  ;;  %2936 = vmatmul.f32.gmra.mxu0 %v2800_v53  ;;  %v6651_v33 = vld [vmem:[#allocation68_spill] sm:$0xff] }
 0x4ca   : > { %2998 = vmatmul.f32.gmra.mxu1 %v2767_v8 }
 0x4cc   : > { %v2676_v56 = vpop.f32.mrf.mxu3 }
 0x4cd   : > { %v2677_v41 = vadd.f32 %v2676_v56, %v5807_v42  ;;  %v6135_v42 = vpop.f32.mrf.mxu1  ;;  %v2806_v56 = vmax.f32 %v6651_v33, 0.0 }
 0x4cf   : > { %v2769_v11 = vmax.f32 %v2677_v41, 0.0  ;;  %v6142_v41 = vpop.f32.mrf.mxu2 }
 0x4d1   : > { %2726 = vmatmul.f32.gmra.mxu3 %v4062_v28  ;;  %2939 = vmatmul.f32.gmra.mxu0 %v2802_v2  ;;  %v4064_v2 = vld [vmem:[%s4525_s3 + $0x5f8] sm:$0xff] }
 0x4d2   : > { %3001 = vmatmul.f32.gmra.mxu1 %v2769_v11  ;;  %v3120_v11 = vld [vmem:[%s6422_s5 + $0x10] sm:$0xff] }
 0x4d3   : > { %3151 = vmatpush.msra.mxu2 %v3120_v11  ;;  %v6165_v11 = vpop.f32.mrf.mxu0 }
 0x4d4   : > { %v2679_v52 = vpop.f32.mrf.mxu3 }
 0x4d5   : > { %v2680_v57 = vadd.f32 %v2679_v52, %v5817_v26  ;;  %v6144_v6 = vpop.f32.mrf.mxu1  ;;  %v6652_v52 = vld [vmem:[#allocation71_spill] sm:$0xff] }
 0x4d7   : > { %v2771_v63 = vmax.f32 %v2680_v57, 0.0  ;;  %v2808_v57 = vmax.f32 %v6652_v52, 0.0 }
 0x4d9   : > { %2729 = vmatmul.f32.gmra.mxu3 %v4063_v58  ;;  %2942 = vmatmul.f32.gmra.mxu0 %v2804_v12  ;;  %v2576_v58 = vadd.f32 %v6103_v46, %v2463_v51  ;;  %v3119_v46 = vld [vmem:[%s6422_s5 + $0x8] sm:$0xff] }
 0x4da   : > { %3004 = vmatmul.f32.gmra.mxu1 %v2771_v63  ;;  %v4065_v63 = vld [vmem:[%s4525_s3 + $0x638] sm:$0xff]  ;;  %3152 = vmatpush.msra.mxu2 %v3119_v46 }
 0x4dc   : > { %v2682_v53 = vpop.f32.mrf.mxu3 }
 0x4dd   : > { %v2683_v8 = vadd.f32 %v2682_v53, %v5827_v7  ;;  %v6158_v53 = vpop.f32.mrf.mxu2 }
 0x4df   : > { %v2773_v26 = vmax.f32 %v2683_v8, 0.0  ;;  %v6160_v8 = vpop.f32.mrf.mxu1 }
 0x4e1   : > { %2732 = vmatmul.f32.gmra.mxu3 %v4064_v2  ;;  %2945 = vmatmul.f32.gmra.mxu0 %v2806_v56  ;;  %v2466_v2 = vadd.f32 %v5965_v32, %v5852_v39  ;;  %v6654_v32 = vld [vmem:[#allocation77_spill] sm:$0xff] }
 0x4e2   : > { %3007 = vmatmul.f32.gmra.mxu1 %v2773_v26  ;;  %v2812_v51 = vmax.f32 %v6654_v32, 0.0 }
 0x4e4   : > { %v2685_v28 = vpop.f32.mrf.mxu3 }
 0x4e5   : > { %v2686_v7 = vadd.f32 %v2685_v28, %v5837_v49  ;;  %v6653_v49 = vld [vmem:[#allocation74_spill] sm:$0xff]  ;;  %v2579_v28 = vadd.f32 %v6114_v43, %v2466_v2  ;;  %v2593_v52 = vpop.f32.mrf.mxu2 }
 0x4e6   : > { %v2810_v26 = vmax.f32 %v6653_v49, 0.0 }
 0x4e7   : > { %v2775_v12 = vmax.f32 %v2686_v7, 0.0 }
 0x4e9   : > { %2735 = vmatmul.f32.gmra.mxu3 %v4065_v63  ;;  %2948 = vmatmul.f32.gmra.mxu0 %v2808_v57  ;;  %v6172_v57 = vpop.f32.mrf.mxu1 }
 0x4ea   : > { %3010 = vmatmul.f32.gmra.mxu1 %v2775_v12  ;;  %v2469_v12 = vadd.f32 %v5978_v30, %v5862_v50  ;;  %v4068_v30 = vld [vmem:[%s4525_s3 + $0x6f8] sm:$0xff] }
 0x4ec   : > { %v2688_v33 = vpop.f32.mrf.mxu3  ;;  %v2582_v43 = vadd.f32 %v6121_v1, %v2469_v12  ;;  %v3118_v1 = vld [vmem:[%s6422_s5] sm:$0xff] }
 0x4ed   : > { %v2689_v56 = vadd.f32 %v2688_v33, %v2576_v58  ;;  %v6177_v58 = vpop.f32.mrf.mxu0  ;;  %v4067_v33 = vld [vmem:[%s4525_s3 + $0x6b8] sm:$0xff]  ;;  %3153 = vmatpush.msra.mxu2 %v3118_v1 }
 0x4ef   : > { %v2777_v31 = vmax.f32 %v2689_v56, 0.0 }
 0x4f1   : > { %2738 = vmatmul.f32.gmra.mxu3 %v4066_v0  ;;  %2951 = vmatmul.f32.gmra.mxu0 %v2810_v26  ;;  %v6655_v26 = vld [vmem:[#allocation80_spill] sm:$0xff]  ;;  %v2596_v0 = vpop.f32.mrf.mxu2  ;;  %v6184_v46 = vpop.f32.mrf.mxu1 }
 0x4f2   : > { %3013 = vmatmul.f32.gmra.mxu1 %v2777_v31  ;;  %v2814_v2 = vmax.f32 %v6655_v26, 0.0  ;;  %v2472_v31 = vadd.f32 %v5990_v24, %v5872_v10  ;;  %v6656_v24 = vld [vmem:[#allocation84_spill] sm:$0xff] }
 0x4f3   : > { %v2816_v32 = vmax.f32 %v6656_v24, 0.0 }
 0x4f4   : > { %v2691_v7 = vpop.f32.mrf.mxu3 }
 0x4f5   : > { %v2692_v39 = vadd.f32 %v2691_v7, %v2579_v28  ;;  %v2585_v28 = vadd.f32 %v6133_v13, %v2472_v31  ;;  %v6191_v7 = vpop.f32.mrf.mxu0 }
 0x4f7   : > { %v2779_v63 = vmax.f32 %v2692_v39, 0.0 }
 0x4f9   : > { %2741 = vmatmul.f32.gmra.mxu3 %v4067_v33  ;;  %2954 = vmatmul.f32.gmra.mxu0 %v2812_v51  ;;  %v2475_v51 = vadd.f32 %v6005_v34, %v5882_v35  ;;  %v6196_v33 = vpop.f32.mrf.mxu1  ;;  %v2478_v35 = vadd.f32 %v6019_v60, %v5895_v54  ;;  %v4071_v60 = vld [vmem:[%s4525_s3 + $0x7b8] sm:$0xff] }
 0x4fa   : > { %3016 = vmatmul.f32.gmra.mxu1 %v2779_v63  ;;  %v2599_v63 = vpop.f32.mrf.mxu2 }
 0x4fb   : > { %v2588_v13 = vadd.f32 %v6142_v41, %v2475_v51 }
 0x4fc   : > { %v2694_v56 = vpop.f32.mrf.mxu3 }
 0x4fd   : > { %v2695_v49 = vadd.f32 %v2694_v56, %v2582_v43  ;;  %v4069_v43 = vld [vmem:[%s4525_s3 + $0x738] sm:$0xff] }
 0x4ff   : > { %v2781_v50 = vmax.f32 %v2695_v49, 0.0  ;;  %v6200_v49 = vpop.f32.mrf.mxu0 }
 0x501   : > { %2744 = vmatmul.f32.gmra.mxu3 %v4068_v30  ;;  %2957 = vmatmul.f32.gmra.mxu0 %v2814_v2  ;;  %v6657_v2 = vld [vmem:[#allocation88_spill] sm:$0xff]  ;;  %v2591_v30 = vadd.f32 %v6158_v53, %v2478_v35  ;;  %v4072_v35 = vld [vmem:[%s4525_s3 + $0x7f8] sm:$0xff] }
 0x502   : > { %3019 = vmatmul.f32.gmra.mxu1 %v2781_v50  ;;  %v2818_v31 = vmax.f32 %v6657_v2, 0.0  ;;  %v4070_v50 = vld [vmem:[%s4525_s3 + $0x778] sm:$0xff]  ;;  %v2602_v1 = vpop.f32.mrf.mxu2 }
 0x504   : > { %v2697_v39 = vpop.f32.mrf.mxu3 }
 0x505   : > { %v2698_v10 = vadd.f32 %v2697_v39, %v2585_v28  ;;  %v6207_v28 = vpop.f32.mrf.mxu1 }
 0x507   : > { %v2783_v12 = vmax.f32 %v2698_v10, 0.0  ;;  %v6658_v10 = vld [vmem:[#allocation92_spill] sm:$0xff]  ;;  %v6212_v51 = vpop.f32.mrf.mxu0 }
 0x508   : > { %v2820_v24 = vmax.f32 %v6658_v10, 0.0 }
 0x509   : > { %2747 = vmatmul.f32.gmra.mxu3 %v4069_v43  ;;  %2960 = vmatmul.f32.gmra.mxu0 %v2816_v32  ;;  %v2481_v32 = vadd.f32 %v6032_v17, %v5905_v14 }
 0x50a   : > { %3022 = vmatmul.f32.gmra.mxu1 %v2783_v12  ;;  %v2605_v43 = vpop.f32.mrf.mxu2 }
 0x50b   : > { %v2594_v12 = vadd.f32 %v2593_v52, %v2481_v32 }
 0x50c   : > { %v2700_v56 = vpop.f32.mrf.mxu3 }
 0x50d   : > { %v2701_v26 = vadd.f32 %v2700_v56, %v2588_v13  ;;  %v6215_v13 = vpop.f32.mrf.mxu1 }
 0x50f   : > { %v2785_v34 = vmax.f32 %v2701_v26, 0.0  ;;  %v6659_v26 = vld [vmem:[#allocation96_spill] sm:$0xff]  ;;  %v6220_v17 = vpop.f32.mrf.mxu0 }
 0x510   : > { %v2822_v2 = vmax.f32 %v6659_v26, 0.0 }
 0x511   : > { %2750 = vmatmul.f32.gmra.mxu3 %v4070_v50  ;;  %2963 = vmatmul.f32.gmra.mxu0 %v2818_v31  ;;  %v2484_v31 = vadd.f32 %v6047_v62, %v5919_v16 }
 0x512   : > { %3025 = vmatmul.f32.gmra.mxu1 %v2785_v34 }
 0x513   : > { %v2597_v34 = vadd.f32 %v2596_v0, %v2484_v31  ;;  %v2490_v0 = vadd.f32 %v6076_v21, %v5938_v59  ;;  %v2493_v31 = vadd.f32 %v6087_v47, %v5946_v37 }
 0x514   : > { %v2703_v41 = vpop.f32.mrf.mxu3 }
 0x515   : > { %v2704_v39 = vadd.f32 %v2703_v41, %v2591_v30  ;;  %v2487_v30 = vadd.f32 %v6059_v20, %v5927_v40  ;;  %v2608_v41 = vpop.f32.mrf.mxu2  ;;  %v2606_v21 = vadd.f32 %v2605_v43, %v2493_v31 }
 0x517   : > { %v2787_v54 = vmax.f32 %v2704_v39, 0.0  ;;  %v6225_v39 = vpop.f32.mrf.mxu1  ;;  %v2600_v16 = vadd.f32 %v2599_v63, %v2487_v30 }
 0x519   : > { %2753 = vmatmul.f32.gmra.mxu3 %v4071_v60  ;;  %2966 = vmatmul.f32.gmra.mxu0 %v2820_v24  ;;  %v6227_v24 = vld [vmem:[#allocation11] ss:$0 sm:$0xff] }
 0x51a   : > { %3028 = vmatmul.f32.gmra.mxu1 %v2787_v54  ;;  %v2878_v54 = vadd.f32 %v6227_v24, %v6138_v4  ;;  %v2881_v63 = vadd.f32 %v6227_v24, %v6150_v5  ;;  %v2884_v30 = vadd.f32 %v6227_v24, %v6165_v11  ;;  %v2496_v5 = vadd.f32 %v6095_v48, %v5959_v18 }
 0x51b   : > { %v2499_v11 = vadd.f32 %v6105_v36, %v5969_v19 }
 0x51c   : > { %v2706_v53 = vpop.f32.mrf.mxu3 }
 0x51d   : > { %v2707_v56 = vadd.f32 %v2706_v53, %v2594_v12  ;;  %v2611_v40 = vpop.f32.mrf.mxu2 }
 0x51f   : > { %v2789_v14 = vmax.f32 %v2707_v56, 0.0  ;;  %v2603_v56 = vadd.f32 %v2602_v1, %v2490_v0  ;;  %v2887_v0 = vadd.f32 %v6227_v24, %v6177_v58  ;;  %v2502_v58 = vadd.f32 %v6116_v27, %v5982_v23 }
 0x521   : > { %2756 = vmatmul.f32.gmra.mxu3 %v4072_v35  ;;  %2969 = vmatmul.f32.gmra.mxu0 %v2822_v2 }
 0x522   : > { %3031 = vmatmul.f32.gmra.mxu1 %v2789_v14 }
 0x524   : > { %v2709_v50 = vpop.f32.mrf.mxu3 }
 0x525   : > { %v2710_v52 = vadd.f32 %v2709_v50, %v2597_v34  ;;  %v2614_v34 = vpop.f32.mrf.mxu2  ;;  %v6237_v50 = vpop.f32.mrf.mxu0 }
 0x527   : > { %v2791_v10 = vmax.f32 %v2710_v52, 0.0 }
 0x52a   : > { %3034 = vmatmul.f32.gmra.mxu1 %v2791_v10 }
 0x52c   : > { %v2712_v62 = vpop.f32.mrf.mxu3 }
 0x52d   : > { %v2713_v32 = vadd.f32 %v2712_v62, %v2600_v16  ;;  %v2609_v62 = vadd.f32 %v2608_v41, %v2496_v5 }
 0x52f   : > { %v2793_v60 = vmax.f32 %v2713_v32, 0.0  ;;  %v2990_v12 = vpop.f32.mrf.mxu1  ;;  %v2617_v32 = vpop.f32.mrf.mxu2 }
 0x530   : > { %v2991_v53 = vadd.f32 %v2990_v12, %v2878_v54 }
 0x532   : > { %v3086_v20 = vmax.f32 %v2991_v53, 0.0  ;;  %3037 = vmatmul.f32.gmra.mxu1 %v2793_v60  ;;  %v6245_v60 = vpop.f32.mrf.mxu0 }
 0x534   : > { %3154 = vmatmul.f32.vlgmr.msra.gmra.mxu2 %v3086_v20  ;;  %v2715_v26 = vpop.f32.mrf.mxu3  ;;  %v2612_v20 = vadd.f32 %v2611_v40, %v2499_v11  ;;  %v2899_v11 = vadd.f32 %v6227_v24, %v6220_v17  ;;  %v2514_v17 = vadd.f32 %v6160_v8, %v6026_v15 }
 0x535   : > { %v2716_v2 = vadd.f32 %v2715_v26, %v2603_v56  ;;  %v2890_v26 = vadd.f32 %v6227_v24, %v6191_v7  ;;  %v2505_v7 = vadd.f32 %v6123_v29, %v5992_v45 }
 0x537   : > { %v2795_v4 = vmax.f32 %v2716_v2, 0.0  ;;  %v2993_v14 = vpop.f32.mrf.mxu1  ;;  %v2620_v2 = vpop.f32.mrf.mxu2  ;;  %v2618_v5 = vadd.f32 %v2617_v32, %v2505_v7 }
 0x538   : > { %v2994_v35 = vadd.f32 %v2993_v14, %v2881_v63  ;;  %v2615_v14 = vadd.f32 %v2614_v34, %v2502_v58 }
 0x53a   : > { %v3087_v59 = vmax.f32 %v2994_v35, 0.0  ;;  %3040 = vmatmul.f32.gmra.mxu1 %v2795_v4  ;;  %v6253_v4 = vpop.f32.mrf.mxu0 }
 0x53c   : > { %3157 = vmatmul.f32.gmra.mxu2 %v3087_v59  ;;  %v2718_v1 = vpop.f32.mrf.mxu3  ;;  %v2893_v59 = vadd.f32 %v6227_v24, %v6200_v49  ;;  %v2508_v49 = vadd.f32 %v6135_v42, %v6003_v25 }
 0x53d   : > { %v2719_v52 = vadd.f32 %v2718_v1, %v2606_v21 }
 0x53f   : > { %v2797_v10 = vmax.f32 %v2719_v52, 0.0  ;;  %v2996_v37 = vpop.f32.mrf.mxu1  ;;  %v2623_v1 = vpop.f32.mrf.mxu2 }
 0x540   : > { %v2997_v47 = vadd.f32 %v2996_v37, %v2884_v30  ;;  %v2896_v37 = vadd.f32 %v6227_v24, %v6212_v51  ;;  %v2511_v51 = vadd.f32 %v6144_v6, %v6013_v44 }
 0x542   : > { %v3088_v16 = vmax.f32 %v2997_v47, 0.0  ;;  %3043 = vmatmul.f32.gmra.mxu1 %v2797_v10  ;;  %v6259_v52 = vpop.f32.mrf.mxu0 }
 0x544   : > { %3160 = vmatmul.f32.gmra.mxu2 %v3088_v16  ;;  %v2721_v43 = vpop.f32.mrf.mxu3 }
 0x545   : > { %v2722_v54 = vadd.f32 %v2721_v43, %v2609_v62  ;;  %v2621_v62 = vadd.f32 %v2620_v2, %v2508_v49 }
 0x547   : > { %v2799_v12 = vmax.f32 %v2722_v54, 0.0  ;;  %v2999_v18 = vpop.f32.mrf.mxu1  ;;  %v2626_v43 = vpop.f32.mrf.mxu2 }
 0x548   : > { %v3000_v48 = vadd.f32 %v2999_v18, %v2887_v0 }
 0x54a   : > { %v3089_v53 = vmax.f32 %v3000_v48, 0.0  ;;  %3046 = vmatmul.f32.gmra.mxu1 %v2799_v12  ;;  %v6265_v54 = vpop.f32.mrf.mxu0  ;;  %v2624_v48 = vadd.f32 %v2623_v1, %v2511_v51 }
 0x54c   : > { %3163 = vmatmul.f32.gmra.mxu2 %v3089_v53  ;;  %v2724_v41 = vpop.f32.mrf.mxu3 }
 0x54d   : > { %v2725_v56 = vadd.f32 %v2724_v41, %v2612_v20 }
 0x54f   : > { %v2801_v63 = vmax.f32 %v2725_v56, 0.0  ;;  %v3002_v31 = vpop.f32.mrf.mxu1  ;;  %v2629_v20 = vpop.f32.mrf.mxu2  ;;  %v2902_v56 = vadd.f32 %v6227_v24, %v6237_v50 }
 0x550   : > { %v3003_v19 = vadd.f32 %v3002_v31, %v2890_v26 }
 0x552   : > { %v3090_v36 = vmax.f32 %v3003_v19, 0.0  ;;  %3049 = vmatmul.f32.gmra.mxu1 %v2801_v63  ;;  %v2916_v26 = vpop.f32.mrf.mxu0  ;;  %v2627_v63 = vadd.f32 %v2626_v43, %v2514_v17 }
 0x554   : > { %3166 = vmatmul.f32.gmra.mxu2 %v3090_v36  ;;  %v2727_v40 = vpop.f32.mrf.mxu3  ;;  %v2905_v36 = vadd.f32 %v6227_v24, %v6245_v60  ;;  %v2520_v60 = vadd.f32 %v6184_v46, %v6049_v3 }
 0x555   : > { %v2728_v35 = vadd.f32 %v2727_v40, %v2615_v14  ;;  %v2517_v14 = vadd.f32 %v6172_v57, %v6036_v55 }
 0x557   : > { %v2803_v21 = vmax.f32 %v2728_v35, 0.0  ;;  %v3005_v23 = vpop.f32.mrf.mxu1  ;;  %v2632_v50 = vpop.f32.mrf.mxu2  ;;  %v2630_v7 = vadd.f32 %v2629_v20, %v2517_v14 }
 0x558   : > { %v3006_v27 = vadd.f32 %v3005_v23, %v2893_v59 }
 0x55a   : > { %v3091_v30 = vmax.f32 %v3006_v27, 0.0  ;;  %3052 = vmatmul.f32.gmra.mxu1 %v2803_v21  ;;  %v2919_v59 = vpop.f32.mrf.mxu0  ;;  %v2908_v27 = vadd.f32 %v6227_v24, %v6253_v4  ;;  %v2523_v4 = vadd.f32 %v6196_v33, %v6057_v22 }
 0x55c   : > { %3169 = vmatmul.f32.gmra.mxu2 %v3091_v30  ;;  %v2730_v34 = vpop.f32.mrf.mxu3 }
 0x55d   : > { %v2731_v10 = vadd.f32 %v2730_v34, %v2618_v5 }
 0x55f   : > { %v2805_v47 = vmax.f32 %v2731_v10, 0.0  ;;  %v3008_v45 = vpop.f32.mrf.mxu1  ;;  %v2635_v57 = vpop.f32.mrf.mxu2  ;;  %v2633_v10 = vadd.f32 %v2632_v50, %v2520_v60  ;;  %v6299_v60 = vld [vmem:[#allocation12] ss:$0 sm:$0xff] }
 0x560   : > { %v3009_v29 = vadd.f32 %v3008_v45, %v2896_v37 }
 0x562   : > { %v3092_v16 = vmax.f32 %v3009_v29, 0.0  ;;  %3055 = vmatmul.f32.gmra.mxu1 %v2805_v47  ;;  %v2922_v5 = vpop.f32.mrf.mxu0  ;;  %v2911_v47 = vadd.f32 %v6227_v24, %v6259_v52  ;;  %v2526_v52 = vadd.f32 %v6207_v28, %v6070_v61 }
 0x564   : > { %3172 = vmatmul.f32.gmra.mxu2 %v3092_v16  ;;  %v2733_v32 = vpop.f32.mrf.mxu3  ;;  %v2636_v16 = vadd.f32 %v2635_v57, %v2523_v4 }
 0x565   : > { %v2734_v0 = vadd.f32 %v2733_v32, %v2621_v62 }
 0x567   : > { %v2807_v12 = vmax.f32 %v2734_v0, 0.0  ;;  %v3011_v25 = vpop.f32.mrf.mxu1  ;;  %v2638_v62 = vpop.f32.mrf.mxu2 }
 0x568   : > { %v3012_v42 = vadd.f32 %v3011_v25, %v2899_v11  ;;  %v2914_v11 = vadd.f32 %v6227_v24, %v6265_v54  ;;  %v2639_v25 = vadd.f32 %v2638_v62, %v2526_v52 }
 0x56a   : > { %v3093_v18 = vmax.f32 %v3012_v42, 0.0  ;;  %3058 = vmatmul.f32.gmra.mxu1 %v2807_v12  ;;  %v2925_v43 = vpop.f32.mrf.mxu0 }
 0x56c   : > { %3175 = vmatmul.f32.gmra.mxu2 %v3093_v18  ;;  %v2736_v53 = vpop.f32.mrf.mxu3 }
 0x56d   : > { %v2737_v41 = vadd.f32 %v2736_v53, %v2624_v48  ;;  %v2917_v53 = vadd.f32 %v6227_v24, %v2916_v26 }
 0x56f   : > { %v2809_v58 = vmax.f32 %v2737_v41, 0.0  ;;  %v3014_v2 = vpop.f32.mrf.mxu1  ;;  %v2641_v48 = vpop.f32.mrf.mxu2  ;;  %v2529_v41 = vadd.f32 %v6215_v13, %v6080_v38 }
 0x570   : > { %v3015_v44 = vadd.f32 %v3014_v2, %v2902_v56 }
 0x571   : > { %v2642_v28 = vadd.f32 %v2641_v48, %v2529_v41 }
 0x572   : > { %v3094_v6 = vmax.f32 %v3015_v44, 0.0  ;;  %3061 = vmatmul.f32.gmra.mxu1 %v2809_v58  ;;  %v2928_v20 = vpop.f32.mrf.mxu0  ;;  %v2920_v44 = vadd.f32 %v6227_v24, %v2919_v59 }
 0x574   : > { %3178 = vmatmul.f32.gmra.mxu2 %v3094_v6  ;;  %v2739_v31 = vpop.f32.mrf.mxu3  ;;  %v2532_v6 = vadd.f32 %v6225_v39, %v6090_v9  ;;  %v2926_v9 = vadd.f32 %v6227_v24, %v2925_v43 }
 0x575   : > { %v2740_v19 = vadd.f32 %v2739_v31, %v2627_v63 }
 0x577   : > { %v2811_v40 = vmax.f32 %v2740_v19, 0.0  ;;  %v3017_v35 = vpop.f32.mrf.mxu1  ;;  %v2644_v31 = vpop.f32.mrf.mxu2 }
 0x578   : > { %v3018_v15 = vadd.f32 %v3017_v35, %v2905_v36  ;;  %v2645_v13 = vadd.f32 %v2644_v31, %v2532_v6 }
 0x57a   : > { %v3095_v8 = vmax.f32 %v3018_v15, 0.0  ;;  %3064 = vmatmul.f32.gmra.mxu1 %v2811_v40  ;;  %v2931_v19 = vpop.f32.mrf.mxu0  ;;  %v2923_v40 = vadd.f32 %v6227_v24, %v2922_v5 }
 0x57c   : > { %3181 = vmatmul.f32.gmra.mxu2 %v3095_v8  ;;  %v2742_v21 = vpop.f32.mrf.mxu3 }
 0x57d   : > { %v2743_v23 = vadd.f32 %v2742_v21, %v2630_v7 }
 0x57f   : > { %v2813_v1 = vmax.f32 %v2743_v23, 0.0  ;;  %v3020_v30 = vpop.f32.mrf.mxu1 }
 0x580   : > { %v3021_v55 = vadd.f32 %v3020_v30, %v2908_v27 }
 0x582   : > { %v3096_v34 = vmax.f32 %v3021_v55, 0.0  ;;  %3067 = vmatmul.f32.gmra.mxu1 %v2813_v1  ;;  %v2934_v59 = vpop.f32.mrf.mxu0  ;;  %v2929_v1 = vadd.f32 %v6227_v24, %v2928_v20 }
 0x584   : > { %3184 = vmatmul.f32.gmra.mxu2 %v3096_v34  ;;  %v2745_v37 = vpop.f32.mrf.mxu3 }
 0x585   : > { %v2746_v49 = vadd.f32 %v2745_v37, %v2633_v10  ;;  %v2932_v37 = vadd.f32 %v6227_v24, %v2931_v19 }
 0x587   : > { %v2815_v45 = vmax.f32 %v2746_v49, 0.0  ;;  %v3023_v29 = vpop.f32.mrf.mxu1 }
 0x588   : > { %v3024_v3 = vadd.f32 %v3023_v29, %v2911_v47 }
 0x58a   : > { %v3097_v46 = vmax.f32 %v3024_v3, 0.0  ;;  %3070 = vmatmul.f32.gmra.mxu1 %v2815_v45  ;;  %v2937_v27 = vpop.f32.mrf.mxu0 }
 0x58c   : > { %3187 = vmatmul.f32.gmra.mxu2 %v3097_v46  ;;  %v2748_v32 = vpop.f32.mrf.mxu3 }
 0x58d   : > { %v2749_v0 = vadd.f32 %v2748_v32, %v2636_v16  ;;  %v2935_v16 = vadd.f32 %v6227_v24, %v2934_v59 }
 0x58f   : > { %v2817_v51 = vmax.f32 %v2749_v0, 0.0  ;;  %v3026_v12 = vpop.f32.mrf.mxu1 }
 0x590   : > { %v3027_v22 = vadd.f32 %v3026_v12, %v2914_v11  ;;  %v2938_v12 = vadd.f32 %v6227_v24, %v2937_v27 }
 0x592   : > { %v3098_v33 = vmax.f32 %v3027_v22, 0.0  ;;  %3073 = vmatmul.f32.gmra.mxu1 %v2817_v51  ;;  %v2940_v49 = vpop.f32.mrf.mxu0 }
 0x593   : > { %v2941_v20 = vadd.f32 %v6227_v24, %v2940_v49 }
 0x594   : > { %3190 = vmatmul.f32.gmra.mxu2 %v3098_v33  ;;  %v2751_v42 = vpop.f32.mrf.mxu3 }
 0x595   : > { %v2752_v18 = vadd.f32 %v2751_v42, %v2639_v25 }
 0x597   : > { %v2819_v54 = vmax.f32 %v2752_v18, 0.0  ;;  %v3029_v56 = vpop.f32.mrf.mxu1 }
 0x598   : > { %v3030_v17 = vadd.f32 %v3029_v56, %v2917_v53 }
 0x59a   : > { %v3099_v61 = vmax.f32 %v3030_v17, 0.0  ;;  %3076 = vmatmul.f32.gmra.mxu1 %v2819_v54  ;;  %v2943_v32 = vpop.f32.mrf.mxu0 }
 0x59c   : > { %3193 = vmatmul.f32.gmra.mxu2 %v3099_v61  ;;  %v2754_v58 = vpop.f32.mrf.mxu3 }
 0x59d   : > { %v2755_v2 = vadd.f32 %v2754_v58, %v2642_v28 }
 0x59f   : > { %v2821_v63 = vmax.f32 %v2755_v2, 0.0  ;;  %v3032_v26 = vpop.f32.mrf.mxu1  ;;  %v2944_v2 = vadd.f32 %v6227_v24, %v2943_v32 }
 0x5a0   : > { %v3033_v36 = vadd.f32 %v3032_v26, %v2920_v44 }
 0x5a2   : > { %v3100_v38 = vmax.f32 %v3033_v36, 0.0  ;;  %3079 = vmatmul.f32.gmra.mxu1 %v2821_v63  ;;  %v2946_v18 = vpop.f32.mrf.mxu0 }
 0x5a3   : > { %v2947_v36 = vadd.f32 %v6227_v24, %v2946_v18 }
 0x5a4   : > { %3196 = vmatmul.f32.gmra.mxu2 %v3100_v38  ;;  %v2757_v14 = vpop.f32.mrf.mxu3 }
 0x5a5   : > { %v2758_v50 = vadd.f32 %v2757_v14, %v2645_v13 }
 0x5a7   : > { %v2823_v35 = vmax.f32 %v2758_v50, 0.0  ;;  %v3035_v15 = vpop.f32.mrf.mxu1 }
 0x5a8   : > { %v3036_v8 = vadd.f32 %v3035_v15, %v2923_v40 }
 0x5aa   : > { %v3101_v7 = vmax.f32 %v3036_v8, 0.0  ;;  %3082 = vmatmul.f32.gmra.mxu1 %v2823_v35  ;;  %v2949_v58 = vpop.f32.mrf.mxu0 }
 0x5ab   : > { %v2950_v8 = vadd.f32 %v6227_v24, %v2949_v58 }
 0x5ac   : > { %3199 = vmatmul.f32.gmra.mxu2 %v3101_v7 }
 0x5af   : > { %v3038_v39 = vpop.f32.mrf.mxu1 }
 0x5b0   : > { %v3039_v21 = vadd.f32 %v3038_v39, %v2926_v9 }
 0x5b2   : > { %v3102_v23 = vmax.f32 %v3039_v21, 0.0  ;;  %v2952_v38 = vpop.f32.mrf.mxu0 }
 0x5b4   : > { %3202 = vmatmul.f32.gmra.mxu2 %v3102_v23 }
 0x5b7   : > { %v3041_v30 = vpop.f32.mrf.mxu1  ;;  %v3155_v55 = vpop.f32.mrf.mxu2 }
 0x5b8   : > { %v3042_v57 = vadd.f32 %v3041_v30, %v2929_v1  ;;  %v3156_v5 = vadd.f32 %v6299_v60, %v3155_v55  ;;  %v2953_v1 = vadd.f32 %v6227_v24, %v2952_v38 }
 0x5ba   : > { %v3103_v34 = vmax.f32 %v3042_v57, 0.0  ;;  %v3251_v10 = vmax.f32 %v3156_v5, 0.0  ;;  %v2955_v9 = vpop.f32.mrf.mxu0 }
 0x5bb   : > { %v2956_v49 = vadd.f32 %v6227_v24, %v2955_v9  ;;  %v3349_v9 = vld [vmem:[%s6424_s7 + $0x10] sm:$0xff] }
 0x5bc   : > { %3205 = vmatmul.f32.gmra.mxu2 %v3103_v34  ;;  %3283 = vxpose.xlu0.b32.start [1/16] (narrow) %v3251_v10, 64 }
 0x5bf   : > { %v3044_v47 = vpop.f32.mrf.mxu1  ;;  %v3158_v4 = vpop.f32.mrf.mxu2 }
 0x5c0   : > { %v3045_v45 = vadd.f32 %v3044_v47, %v2932_v37  ;;  %v3159_v29 = vadd.f32 %v6299_v60, %v3158_v4 }
 0x5c2   : > { %v3104_v3 = vmax.f32 %v3045_v45, 0.0  ;;  %v3252_v46 = vmax.f32 %v3159_v29, 0.0  ;;  %v2958_v34 = vpop.f32.mrf.mxu0 }
 0x5c4   : > { %3208 = vmatmul.f32.gmra.mxu2 %v3104_v3  ;;  %3284 = vxpose.xlu0.b32.cont [2/16] (narrow) %v3252_v46, 64 }
 0x5c7   : > { %v3047_v62 = vpop.f32.mrf.mxu1  ;;  %v3161_v43 = vpop.f32.mrf.mxu2 }
 0x5c8   : > { %v3048_v0 = vadd.f32 %v3047_v62, %v2935_v16  ;;  %v3162_v11 = vadd.f32 %v6299_v60, %v3161_v43  ;;  %v2959_v62 = vadd.f32 %v6227_v24, %v2958_v34 }
 0x5ca   : > { %v3105_v52 = vmax.f32 %v3048_v0, 0.0  ;;  %v3253_v51 = vmax.f32 %v3162_v11, 0.0  ;;  %v2961_v16 = vpop.f32.mrf.mxu0 }
 0x5cc   : > { %3211 = vmatmul.f32.gmra.mxu2 %v3105_v52  ;;  %3285 = vxpose.xlu0.b32.cont [3/16] (narrow) %v3253_v51, 64 }
 0x5cf   : > { %v3050_v22 = vpop.f32.mrf.mxu1  ;;  %v3164_v33 = vpop.f32.mrf.mxu2 }
 0x5d0   : > { %v3051_v25 = vadd.f32 %v3050_v22, %v2938_v12  ;;  %v3165_v42 = vadd.f32 %v6299_v60, %v3164_v33  ;;  %v2962_v12 = vadd.f32 %v6227_v24, %v2961_v16 }
 0x5d2   : > { %v3106_v48 = vmax.f32 %v3051_v25, 0.0  ;;  %v3254_v53 = vmax.f32 %v3165_v42, 0.0  ;;  %v2964_v22 = vpop.f32.mrf.mxu0 }
 0x5d4   : > { %3214 = vmatmul.f32.gmra.mxu2 %v3106_v48  ;;  %3286 = vxpose.xlu0.b32.cont [4/16] (narrow) %v3254_v53, 64 }
 0x5d7   : > { %v3053_v41 = vpop.f32.mrf.mxu1  ;;  %v3167_v54 = vpop.f32.mrf.mxu2 }
 0x5d8   : > { %v3054_v56 = vadd.f32 %v3053_v41, %v2941_v20  ;;  %v3168_v17 = vadd.f32 %v6299_v60, %v3167_v54  ;;  %v2965_v20 = vadd.f32 %v6227_v24, %v2964_v22 }
 0x5da   : > { %v3107_v61 = vmax.f32 %v3054_v56, 0.0  ;;  %v3255_v28 = vmax.f32 %v3168_v17, 0.0  ;;  %v3347_v56 = vld [vmem:[%s6424_s7] sm:$0xff]  ;;  %v2967_v58 = vpop.f32.mrf.mxu0 }
 0x5dc   : > { %3217 = vmatmul.f32.gmra.mxu2 %v3107_v61  ;;  %3287 = vxpose.xlu0.b32.cont [5/16] (narrow) %v3255_v28, 64  ;;  %v4344_v28 = vmov 0  }
 0x5dd   : > { %3804 = vset.pattern.permute.xlu2 %v4344_v28 }
 0x5de   : > { %3357 = vperm.xlu2 %3804, %v3347_v56  }
 0x5df   : > { %v3056_v44 = vpop.f32.mrf.mxu1  ;;  %v3170_v6 = vpop.f32.mrf.mxu2 }
 0x5e0   : > { %v3057_v63 = vadd.f32 %v3056_v44, %v2944_v2  ;;  %v3171_v26 = vadd.f32 %v6299_v60, %v3170_v6  ;;  %v2968_v6 = vadd.f32 %v6227_v24, %v2967_v58 }
 0x5e2   : > { %v3108_v31 = vmax.f32 %v3057_v63, 0.0  ;;  %v3256_v19 = vmax.f32 %v3171_v26, 0.0 }
 0x5e4   : > { %3220 = vmatmul.f32.gmra.mxu2 %v3108_v31  ;;  %3288 = vxpose.xlu0.b32.cont [6/16] (narrow) %v3256_v19, 64 }
 0x5e7   : > { %v3059_v13 = vpop.f32.mrf.mxu1  ;;  %v3173_v14 = vpop.f32.mrf.mxu2 }
 0x5e8   : > { %v3060_v50 = vadd.f32 %v3059_v13, %v2947_v36  ;;  %v3174_v40 = vadd.f32 %v6299_v60, %v3173_v14  ;;  %v3348_v13 = vld [vmem:[%s6424_s7 + $0x8] sm:$0xff]  ;;  %v2970_v14 = vpop.f32.mrf.mxu0 }
 0x5e9   : > { %3362 = vperm.xlu2 %3804, %v3348_v13  }
 0x5ea   : > { %v3109_v35 = vmax.f32 %v3060_v50, 0.0  ;;  %v3257_v15 = vmax.f32 %v3174_v40, 0.0  ;;  %v2971_v50 = vadd.f32 %v6227_v24, %v2970_v14  ;;  %v3350_v24 = vld [vmem:[%s6424_s7 + $0x18] sm:$0xff] }
 0x5ec   : > { %3223 = vmatmul.f32.gmra.mxu2 %v3109_v35  ;;  %3289 = vxpose.xlu0.b32.cont [7/16] (narrow) %v3257_v15, 64 }
 0x5ef   : > { %v3062_v59 = vpop.f32.mrf.mxu1  ;;  %v3176_v7 = vpop.f32.mrf.mxu2 }
 0x5f0   : > { %v3063_v39 = vadd.f32 %v3062_v59, %v2950_v8  ;;  %v3177_v21 = vadd.f32 %v6299_v60, %v3176_v7 }
 0x5f1   : > { %3367 = vperm.xlu2 %3804, %v3349_v9  }
 0x5f2   : > { %v3110_v23 = vmax.f32 %v3063_v39, 0.0  ;;  %v3258_v27 = vmax.f32 %v3177_v21, 0.0 }
 0x5f4   : > { %3226 = vmatmul.f32.gmra.mxu2 %v3110_v23  ;;  %3290 = vxpose.xlu0.b32.cont [8/16] (narrow) %v3258_v27, 64 }
 0x5f7   : > { %v3065_v30 = vpop.f32.mrf.mxu1  ;;  %v3179_v55 = vpop.f32.mrf.mxu2 }
 0x5f8   : > { %v3066_v57 = vadd.f32 %v3065_v30, %v2953_v1  ;;  %v3180_v5 = vadd.f32 %v6299_v60, %v3179_v55  ;;  %v3351_v55 = vld [vmem:[%s6424_s7 + $0x20] sm:$0xff] }
 0x5f9   : > { %3372 = vperm.xlu2 %3804, %v3350_v24  }
 0x5fa   : > { %v3111_v10 = vmax.f32 %v3066_v57, 0.0  ;;  %v3259_v37 = vmax.f32 %v3180_v5, 0.0 }
 0x5fc   : > { %3229 = vmatmul.f32.gmra.mxu2 %v3111_v10  ;;  %3291 = vxpose.xlu0.b32.cont [9/16] (narrow) %v3259_v37, 64  ;;  %v3352_v10 = vld [vmem:[%s6424_s7 + $0x28] sm:$0xff] }
 0x5ff   : > { %v3068_v47 = vpop.f32.mrf.mxu1  ;;  %v3182_v4 = vpop.f32.mrf.mxu2 }
 0x600   : > { %v3069_v45 = vadd.f32 %v3068_v47, %v2956_v49  ;;  %v3183_v29 = vadd.f32 %v6299_v60, %v3182_v4  ;;  %v3353_v4 = vld [vmem:[%s6424_s7 + $0x30] sm:$0xff] }
 0x601   : > { %3377 = vperm.xlu2 %3804, %v3351_v55  }
 0x602   : > { %v3112_v3 = vmax.f32 %v3069_v45, 0.0  ;;  %v3260_v46 = vmax.f32 %v3183_v29, 0.0 }
 0x604   : > { %3232 = vmatmul.f32.gmra.mxu2 %v3112_v3  ;;  %3292 = vxpose.xlu0.b32.cont [10/16] (narrow) %v3260_v46, 64  ;;  %v3354_v46 = vld [vmem:[%s6424_s7 + $0x38] sm:$0xff] }
 0x607   : > { %v3071_v43 = vpop.f32.mrf.mxu1  ;;  %v3185_v32 = vpop.f32.mrf.mxu2 }
 0x608   : > { %v3072_v0 = vadd.f32 %v3071_v43, %v2959_v62  ;;  %v3186_v11 = vadd.f32 %v6299_v60, %v3185_v32 }
 0x609   : > { %3382 = vperm.xlu2 %3804, %v3352_v10  }
 0x60a   : > { %v3113_v52 = vmax.f32 %v3072_v0, 0.0  ;;  %v3261_v51 = vmax.f32 %v3186_v11, 0.0 }
 0x60c   : > { %3235 = vmatmul.f32.gmra.mxu2 %v3113_v52  ;;  %3293 = vxpose.xlu0.b32.cont [11/16] (narrow) %v3261_v51, 64 }
 0x60f   : > { %v3074_v33 = vpop.f32.mrf.mxu1  ;;  %v3188_v25 = vpop.f32.mrf.mxu2 }
 0x610   : > { %v3075_v42 = vadd.f32 %v3074_v33, %v2962_v12  ;;  %v3189_v18 = vadd.f32 %v6299_v60, %v3188_v25 }
 0x611   : > { %3387 = vperm.xlu2 %3804, %v3353_v4  }
 0x612   : > { %v3114_v48 = vmax.f32 %v3075_v42, 0.0  ;;  %v3262_v53 = vmax.f32 %v3189_v18, 0.0 }
 0x614   : > { %3238 = vmatmul.f32.gmra.mxu2 %v3114_v48  ;;  %3294 = vxpose.xlu0.b32.cont [12/16] (narrow) %v3262_v53, 64 }
 0x617   : > { %v3077_v41 = vpop.f32.mrf.mxu1  ;;  %v3191_v54 = vpop.f32.mrf.mxu2 }
 0x618   : > { %v3078_v17 = vadd.f32 %v3077_v41, %v2965_v20  ;;  %v3192_v61 = vadd.f32 %v6299_v60, %v3191_v54 }
 0x619   : > { %3392 = vperm.xlu2 %3804, %v3354_v46  }
 0x61a   : > { %v3115_v2 = vmax.f32 %v3078_v17, 0.0  ;;  %v3263_v44 = vmax.f32 %v3192_v61, 0.0 }
 0x61c   : > { %3241 = vmatmul.f32.gmra.mxu2 %v3115_v2  ;;  %3295 = vxpose.xlu0.b32.cont [13/16] (narrow) %v3263_v44, 64 }
 0x61f   : > { %v3080_v63 = vpop.f32.mrf.mxu1  ;;  %v3194_v26 = vpop.f32.mrf.mxu2 }
 0x620   : > { %v3081_v31 = vadd.f32 %v3080_v63, %v2968_v6  ;;  %v3195_v19 = vadd.f32 %v6299_v60, %v3194_v26 }
 0x622   : > { %v3116_v36 = vmax.f32 %v3081_v31, 0.0  ;;  %v3264_v38 = vmax.f32 %v3195_v19, 0.0 }
 0x624   : > { %3244 = vmatmul.f32.gmra.mxu2 %v3116_v36  ;;  %3296 = vxpose.xlu0.b32.cont [14/16] (narrow) %v3264_v38, 64 }
 0x627   : > { %v3083_v40 = vpop.f32.mrf.mxu1  ;;  %v3197_v35 = vpop.f32.mrf.mxu2 }
 0x628   : > { %v3084_v15 = vadd.f32 %v3083_v40, %v2971_v50  ;;  %v3198_v8 = vadd.f32 %v6299_v60, %v3197_v35 }
 0x62a   : > { %v3117_v59 = vmax.f32 %v3084_v15, 0.0  ;;  %v3265_v7 = vmax.f32 %v3198_v8, 0.0 }
 0x62c   : > { %3247 = vmatmul.f32.gmra.mxu2 %v3117_v59  ;;  %3297 = vxpose.xlu0.b32.cont [15/16] (narrow) %v3265_v7, 64 }
 0x62f   : > { %v3200_v39 = vpop.f32.mrf.mxu2 }
 0x630   : > { %v3201_v21 = vadd.f32 %v6299_v60, %v3200_v39 }
 0x632   : > { %v3266_v23 = vmax.f32 %v3201_v21, 0.0 }
 0x634   : > { %3298 = vxpose.xlu0.b32.end [16/16] (narrow) %v3266_v23, 64 }
 0x637   : > { %v3203_v27 = vpop.f32.mrf.mxu2 }
 0x638   : > { %v3204_v1 = vadd.f32 %v6299_v60, %v3203_v27  ;;  %v3358_v14 = vpop.permute.xlu2 %3357 }
 0x63a   : > { %v3267_v30 = vmax.f32 %v3204_v1, 0.0 }
 0x63c   : > { %3315 = vxpose.xlu1.b32.start [1/16] (narrow) %v3267_v30, 64 }
 0x63f   : > { %v3206_v57 = vpop.f32.mrf.mxu2 }
 0x640   : > { %v3207_v5 = vadd.f32 %v6299_v60, %v3206_v57 }
 0x642   : > { %v3268_v34 = vmax.f32 %v3207_v5, 0.0 }
 0x643   : > { %v3363_v8 = vpop.permute.xlu2 %3362 }
 0x644   : > { %3316 = vxpose.xlu1.b32.cont [2/16] (narrow) %v3268_v34, 64 }
 0x647   : > { %v3209_v37 = vpop.f32.mrf.mxu2 }
 0x648   : > { %v3210_v49 = vadd.f32 %v6299_v60, %v3209_v37 }
 0x64a   : > { %v3269_v47 = vmax.f32 %v3210_v49, 0.0 }
 0x64b   : > { %v3368_v59 = vpop.permute.xlu2 %3367 }
 0x64c   : > { %3317 = vxpose.xlu1.b32.cont [3/16] (narrow) %v3269_v47, 64 }
 0x64f   : > { %v3212_v45 = vpop.f32.mrf.mxu2 }
 0x650   : > { %v3213_v29 = vadd.f32 %v6299_v60, %v3212_v45 }
 0x652   : > { %v3270_v3 = vmax.f32 %v3213_v29, 0.0 }
 0x653   : > { %v3373_v9 = vpop.permute.xlu2 %3372 }
 0x654   : > { %3318 = vxpose.xlu1.b32.cont [4/16] (narrow) %v3270_v3, 64 }
 0x657   : > { %v3215_v16 = vpop.f32.mrf.mxu2 }
 0x658   : > { %v3216_v62 = vadd.f32 %v6299_v60, %v3215_v16 }
 0x65a   : > { %v3271_v43 = vmax.f32 %v3216_v62, 0.0 }
 0x65b   : > { %v3378_v21 = vpop.permute.xlu2 %3377 }
 0x65c   : > { %3319 = vxpose.xlu1.b32.cont [5/16] (narrow) %v3271_v43, 64 }
 0x65f   : > { %v3218_v32 = vpop.f32.mrf.mxu2 }
 0x660   : > { %v3219_v0 = vadd.f32 %v6299_v60, %v3218_v32  ;;  %v3299_v50 = vpop.trf.xlu0 }
 0x661   : > { %v3395_v24 = vmul.f32 %v3358_v14, %v3299_v50 }
 0x662   : > { %v3272_v11 = vmax.f32 %v3219_v0, 0.0 }
 0x663   : > { %v3383_v1 = vpop.permute.xlu2 %3382 }
 0x664   : > { %3320 = vxpose.xlu1.b32.cont [6/16] (narrow) %v3272_v11, 64 }
 0x667   : > { %v3221_v52 = vpop.f32.mrf.mxu2 }
 0x668   : > { %v3222_v51 = vadd.f32 %v6299_v60, %v3221_v52 }
 0x66a   : > { %v3273_v12 = vmax.f32 %v3222_v51, 0.0 }
 0x66b   : > { %v3388_v37 = vpop.permute.xlu2 %3387 }
 0x66c   : > { %3321 = vxpose.xlu1.b32.cont [7/16] (narrow) %v3273_v12, 64 }
 0x66f   : > { %v3224_v22 = vpop.f32.mrf.mxu2 }
 0x670   : > { %v3225_v33 = vadd.f32 %v6299_v60, %v3224_v22 }
 0x672   : > { %v3274_v25 = vmax.f32 %v3225_v33, 0.0 }
 0x673   : > { %v3393_v62 = vpop.permute.xlu2 %3392 }
 0x674   : > { %3322 = vxpose.xlu1.b32.cont [8/16] (narrow) %v3274_v25, 64 }
 0x677   : > { %v3227_v42 = vpop.f32.mrf.mxu2 }
 0x678   : > { %v3228_v18 = vadd.f32 %v6299_v60, %v3227_v42 }
 0x67a   : > { %v3275_v48 = vmax.f32 %v3228_v18, 0.0 }
 0x67c   : > { %3323 = vxpose.xlu1.b32.cont [9/16] (narrow) %v3275_v48, 64 }
 0x67f   : > { %v3230_v53 = vpop.f32.mrf.mxu2 }
 0x680   : > { %v3231_v20 = vadd.f32 %v6299_v60, %v3230_v53 }
 0x682   : > { %v3276_v41 = vmax.f32 %v3231_v20, 0.0 }
 0x684   : > { %3324 = vxpose.xlu1.b32.cont [10/16] (narrow) %v3276_v41, 64 }
 0x687   : > { %v3233_v54 = vpop.f32.mrf.mxu2 }
 0x688   : > { %v3234_v56 = vadd.f32 %v6299_v60, %v3233_v54 }
 0x68a   : > { %v3277_v17 = vmax.f32 %v3234_v56, 0.0 }
 0x68c   : > { %3325 = vxpose.xlu1.b32.cont [11/16] (narrow) %v3277_v17, 64 }
 0x68f   : > { %v3236_v61 = vpop.f32.mrf.mxu2 }
 0x690   : > { %v3237_v58 = vadd.f32 %v6299_v60, %v3236_v61 }
 0x692   : > { %v3278_v2 = vmax.f32 %v3237_v58, 0.0 }
 0x694   : > { %3326 = vxpose.xlu1.b32.cont [12/16] (narrow) %v3278_v2, 64  ;;  %v3438_v2 = vstv %s6374_s19 }
 0x697   : > { %v3239_v44 = vpop.f32.mrf.mxu2 }
 0x698   : > { %v3240_v6 = vadd.f32 %v6299_v60, %v3239_v44 }
 0x69a   : > { %v3279_v63 = vmax.f32 %v3240_v6, 0.0 }
 0x69b   : > { %3805 = vset.pattern.permute.xlu0 %v4344_v28  ;;  %v3300_v28 = vpop.trf.xlu0 }
 0x69c   : > { %3327 = vxpose.xlu1.b32.cont [13/16] (narrow) %v3279_v63, 64  ;;  %v3397_v27 = vmul.f32 %v3363_v8, %v3300_v28 }
 0x69e   : > { %v3411_v57 = vadd.f32 %v3397_v27, %v3395_v24 }
 0x69f   : > { %v3242_v26 = vpop.f32.mrf.mxu2 }
 0x6a0   : > { %v3243_v31 = vadd.f32 %v6299_v60, %v3242_v26 }
 0x6a2   : > { %v3280_v19 = vmax.f32 %v3243_v31, 0.0 }
 0x6a3   : > { %v3301_v7 = vpop.trf.xlu0 }
 0x6a4   : > { %3328 = vxpose.xlu1.b32.cont [14/16] (narrow) %v3280_v19, 64  ;;  %v3399_v5 = vmul.f32 %v3368_v59, %v3301_v7 }
 0x6a6   : > { %v3412_v34 = vadd.f32 %v3411_v57, %v3399_v5 }
 0x6a7   : > { %v3245_v36 = vpop.f32.mrf.mxu2 }
 0x6a8   : > { %v3246_v38 = vadd.f32 %v6299_v60, %v3245_v36 }
 0x6aa   : > { %v3281_v13 = vmax.f32 %v3246_v38, 0.0 }
 0x6ab   : > { %v3302_v39 = vpop.trf.xlu0 }
 0x6ac   : > { %3329 = vxpose.xlu1.b32.cont [15/16] (narrow) %v3281_v13, 64  ;;  %v3401_v10 = vmul.f32 %v3373_v9, %v3302_v39 }
 0x6ae   : > { %v3413_v47 = vadd.f32 %v3412_v34, %v3401_v10 }
 0x6af   : > { %v3248_v40 = vpop.f32.mrf.mxu2 }
 0x6b0   : > { %v3249_v35 = vadd.f32 %v6299_v60, %v3248_v40 }
 0x6b2   : > { %v3282_v15 = vmax.f32 %v3249_v35, 0.0 }
 0x6b3   : > { %v3303_v23 = vpop.trf.xlu0 }
 0x6b4   : > { %3330 = vxpose.xlu1.b32.end [16/16] (narrow) %v3282_v15, 64  ;;  %v3403_v4 = vmul.f32 %v3378_v21, %v3303_v23 }
 0x6b6   : > { %v3414_v45 = vadd.f32 %v3413_v47, %v3403_v4 }
 0x6bb   : > { %v3304_v30 = vpop.trf.xlu0 }
 0x6bc   : > { %v3405_v29 = vmul.f32 %v3383_v1, %v3304_v30 }
 0x6be   : > { %v3415_v46 = vadd.f32 %v3414_v45, %v3405_v29 }
 0x6c3   : > { %v3305_v49 = vpop.trf.xlu0 }
 0x6c4   : > { %v3407_v16 = vmul.f32 %v3388_v37, %v3305_v49 }
 0x6c6   : > { %v3416_v32 = vadd.f32 %v3415_v46, %v3407_v16 }
 0x6cb   : > { %v3306_v43 = vpop.trf.xlu0 }
 0x6cc   : > { %v3409_v0 = vmul.f32 %v3393_v62, %v3306_v43 }
 0x6ce   : > { %v3417_v52 = vadd.f32 %v3416_v32, %v3409_v0 }
 0x6d0   : > { %v3418_v51 = vrot.slane %v3417_v52, 4 }
 0x6d2   : > { %v3419_v22 = vadd.f32 %v3418_v51, %v3417_v52 }
 0x6d4   : > { %v3420_v33 = vrot.slane %v3419_v22, 2 }
 0x6d6   : > { %v3421_v42 = vadd.f32 %v3420_v33, %v3419_v22 }
 0x6d8   : > { %v3422_v20 = vrot.slane %v3421_v42, 1 }
 0x6da   : > { %v3423_v58 = vadd.f32 %v3422_v20, %v3421_v42 }
 0x6dc   : > { %v3439_v31 = vadd.f32 %v3438_v2, %v3423_v58 }
 0x6de   : > { %v3644_v50 = vmul.f32 -1.442695, %v3439_v31 }
 0x6e0   : > { %v3331_v55 = vpop.trf.xlu1  ;;  %3808 = vpow2.f32 %v3644_v50 }
 0x6e1   : > { %v3396_v48 = vmul.f32 %v3358_v14, %v3331_v55 }
 0x6e6   : > { %v3809_v28 = vpop.eup %3808 }
 0x6e7   : > { %v3447_v7 = vadd.f32 1.0, %v3809_v28 }
 0x6e8   : > { %v3332_v60 = vpop.trf.xlu1 }
 0x6e9   : > { %v3398_v18 = vmul.f32 %v3363_v8, %v3332_v60  ;;  %3810 = vrcp.f32 %v3447_v7  ;;  %vm3454_vm0 = vweird.f32 %v3447_v7  ;;  %v3460_v60 = vand.u32 2147483648, %v3447_v7 }
 0x6ea   : > { %v3458_v49 = vand.u32 2147483647, %v3447_v7 }
 0x6eb   : > { %v3424_v41 = vadd.f32 %v3398_v18, %v3396_v48  ;;  %v3461_v46 = vor.u32 1.1754944e-38, %v3460_v60 }
 0x6ec   : > { %vm3459_vm6 = vcmp.eq.f32.partialorder %v3458_v49, 8.507059e+37 }
 0x6ef   : > { %v3811_v23 = vpop.eup %3810 }
 0x6f0   : > { %v3333_v3 = vpop.trf.xlu1  ;;  %vm3455_vm1 = vweird.f32 %v3811_v23 }
 0x6f1   : > { %v3400_v53 = vmul.f32 %v3368_v59, %v3333_v3  ;;  %vm6379_vm3 = vmor %vm3454_vm0, %vm3455_vm1  ;;  %v3485_v3 = vlaneseq }
 0x6f3   : > { %v3425_v17 = vadd.f32 %v3424_v41, %v3400_v53  ;;  %vm3487_vm9 = vcmp.lt.s32.totalorder %v3485_v3, 256 }
 0x6f8   : > { %v3334_v11 = vpop.trf.xlu1 }
 0x6f9   : > { %v3402_v54 = vmul.f32 %v3373_v9, %v3334_v11 }
 0x6fb   : > { %v3426_v44 = vadd.f32 %v3425_v17, %v3402_v54 }
 0x700   : > { %v3335_v12 = vpop.trf.xlu1 }
 0x701   : > { %v3404_v61 = vmul.f32 %v3378_v21, %v3335_v12 }
 0x703   : > { %v3427_v63 = vadd.f32 %v3426_v44, %v3404_v61 }
 0x708   : > { %v3336_v25 = vpop.trf.xlu1 }
 0x709   : > { %v3406_v6 = vmul.f32 %v3383_v1, %v3336_v25  ;;  %v3450_v1 = vmul.f32 %v3811_v23, %v3447_v7 }
 0x70b   : > { %v3428_v19 = vadd.f32 %v3427_v63, %v3406_v6  ;;  %v3451_v30 = vsub.f32 1.0, %v3450_v1 }
 0x70d   : > { %v3452_v57 = vmul.f32 %v3811_v23, %v3451_v30 }
 0x70f   : > { %v3453_v10 = vadd.f32 %v3811_v23, %v3452_v57 }
 0x710   : > { %v3337_v56 = vpop.trf.xlu1 }
 0x711   : > { %v3408_v26 = vmul.f32 %v3388_v37, %v3337_v56 }
 0x713   : > { %v3429_v38 = vadd.f32 %v3428_v19, %v3408_v26 }
 0x718   : > { %v3338_v36 = vpop.trf.xlu1 }
 0x719   : > { %v3410_v13 = vmul.f32 %v3393_v62, %v3338_v36  ;;  %v3457_v62 = vsel %vm6379_vm3, %v3811_v23, %v3453_v10 }
 0x71a   : > { %v3462_v11 = vsel %vm3459_vm6, %v3461_v46, %v3457_v62 }
 0x71b   : > { %v3430_v14 = vadd.f32 %v3429_v38, %v3410_v13 }
 0x71d   : > { %v3431_v40 = vrot.slane %v3430_v14, 4 }
 0x71f   : > { %v3432_v35 = vadd.f32 %v3431_v40, %v3430_v14 }
 0x721   : > { %v3433_v15 = vrot.slane %v3432_v35, 2 }
 0x723   : > { %v3434_v8 = vadd.f32 %v3433_v15, %v3432_v35 }
 0x725   : > { %v3435_v59 = vrot.slane %v3434_v8, 1 }
 0x727   : > { %v3436_v9 = vadd.f32 %v3435_v59, %v3434_v8 }
 0x729   : > { %v3440_v39 = vadd.f32 %v3438_v2, %v3436_v9 }
 0x72b   : > { %v3645_v21 = vmul.f32 -1.442695, %v3440_v39 }
 0x72d   : > { %3812 = vpow2.f32 %v3645_v21 }
 0x733   : > { %v3813_v24 = vpop.eup %3812 }
 0x734   : > { %v3448_v27 = vadd.f32 1.0, %v3813_v24 }
 0x736   : > { %3814 = vrcp.f32 %v3448_v27  ;;  %v3475_v37 = vand.u32 2147483648, %v3448_v27  ;;  %v3473_v4 = vand.u32 2147483647, %v3448_v27  ;;  %vm3469_vm4 = vweird.f32 %v3448_v27 }
 0x738   : > { %v3476_v16 = vor.u32 1.1754944e-38, %v3475_v37  ;;  %vm3474_vm7 = vcmp.eq.f32.partialorder %v3473_v4, 8.507059e+37 }
 0x73c   : > { %v3815_v55 = vpop.eup %3814 }
 0x73d   : > { %v3465_v5 = vmul.f32 %v3815_v55, %v3448_v27  ;;  %vm3470_vm2 = vweird.f32 %v3815_v55 }
 0x73e   : > { %vm3471_vm5 = vmor %vm3469_vm4, %vm3470_vm2 }
 0x73f   : > { %v3466_v34 = vsub.f32 1.0, %v3465_v5 }
 0x741   : > { %v3467_v47 = vmul.f32 %v3815_v55, %v3466_v34 }
 0x743   : > { %v3468_v29 = vadd.f32 %v3815_v55, %v3467_v47 }
 0x745   : > { %v3472_v43 = vsel %vm3471_vm5, %v3815_v55, %v3468_v29 }
 0x746   : > { %v3477_v32 = vsel %vm3474_vm7, %v3476_v16, %v3472_v43 }
 0x747   : > { %v3481_v0 = vrot.slane %v3477_v32, 7 }
 0x749   : > { %v3483_v52 = vsel %vm3482_vm8, %v3462_v11, %v3481_v0 }
 0x74a   : > { %3489 = vst.msk [vmem:[%s431_s17] sm:$0x3] %vm3487_vm9, %v3483_v52 }
 0x74b   : > { %4280 = shalt.err (!%p4277_p9)
}
 0x74c   : > { %3722 = dma.vmem_to_hbm [thread:$0]  (%p4488_p0), %s3504_s16, 32, %s3506_s29, %s3491_s26  }
 0x74d PF: > { %s3517_s15 = sand.u32 1, %s4319_s11   ;;  %p6662_p10 = scmp.ge.s32.totalorder %s4331_s14, 2 }
 0x74e   : > { %s3518_s10 = scalar_lea.sflag [#allocation5], %s3517_s15 }
 0x74f   : > { %p3745_p11 = pnand %p6662_p10, %p4494_p6 }
 0x751   : > { %p3746_p12 = pneg %p3745_p11 }
 0x753   : > { %4314 = dma.done.wait (%p3746_p12), %s3518_s10, 32  }
 0x754   : > { %4316 = vsyncadd (%p3746_p12), %s3518_s10, 4294967264  ;;  %p26_p2 = scmp.ge.s32.totalorder %s4464_s8, 4   ;;  %s6663_s11 = smov %s4323_s12 }
 0x755   : > { %s6664_s12 = smov %s4327_s13  ;;  %s6665_s13 = smov %s4476_s21 }
 0x756   : > { %s6666_s14 = smov %s4464_s8  ;;  %28 = sbr.rel (!%p26_p2) target bundleno = 13 (0xd), region = 121 }
 0x75b   :  { %3524 = vsyncpa [#allocation4], 1 }
 0x75c   :  { %3526 = vsyncpa [#allocation4 + $0x1], 1 }
 0x75d   :  { %3527 = vsyncpa [#allocation7], 1 }
 0x75e   :  { %3528 = vsyncpa [#allocation10], 1 }
 0x75f   :  { %3529 = vsyncpa [#allocation13], 1 }
 0x760   :  { %3530 = vsyncpa [#allocation5], 1 }
 0x761   :  { %3532 = vsyncpa [#allocation5 + $0x1], 1 }

</bundles_post_ra>
